<compile_context>
chip_gen: v7x
topology: tpu7x:2x2x1
jax: 0.10.0
libtpu: 0.0.40
codegen_flags: <defaults>
</compile_context>

<pallas_src>
import random

import jax
import jax.numpy as jnp
from jax.experimental import pallas as pl
from jax.experimental.pallas import tpu as pltpu

# ---------------------------------------------------------------------------
# Constants implied by the module's hard-coded reshapes.
C_IN = 256
C_OUT = 256
H = 14
W = 14
KW = 3                       # conv taps along w (unfold kernel (3,1), padding (1,0))
L = 2                        # "sub-output" dim of the weight
WP = W + 2                   # zero-padded width
M_ROWS = H * WP              # 224 output rows in flat (H, W+2) layout
N_ROWS = 248                 # LHS rows: 224 + 16 wrap rows + zero tail (mult. of 8)
SHIFTS = (0, 1, 2, WP, WP + 1, WP + 2)   # result-row shift per fused K block
N_BLK = 128                  # C_OUT tile: lane-dense stores, 2 TCs on v7x

# Deterministic stand-in for the module's per-instance
# `(random.random() > 0.5) * 2 - 1` (documented behavioural divergence).
random.seed(0)
SHIFT_DIRECTION = (random.random() > 0.5) * 2 - 1


# ---------------------------------------------------------------------------
# Kernel: 6 accumulating MXU dots with an aligned LHS; row shifts on the small
# f32 results (VPU), single lane-dense (224, 128) store per grid step.
def _shifted_matmul_kernel(x_ref, w_ref, o_ref):
    x = x_ref[...]                                       # (N_ROWS, C_IN)
    acc = None
    for i, s in enumerate(SHIFTS):
        z = jnp.dot(x, w_ref[i], preferred_element_type=jnp.float32)  # (N_ROWS, N_BLK)
        zs = z[s:s + M_ROWS, :]                          # static row-shifted slice
        acc = zs if acc is None else acc + zs
    o_ref[...] = acc


# ---------------------------------------------------------------------------
def fuse_weight(weight, compute_dtype=jnp.bfloat16):
    """Precompute (ONCE, at init) the fused weight (6, C_IN, C_OUT).

    K blocks are ordered to match SHIFTS: shifts {0,1,2} pair with l=1 taps,
    shifts {16,17,18} pair with l=0 taps.
    """
    assert weight.shape == (C_OUT, C_IN, L, KW)
    w_t = jnp.transpose(weight, (2, 3, 1, 0))            # (L, KW, C_IN, C_OUT)
    w_f = jnp.concatenate([w_t[1], w_t[0]], axis=0)      # (2*KW, C_IN, C_OUT)
    return w_f.astype(compute_dtype)


def kernel_generated_4_forward(x_nchw, w_fused, shift_direction=SHIFT_DIRECTION):
    """Forward pass. `w_fused` is the init-time output of `fuse_weight`."""
    assert x_nchw.shape == (1, C_IN, H, W)
    assert w_fused.shape == (len(SHIFTS), C_IN, C_OUT)
    compute_dtype = w_fused.dtype

    # roll -> sum(l) -> roll collapses to y[o] = Y'[(o+a)%H]; `a` only appears
    # in the output rotation below.
    a = (-2) % H if shift_direction == 1 else 1

    # --- single per-call input relayout (fuses in XLA): NCHW -> (N_ROWS, C) ---
    x_hwc = jnp.transpose(x_nchw[0], (1, 2, 0)).astype(compute_dtype)  # (H, W, C)
    x_pad = jnp.pad(x_hwc, ((0, 0), (1, 1), (0, 0)))                   # (H, WP, C)
    x_flat = x_pad.reshape(M_ROWS, C_IN)
    x_ext = jnp.concatenate(
        [x_flat,                                               # rows 0..223
         x_flat[:WP],                                          # wrap rows ((o+1)%H at o=H-1)
         jnp.zeros((N_ROWS - M_ROWS - WP, C_IN), compute_dtype)],  # zero tail
        axis=0)                                                # (N_ROWS, C_IN)

    bytes_accessed = (x_ext.size * x_ext.dtype.itemsize
                      + w_fused.size * w_fused.dtype.itemsize
                      + M_ROWS * C_OUT * 4)

    out_flat = pl.pallas_call(
        _shifted_matmul_kernel,
        out_shape=jax.ShapeDtypeStruct((M_ROWS, C_OUT), jnp.float32),
        grid=(C_OUT // N_BLK,),
        in_specs=[
            # x: same block every step -> DMA'd once, stays resident in VMEM.
            pl.BlockSpec((N_ROWS, C_IN), lambda j: (0, 0)),
            # weight: 128-wide C_OUT blocks, double-buffered against compute.
            pl.BlockSpec((len(SHIFTS), C_IN, N_BLK), lambda j: (0, 0, j)),
        ],
        out_specs=pl.BlockSpec((M_ROWS, N_BLK), lambda j: (0, j)),
        compiler_params=pltpu.CompilerParams(
            dimension_semantics=("parallel",)),
        cost_estimate=pl.CostEstimate(
            flops=2 * N_ROWS * len(SHIFTS) * C_IN * C_OUT,
            transcendentals=0,
            bytes_accessed=bytes_accessed),
    )(x_ext, w_fused)

    # (H*WP, C_OUT) -> drop pad columns -> apply output H-rotation -> NCHW
    y = out_flat.reshape(H, WP, C_OUT)[:, :W, :]          # (H, W, C_OUT)
    y = jnp.roll(y, -a, axis=0)                           # y[o] = Y'[(o+a)%H]
    return jnp.transpose(y, (2, 0, 1))[None]              # (1, C_OUT, H, W)


# ---------------------------------------------------------------------------
def reference_forward(x, w, shift):
    """Literal JAX translation of the torch op sequence (HIGHEST-prec einsum)."""
    t2 = x.reshape(1, C_IN * H, W, 1)
    t2p = jnp.pad(t2, ((0, 0), (0, 0), (1, 1), (0, 0)))
    # torch unfold((3,1), padding=(1,0)): out[0, c*3+k, l] = padded[0, c, l+k, 0]
    patches = jnp.stack([t2p[0, :, k:k + W, 0] for k in range(KW)], axis=1)
    t2r = patches.reshape(1, C_IN, H, KW, W)
    t3 = jnp.einsum('mjokn,ijlk->mioln', t2r, w,
                    precision=jax.lax.Precision.HIGHEST)
    t4 = t3.reshape(1, C_OUT, H * L, W)
    t4 = jnp.roll(t4, shift, axis=2)
    t4 = t4.reshape(1, C_OUT, H, L, W).sum(axis=3)
    return jnp.roll(t4, shift, axis=2)


# ---------------------------------------------------------------------------
if __name__ == "__main__":
    key = jax.random.PRNGKey(0)
    kx, kw_key = jax.random.split(key)
    x = jax.random.normal(kx, (1, C_IN, H, W), dtype=jnp.float32)
    w = jax.random.normal(kw_key, (C_OUT, C_IN, L, KW), dtype=jnp.float32)

    fwd = jax.jit(kernel_generated_4_forward, static_argnames=("shift_direction",))

    # Fused weights precomputed ONCE (init-time), not in the per-call path.
    w_bf16 = jax.block_until_ready(fuse_weight(w, jnp.bfloat16))   # perf default
    w_f32 = jax.block_until_ready(fuse_weight(w, jnp.float32))     # exact-math path

    for s in (SHIFT_DIRECTION, -SHIFT_DIRECTION):
        y_ref = reference_forward(x, w, s)

        # f32-operand path (closest to original torch numerics).
        y32 = jax.block_until_ready(fwd(x, w_f32, shift_direction=s))
        assert y32.shape == (1, C_OUT, H, W)
        if not bool(jnp.allclose(y32, y_ref, rtol=2e-2, atol=1e-1)):
            err = float(jnp.max(jnp.abs(y32 - y_ref)))
            raise AssertionError(
                f"f32 Pallas result mismatch (shift={s}), max abs err={err}")

        # bf16-operand default path (MXU-native, f32 accumulation) — looser check.
        ybf = jax.block_until_ready(fwd(x, w_bf16, shift_direction=s))
        if not bool(jnp.allclose(ybf, y_ref, rtol=5e-2, atol=1.0)):
            err = float(jnp.max(jnp.abs(ybf - y_ref)))
            raise AssertionError(
                f"bf16 Pallas result mismatch (shift={s}), max abs err={err}")

    print("KERNEL_OK")
</pallas_src>

<mosaic_0001>
module attributes {stable_mosaic.version = 11 : i64} {
  func.func @_shifted_matmul_kernel(%arg0: i32, %arg1: memref<248x256xf32, #tpu.memory_space<vmem>>, %arg2: memref<6x256x128xf32, #tpu.memory_space<vmem>>, %arg3: memref<224x128xf32, #tpu.memory_space<vmem>>) attributes {dimension_semantics = [#tpu.dimension_semantics<parallel>], iteration_bounds = array<i64: 2>, scalar_prefetch = 0 : i64, scratch_operands = 0 : i64, tpu.core_type = #tpu.core_type<tc>, window_params = [{pipeline_mode = #tpu.pipeline_mode<synchronous>, transform_indices = @transform_0, window_bounds = array<i64: 248, 256>}, {transform_indices = @transform_1, window_bounds = array<i64: 6, 256, 128>}, {transform_indices = @transform_2, window_bounds = array<i64: 224, 128>}]} {
    %c0 = arith.constant 0 : index
    %c0_0 = arith.constant 0 : index
    %0 = vector.load %arg1[%c0, %c0_0] : memref<248x256xf32, #tpu.memory_space<vmem>>, vector<248x256xf32>
    %c0_1 = arith.constant 0 : index
    %c0_2 = arith.constant 0 : index
    %c0_3 = arith.constant 0 : index
    %1 = vector.load %arg2[%c0_1, %c0_2, %c0_3] : memref<6x256x128xf32, #tpu.memory_space<vmem>>, vector<1x256x128xf32>
    %2 = vector.shape_cast %1 : vector<1x256x128xf32> to vector<256x128xf32>
    %cst = arith.constant dense<0.000000e+00> : vector<248x128xf32>
    %3 = tpu.matmul %0, %2, %cst {dimension_numbers = #tpu.dot_dimension_numbers<[1], [0], [0], [1], [0, 0, 1, 1], [], []>} : vector<248x256xf32>, vector<256x128xf32>, vector<248x128xf32> -> vector<248x128xf32>
    %4 = vector.extract_strided_slice %3 {offsets = [0, 0], sizes = [224, 128], strides = [1, 1]} : vector<248x128xf32> to vector<224x128xf32>
    %c1 = arith.constant 1 : index
    %c0_4 = arith.constant 0 : index
    %c0_5 = arith.constant 0 : index
    %5 = vector.load %arg2[%c1, %c0_4, %c0_5] : memref<6x256x128xf32, #tpu.memory_space<vmem>>, vector<1x256x128xf32>
    %6 = vector.shape_cast %5 : vector<1x256x128xf32> to vector<256x128xf32>
    %cst_6 = arith.constant dense<0.000000e+00> : vector<248x128xf32>
    %7 = tpu.matmul %0, %6, %cst_6 {dimension_numbers = #tpu.dot_dimension_numbers<[1], [0], [0], [1], [0, 0, 1, 1], [], []>} : vector<248x256xf32>, vector<256x128xf32>, vector<248x128xf32> -> vector<248x128xf32>
    %8 = vector.extract_strided_slice %7 {offsets = [1, 0], sizes = [224, 128], strides = [1, 1]} : vector<248x128xf32> to vector<224x128xf32>
    %9 = arith.addf %4, %8 : vector<224x128xf32>
    %c2 = arith.constant 2 : index
    %c0_7 = arith.constant 0 : index
    %c0_8 = arith.constant 0 : index
    %10 = vector.load %arg2[%c2, %c0_7, %c0_8] : memref<6x256x128xf32, #tpu.memory_space<vmem>>, vector<1x256x128xf32>
    %11 = vector.shape_cast %10 : vector<1x256x128xf32> to vector<256x128xf32>
    %cst_9 = arith.constant dense<0.000000e+00> : vector<248x128xf32>
    %12 = tpu.matmul %0, %11, %cst_9 {dimension_numbers = #tpu.dot_dimension_numbers<[1], [0], [0], [1], [0, 0, 1, 1], [], []>} : vector<248x256xf32>, vector<256x128xf32>, vector<248x128xf32> -> vector<248x128xf32>
    %13 = vector.extract_strided_slice %12 {offsets = [2, 0], sizes = [224, 128], strides = [1, 1]} : vector<248x128xf32> to vector<224x128xf32>
    %14 = arith.addf %9, %13 : vector<224x128xf32>
    %c3 = arith.constant 3 : index
    %c0_10 = arith.constant 0 : index
    %c0_11 = arith.constant 0 : index
    %15 = vector.load %arg2[%c3, %c0_10, %c0_11] : memref<6x256x128xf32, #tpu.memory_space<vmem>>, vector<1x256x128xf32>
    %16 = vector.shape_cast %15 : vector<1x256x128xf32> to vector<256x128xf32>
    %cst_12 = arith.constant dense<0.000000e+00> : vector<248x128xf32>
    %17 = tpu.matmul %0, %16, %cst_12 {dimension_numbers = #tpu.dot_dimension_numbers<[1], [0], [0], [1], [0, 0, 1, 1], [], []>} : vector<248x256xf32>, vector<256x128xf32>, vector<248x128xf32> -> vector<248x128xf32>
    %18 = vector.extract_strided_slice %17 {offsets = [16, 0], sizes = [224, 128], strides = [1, 1]} : vector<248x128xf32> to vector<224x128xf32>
    %19 = arith.addf %14, %18 : vector<224x128xf32>
    %c4 = arith.constant 4 : index
    %c0_13 = arith.constant 0 : index
    %c0_14 = arith.constant 0 : index
    %20 = vector.load %arg2[%c4, %c0_13, %c0_14] : memref<6x256x128xf32, #tpu.memory_space<vmem>>, vector<1x256x128xf32>
    %21 = vector.shape_cast %20 : vector<1x256x128xf32> to vector<256x128xf32>
    %cst_15 = arith.constant dense<0.000000e+00> : vector<248x128xf32>
    %22 = tpu.matmul %0, %21, %cst_15 {dimension_numbers = #tpu.dot_dimension_numbers<[1], [0], [0], [1], [0, 0, 1, 1], [], []>} : vector<248x256xf32>, vector<256x128xf32>, vector<248x128xf32> -> vector<248x128xf32>
    %23 = vector.extract_strided_slice %22 {offsets = [17, 0], sizes = [224, 128], strides = [1, 1]} : vector<248x128xf32> to vector<224x128xf32>
    %24 = arith.addf %19, %23 : vector<224x128xf32>
    %c5 = arith.constant 5 : index
    %c0_16 = arith.constant 0 : index
    %c0_17 = arith.constant 0 : index
    %25 = vector.load %arg2[%c5, %c0_16, %c0_17] : memref<6x256x128xf32, #tpu.memory_space<vmem>>, vector<1x256x128xf32>
    %26 = vector.shape_cast %25 : vector<1x256x128xf32> to vector<256x128xf32>
    %cst_18 = arith.constant dense<0.000000e+00> : vector<248x128xf32>
    %27 = tpu.matmul %0, %26, %cst_18 {dimension_numbers = #tpu.dot_dimension_numbers<[1], [0], [0], [1], [0, 0, 1, 1], [], []>} : vector<248x256xf32>, vector<256x128xf32>, vector<248x128xf32> -> vector<248x128xf32>
    %28 = vector.extract_strided_slice %27 {offsets = [18, 0], sizes = [224, 128], strides = [1, 1]} : vector<248x128xf32> to vector<224x128xf32>
    %29 = arith.addf %24, %28 : vector<224x128xf32>
    %c0_19 = arith.constant 0 : index
    %c0_20 = arith.constant 0 : index
    %30 = vector.load %arg3[%c0_19, %c0_20] : memref<224x128xf32, #tpu.memory_space<vmem>>, vector<224x128xf32>
    tpu.vector_store %arg3[%c0_19, %c0_20], %29 {strides = array<i32>} : memref<224x128xf32, #tpu.memory_space<vmem>>, vector<224x128xf32>,
    return
  }
  func.func @transform_0(%arg0: i32) -> (i32, i32) {
    %c0_i32 = arith.constant 0 : i32
    %c0_i32_0 = arith.constant 0 : i32
    %c0_i32_1 = arith.constant 0 : i32
    return %c0_i32, %c0_i32_0 : i32, i32
  }
  func.func @transform_1(%arg0: i32) -> (i32, i32, i32) {
    %c0_i32 = arith.constant 0 : i32
    %c0_i32_0 = arith.constant 0 : i32
    %c0_i32_1 = arith.constant 0 : i32
    return %c0_i32, %c0_i32_0, %arg0 : i32, i32, i32
  }
  func.func @transform_2(%arg0: i32) -> (i32, i32) {
    %c0_i32 = arith.constant 0 : i32
    %c0_i32_0 = arith.constant 0 : i32
    return %c0_i32, %arg0 : i32, i32
  }
}

</mosaic_0001>

<bundles_post_ra>
// kernel: kernel_generated_4_forward.1
= control target key start
LH: loop header
LB: loop body
LE: loop exit
PB: predicated region body
PF: predicated region fallthrough
CT: control target
= control target key end

     0   :  { %s3919_s9 = smov 0   ;;  %s3921_s10 = smov 0   ;;  %s5773_s0 = inlined_call_operand.vmem [shape: f32[248,256], index: 0, kind: input, shape index: {}]   ;;  %s5774_s1 = inlined_call_operand.vmem [shape: f32[6,256,256], index: 1, kind: input, shape index: {}]   ;;  %s5775_s2 = inlined_call_operand.vmem [shape: f32[224,256], index: 2, kind: output, shape index: {}]  }
   0x1   :  { %s3923_s11 = smov 0  }
   0x2 LB: > { %s3332_s12 = sadd.s32 4294967295, %s3901_s11   ;;  %s3936_s13 = sadd.s32 1, %s3901_s11   ;;  %s3901_s11 = sphi %s3923_s11, %s5818_s11   ;;  %s3897_s10 = sphi %s3921_s10, %s5817_s10   ;;  %s3893_s9 = sphi %s3919_s9, %s5816_s9  }
   0x3   : > { %s37_s14 = ssub.s32 %s3901_s11, %s3936_s13  ;;  %s40_s15 = sadd.s32 1, %s3897_s10 }
   0x4   : > { %p38_p0 = scmp.eq.s32.totalorder %s37_s14, 0  ;;  %p47_p1 = scmp.ne.s32.totalorder %s3897_s10, %s3893_s9 }
   0x5   : > { %p48_p2 = scmp.eq.s32.totalorder %s3901_s11, 0  ;;  %p77_p3 = scmp.eq.s32.totalorder %s3332_s12, 1 }
   0x6   : > { %s3947_s16 = scalar_select %p38_p0, %s3897_s10, %s40_s15  }
   0x7   : > { %p49_p4 = por %p48_p2, %p47_p1  ;;  %p3949_p5 = por %p77_p3, %p47_p1 }
   0x8   : > { %p3335_p6 = scmp.ge.s32.totalorder %s3901_s11, 2 }
   0xa   : > { %102 = sbr.rel (%p3335_p6) target bundleno = 117 (0x75), region = 20 }
  0x11   : > { %105 = sbr.rel (!%p49_p4) target bundleno = 117 (0x75), region = 24  ;;  %s107_s18 = sand.u32 (%p49_p4), 1, %s3897_s10  }
  0x12   : > { %s3336_s19 = sshll.u32 (%p49_p4), %s3901_s11, 3  ;;  %s3789_s20 = smul.u32 (%p49_p4), 1536, %s107_s18 }
  0x13   : > { %s3959_s23 = scalar_lea.vmem (%p49_p4), %s5774_s1, %s3336_s19 }
  0x14   : > { %v521_v0 = vld [vmem:[%s3959_s23] sm:$0xff] (%p49_p4)  ;;  %v523_v1 = vld [vmem:[%s3959_s23 + $0x10] sm:$0xff] (%p49_p4)  ;;  %s3967_s24 = scalar_lea.vmem (%p49_p4), [#allocation2], %s3789_s20 }
  0x15   : > { %v525_v2 = vld [vmem:[%s3959_s23 + $0x20] sm:$0xff] (%p49_p4)  ;;  %v527_v3 = vld [vmem:[%s3959_s23 + $0x30] sm:$0xff] (%p49_p4)  ;;  %522 = vst [vmem:[%s3967_s24] sm:$0xff] (%p49_p4), %v521_v0  ;;  %524 = vst [vmem:[%s3967_s24 + $0x8] sm:$0xff] (%p49_p4), %v523_v1 }
  0x16   : > { %v529_v4 = vld [vmem:[%s3959_s23 + $0x40] sm:$0xff] (%p49_p4)  ;;  %v531_v5 = vld [vmem:[%s3959_s23 + $0x50] sm:$0xff] (%p49_p4)  ;;  %526 = vst [vmem:[%s3967_s24 + $0x10] sm:$0xff] (%p49_p4), %v525_v2  ;;  %528 = vst [vmem:[%s3967_s24 + $0x18] sm:$0xff] (%p49_p4), %v527_v3 }
  0x17   : > { %530 = vst [vmem:[%s3967_s24 + $0x20] sm:$0xff] (%p49_p4), %v529_v4  ;;  %532 = vst [vmem:[%s3967_s24 + $0x28] sm:$0xff] (%p49_p4), %v531_v5  ;;  %v533_v6 = vld [vmem:[%s3959_s23 + $0x60] sm:$0xff] (%p49_p4)  ;;  %v535_v7 = vld [vmem:[%s3959_s23 + $0x70] sm:$0xff] (%p49_p4) }
  0x18   : > { %v537_v8 = vld [vmem:[%s3959_s23 + $0x80] sm:$0xff]  ;;  %534 = vst [vmem:[%s3967_s24 + $0x30] sm:$0xff] %v533_v6  ;;  %536 = vst [vmem:[%s3967_s24 + $0x38] sm:$0xff] %v535_v7  ;;  %v539_v9 = vld [vmem:[%s3959_s23 + $0x90] sm:$0xff] }
  0x19   : > { %538 = vst [vmem:[%s3967_s24 + $0x40] sm:$0xff] %v537_v8  ;;  %v541_v10 = vld [vmem:[%s3959_s23 + $0xa0] sm:$0xff]  ;;  %v543_v11 = vld [vmem:[%s3959_s23 + $0xb0] sm:$0xff]  ;;  %540 = vst [vmem:[%s3967_s24 + $0x48] sm:$0xff] %v539_v9 }
  0x1a   : > { %542 = vst [vmem:[%s3967_s24 + $0x50] sm:$0xff] %v541_v10  ;;  %544 = vst [vmem:[%s3967_s24 + $0x58] sm:$0xff] %v543_v11  ;;  %v545_v12 = vld [vmem:[%s3959_s23 + $0xc0] sm:$0xff]  ;;  %v547_v13 = vld [vmem:[%s3959_s23 + $0xd0] sm:$0xff] }
  0x1b   : > { %v549_v14 = vld [vmem:[%s3959_s23 + $0xe0] sm:$0xff]  ;;  %546 = vst [vmem:[%s3967_s24 + $0x60] sm:$0xff] %v545_v12  ;;  %548 = vst [vmem:[%s3967_s24 + $0x68] sm:$0xff] %v547_v13  ;;  %v551_v15 = vld [vmem:[%s3959_s23 + $0xf0] sm:$0xff] }
  0x1c   : > { %550 = vst [vmem:[%s3967_s24 + $0x70] sm:$0xff] %v549_v14  ;;  %v553_v16 = vld [vmem:[%s3959_s23 + $0x100] sm:$0xff]  ;;  %v555_v17 = vld [vmem:[%s3959_s23 + $0x110] sm:$0xff]  ;;  %552 = vst [vmem:[%s3967_s24 + $0x78] sm:$0xff] %v551_v15 }
  0x1d   : > { %554 = vst [vmem:[%s3967_s24 + $0x80] sm:$0xff] %v553_v16  ;;  %556 = vst [vmem:[%s3967_s24 + $0x88] sm:$0xff] %v555_v17  ;;  %v557_v18 = vld [vmem:[%s3959_s23 + $0x120] sm:$0xff]  ;;  %v559_v19 = vld [vmem:[%s3959_s23 + $0x130] sm:$0xff] }
  0x1e   : > { %v561_v20 = vld [vmem:[%s3959_s23 + $0x140] sm:$0xff]  ;;  %558 = vst [vmem:[%s3967_s24 + $0x90] sm:$0xff] %v557_v18  ;;  %560 = vst [vmem:[%s3967_s24 + $0x98] sm:$0xff] %v559_v19  ;;  %v563_v21 = vld [vmem:[%s3959_s23 + $0x150] sm:$0xff] }
  0x1f   : > { %562 = vst [vmem:[%s3967_s24 + $0xa0] sm:$0xff] %v561_v20  ;;  %v565_v22 = vld [vmem:[%s3959_s23 + $0x160] sm:$0xff]  ;;  %v567_v23 = vld [vmem:[%s3959_s23 + $0x170] sm:$0xff]  ;;  %564 = vst [vmem:[%s3967_s24 + $0xa8] sm:$0xff] %v563_v21 }
  0x20   : > { %566 = vst [vmem:[%s3967_s24 + $0xb0] sm:$0xff] %v565_v22  ;;  %568 = vst [vmem:[%s3967_s24 + $0xb8] sm:$0xff] %v567_v23  ;;  %v569_v24 = vld [vmem:[%s3959_s23 + $0x180] sm:$0xff]  ;;  %v571_v25 = vld [vmem:[%s3959_s23 + $0x190] sm:$0xff] }
  0x21   : > { %v573_v26 = vld [vmem:[%s3959_s23 + $0x1a0] sm:$0xff]  ;;  %570 = vst [vmem:[%s3967_s24 + $0xc0] sm:$0xff] %v569_v24  ;;  %572 = vst [vmem:[%s3967_s24 + $0xc8] sm:$0xff] %v571_v25  ;;  %v575_v27 = vld [vmem:[%s3959_s23 + $0x1b0] sm:$0xff] }
  0x22   : > { %574 = vst [vmem:[%s3967_s24 + $0xd0] sm:$0xff] %v573_v26  ;;  %v577_v28 = vld [vmem:[%s3959_s23 + $0x1c0] sm:$0xff]  ;;  %v579_v29 = vld [vmem:[%s3959_s23 + $0x1d0] sm:$0xff]  ;;  %576 = vst [vmem:[%s3967_s24 + $0xd8] sm:$0xff] %v575_v27 }
  0x23   : > { %578 = vst [vmem:[%s3967_s24 + $0xe0] sm:$0xff] %v577_v28  ;;  %580 = vst [vmem:[%s3967_s24 + $0xe8] sm:$0xff] %v579_v29  ;;  %v581_v30 = vld [vmem:[%s3959_s23 + $0x1e0] sm:$0xff]  ;;  %v583_v31 = vld [vmem:[%s3959_s23 + $0x1f0] sm:$0xff] }
  0x24   : > { %v585_v32 = vld [vmem:[%s3959_s23 + $0x200] sm:$0xff]  ;;  %582 = vst [vmem:[%s3967_s24 + $0xf0] sm:$0xff] %v581_v30  ;;  %584 = vst [vmem:[%s3967_s24 + $0xf8] sm:$0xff] %v583_v31  ;;  %v587_v33 = vld [vmem:[%s3959_s23 + $0x210] sm:$0xff] }
  0x25   : > { %586 = vst [vmem:[%s3967_s24 + $0x100] sm:$0xff] %v585_v32  ;;  %v589_v34 = vld [vmem:[%s3959_s23 + $0x220] sm:$0xff]  ;;  %v591_v35 = vld [vmem:[%s3959_s23 + $0x230] sm:$0xff]  ;;  %588 = vst [vmem:[%s3967_s24 + $0x108] sm:$0xff] %v587_v33 }
  0x26   : > { %590 = vst [vmem:[%s3967_s24 + $0x110] sm:$0xff] %v589_v34  ;;  %592 = vst [vmem:[%s3967_s24 + $0x118] sm:$0xff] %v591_v35  ;;  %v593_v36 = vld [vmem:[%s3959_s23 + $0x240] sm:$0xff]  ;;  %v595_v37 = vld [vmem:[%s3959_s23 + $0x250] sm:$0xff] }
  0x27   : > { %v597_v38 = vld [vmem:[%s3959_s23 + $0x260] sm:$0xff]  ;;  %594 = vst [vmem:[%s3967_s24 + $0x120] sm:$0xff] %v593_v36  ;;  %596 = vst [vmem:[%s3967_s24 + $0x128] sm:$0xff] %v595_v37  ;;  %v599_v39 = vld [vmem:[%s3959_s23 + $0x270] sm:$0xff] }
  0x28   : > { %598 = vst [vmem:[%s3967_s24 + $0x130] sm:$0xff] %v597_v38  ;;  %v601_v40 = vld [vmem:[%s3959_s23 + $0x280] sm:$0xff]  ;;  %v603_v41 = vld [vmem:[%s3959_s23 + $0x290] sm:$0xff]  ;;  %600 = vst [vmem:[%s3967_s24 + $0x138] sm:$0xff] %v599_v39 }
  0x29   : > { %602 = vst [vmem:[%s3967_s24 + $0x140] sm:$0xff] %v601_v40  ;;  %604 = vst [vmem:[%s3967_s24 + $0x148] sm:$0xff] %v603_v41  ;;  %v605_v42 = vld [vmem:[%s3959_s23 + $0x2a0] sm:$0xff]  ;;  %v607_v43 = vld [vmem:[%s3959_s23 + $0x2b0] sm:$0xff] }
  0x2a   : > { %v609_v44 = vld [vmem:[%s3959_s23 + $0x2c0] sm:$0xff]  ;;  %606 = vst [vmem:[%s3967_s24 + $0x150] sm:$0xff] %v605_v42  ;;  %608 = vst [vmem:[%s3967_s24 + $0x158] sm:$0xff] %v607_v43  ;;  %v611_v45 = vld [vmem:[%s3959_s23 + $0x2d0] sm:$0xff] }
  0x2b   : > { %610 = vst [vmem:[%s3967_s24 + $0x160] sm:$0xff] %v609_v44  ;;  %v613_v46 = vld [vmem:[%s3959_s23 + $0x2e0] sm:$0xff]  ;;  %v615_v47 = vld [vmem:[%s3959_s23 + $0x2f0] sm:$0xff]  ;;  %612 = vst [vmem:[%s3967_s24 + $0x168] sm:$0xff] %v611_v45 }
  0x2c   : > { %614 = vst [vmem:[%s3967_s24 + $0x170] sm:$0xff] %v613_v46  ;;  %616 = vst [vmem:[%s3967_s24 + $0x178] sm:$0xff] %v615_v47  ;;  %v617_v48 = vld [vmem:[%s3959_s23 + $0x300] sm:$0xff]  ;;  %v619_v49 = vld [vmem:[%s3959_s23 + $0x310] sm:$0xff] }
  0x2d   : > { %v621_v50 = vld [vmem:[%s3959_s23 + $0x320] sm:$0xff]  ;;  %618 = vst [vmem:[%s3967_s24 + $0x180] sm:$0xff] %v617_v48  ;;  %620 = vst [vmem:[%s3967_s24 + $0x188] sm:$0xff] %v619_v49  ;;  %v623_v51 = vld [vmem:[%s3959_s23 + $0x330] sm:$0xff] }
  0x2e   : > { %622 = vst [vmem:[%s3967_s24 + $0x190] sm:$0xff] %v621_v50  ;;  %v625_v52 = vld [vmem:[%s3959_s23 + $0x340] sm:$0xff]  ;;  %v627_v53 = vld [vmem:[%s3959_s23 + $0x350] sm:$0xff]  ;;  %624 = vst [vmem:[%s3967_s24 + $0x198] sm:$0xff] %v623_v51 }
  0x2f   : > { %626 = vst [vmem:[%s3967_s24 + $0x1a0] sm:$0xff] %v625_v52  ;;  %628 = vst [vmem:[%s3967_s24 + $0x1a8] sm:$0xff] %v627_v53  ;;  %v629_v54 = vld [vmem:[%s3959_s23 + $0x360] sm:$0xff]  ;;  %v631_v55 = vld [vmem:[%s3959_s23 + $0x370] sm:$0xff] }
  0x30   : > { %v633_v56 = vld [vmem:[%s3959_s23 + $0x380] sm:$0xff]  ;;  %630 = vst [vmem:[%s3967_s24 + $0x1b0] sm:$0xff] %v629_v54  ;;  %632 = vst [vmem:[%s3967_s24 + $0x1b8] sm:$0xff] %v631_v55  ;;  %v635_v57 = vld [vmem:[%s3959_s23 + $0x390] sm:$0xff] }
  0x31   : > { %634 = vst [vmem:[%s3967_s24 + $0x1c0] sm:$0xff] %v633_v56  ;;  %v637_v58 = vld [vmem:[%s3959_s23 + $0x3a0] sm:$0xff]  ;;  %v639_v59 = vld [vmem:[%s3959_s23 + $0x3b0] sm:$0xff]  ;;  %636 = vst [vmem:[%s3967_s24 + $0x1c8] sm:$0xff] %v635_v57 }
  0x32   : > { %638 = vst [vmem:[%s3967_s24 + $0x1d0] sm:$0xff] %v637_v58  ;;  %640 = vst [vmem:[%s3967_s24 + $0x1d8] sm:$0xff] %v639_v59  ;;  %v641_v60 = vld [vmem:[%s3959_s23 + $0x3c0] sm:$0xff]  ;;  %v643_v61 = vld [vmem:[%s3959_s23 + $0x3d0] sm:$0xff] }
  0x33   : > { %v645_v62 = vld [vmem:[%s3959_s23 + $0x3e0] sm:$0xff]  ;;  %642 = vst [vmem:[%s3967_s24 + $0x1e0] sm:$0xff] %v641_v60  ;;  %644 = vst [vmem:[%s3967_s24 + $0x1e8] sm:$0xff] %v643_v61  ;;  %v647_v63 = vld [vmem:[%s3959_s23 + $0x3f0] sm:$0xff] }
  0x34   : > { %646 = vst [vmem:[%s3967_s24 + $0x1f0] sm:$0xff] %v645_v62  ;;  %v649_v0 = vld [vmem:[%s3959_s23 + $0x400] sm:$0xff]  ;;  %v651_v1 = vld [vmem:[%s3959_s23 + $0x410] sm:$0xff]  ;;  %648 = vst [vmem:[%s3967_s24 + $0x1f8] sm:$0xff] %v647_v63 }
  0x35   : > { %650 = vst [vmem:[%s3967_s24 + $0x200] sm:$0xff] %v649_v0  ;;  %652 = vst [vmem:[%s3967_s24 + $0x208] sm:$0xff] %v651_v1  ;;  %v653_v2 = vld [vmem:[%s3959_s23 + $0x420] sm:$0xff]  ;;  %v655_v3 = vld [vmem:[%s3959_s23 + $0x430] sm:$0xff] }
  0x36   : > { %v657_v4 = vld [vmem:[%s3959_s23 + $0x440] sm:$0xff]  ;;  %654 = vst [vmem:[%s3967_s24 + $0x210] sm:$0xff] %v653_v2  ;;  %656 = vst [vmem:[%s3967_s24 + $0x218] sm:$0xff] %v655_v3  ;;  %v659_v5 = vld [vmem:[%s3959_s23 + $0x450] sm:$0xff] }
  0x37   : > { %658 = vst [vmem:[%s3967_s24 + $0x220] sm:$0xff] %v657_v4  ;;  %v661_v6 = vld [vmem:[%s3959_s23 + $0x460] sm:$0xff]  ;;  %v663_v7 = vld [vmem:[%s3959_s23 + $0x470] sm:$0xff]  ;;  %660 = vst [vmem:[%s3967_s24 + $0x228] sm:$0xff] %v659_v5 }
  0x38   : > { %662 = vst [vmem:[%s3967_s24 + $0x230] sm:$0xff] %v661_v6  ;;  %664 = vst [vmem:[%s3967_s24 + $0x238] sm:$0xff] %v663_v7  ;;  %v665_v8 = vld [vmem:[%s3959_s23 + $0x480] sm:$0xff]  ;;  %v667_v9 = vld [vmem:[%s3959_s23 + $0x490] sm:$0xff] }
  0x39   : > { %v669_v10 = vld [vmem:[%s3959_s23 + $0x4a0] sm:$0xff]  ;;  %666 = vst [vmem:[%s3967_s24 + $0x240] sm:$0xff] %v665_v8  ;;  %668 = vst [vmem:[%s3967_s24 + $0x248] sm:$0xff] %v667_v9  ;;  %v671_v11 = vld [vmem:[%s3959_s23 + $0x4b0] sm:$0xff] }
  0x3a   : > { %670 = vst [vmem:[%s3967_s24 + $0x250] sm:$0xff] %v669_v10  ;;  %v673_v12 = vld [vmem:[%s3959_s23 + $0x4c0] sm:$0xff]  ;;  %v675_v13 = vld [vmem:[%s3959_s23 + $0x4d0] sm:$0xff]  ;;  %672 = vst [vmem:[%s3967_s24 + $0x258] sm:$0xff] %v671_v11 }
  0x3b   : > { %674 = vst [vmem:[%s3967_s24 + $0x260] sm:$0xff] %v673_v12  ;;  %676 = vst [vmem:[%s3967_s24 + $0x268] sm:$0xff] %v675_v13  ;;  %v677_v14 = vld [vmem:[%s3959_s23 + $0x4e0] sm:$0xff]  ;;  %v679_v15 = vld [vmem:[%s3959_s23 + $0x4f0] sm:$0xff] }
  0x3c   : > { %v681_v16 = vld [vmem:[%s3959_s23 + $0x500] sm:$0xff]  ;;  %678 = vst [vmem:[%s3967_s24 + $0x270] sm:$0xff] %v677_v14  ;;  %680 = vst [vmem:[%s3967_s24 + $0x278] sm:$0xff] %v679_v15  ;;  %v683_v17 = vld [vmem:[%s3959_s23 + $0x510] sm:$0xff] }
  0x3d   : > { %682 = vst [vmem:[%s3967_s24 + $0x280] sm:$0xff] %v681_v16  ;;  %v685_v18 = vld [vmem:[%s3959_s23 + $0x520] sm:$0xff]  ;;  %v687_v19 = vld [vmem:[%s3959_s23 + $0x530] sm:$0xff]  ;;  %684 = vst [vmem:[%s3967_s24 + $0x288] sm:$0xff] %v683_v17 }
  0x3e   : > { %686 = vst [vmem:[%s3967_s24 + $0x290] sm:$0xff] %v685_v18  ;;  %688 = vst [vmem:[%s3967_s24 + $0x298] sm:$0xff] %v687_v19  ;;  %v689_v20 = vld [vmem:[%s3959_s23 + $0x540] sm:$0xff]  ;;  %v691_v21 = vld [vmem:[%s3959_s23 + $0x550] sm:$0xff] }
  0x3f   : > { %v693_v22 = vld [vmem:[%s3959_s23 + $0x560] sm:$0xff]  ;;  %690 = vst [vmem:[%s3967_s24 + $0x2a0] sm:$0xff] %v689_v20  ;;  %692 = vst [vmem:[%s3967_s24 + $0x2a8] sm:$0xff] %v691_v21  ;;  %v695_v23 = vld [vmem:[%s3959_s23 + $0x570] sm:$0xff] }
  0x40   : > { %694 = vst [vmem:[%s3967_s24 + $0x2b0] sm:$0xff] %v693_v22  ;;  %v697_v24 = vld [vmem:[%s3959_s23 + $0x580] sm:$0xff]  ;;  %v699_v25 = vld [vmem:[%s3959_s23 + $0x590] sm:$0xff]  ;;  %696 = vst [vmem:[%s3967_s24 + $0x2b8] sm:$0xff] %v695_v23 }
  0x41   : > { %698 = vst [vmem:[%s3967_s24 + $0x2c0] sm:$0xff] %v697_v24  ;;  %700 = vst [vmem:[%s3967_s24 + $0x2c8] sm:$0xff] %v699_v25  ;;  %v701_v26 = vld [vmem:[%s3959_s23 + $0x5a0] sm:$0xff]  ;;  %v703_v27 = vld [vmem:[%s3959_s23 + $0x5b0] sm:$0xff] }
  0x42   : > { %v705_v28 = vld [vmem:[%s3959_s23 + $0x5c0] sm:$0xff]  ;;  %702 = vst [vmem:[%s3967_s24 + $0x2d0] sm:$0xff] %v701_v26  ;;  %704 = vst [vmem:[%s3967_s24 + $0x2d8] sm:$0xff] %v703_v27  ;;  %v707_v29 = vld [vmem:[%s3959_s23 + $0x5d0] sm:$0xff] }
  0x43   : > { %706 = vst [vmem:[%s3967_s24 + $0x2e0] sm:$0xff] %v705_v28  ;;  %v709_v30 = vld [vmem:[%s3959_s23 + $0x5e0] sm:$0xff]  ;;  %v711_v31 = vld [vmem:[%s3959_s23 + $0x5f0] sm:$0xff]  ;;  %708 = vst [vmem:[%s3967_s24 + $0x2e8] sm:$0xff] %v707_v29 }
  0x44   : > { %710 = vst [vmem:[%s3967_s24 + $0x2f0] sm:$0xff] %v709_v30  ;;  %712 = vst [vmem:[%s3967_s24 + $0x2f8] sm:$0xff] %v711_v31  ;;  %v713_v32 = vld [vmem:[%s3959_s23 + $0x600] sm:$0xff]  ;;  %v715_v33 = vld [vmem:[%s3959_s23 + $0x610] sm:$0xff] }
  0x45   : > { %v717_v34 = vld [vmem:[%s3959_s23 + $0x620] sm:$0xff]  ;;  %714 = vst [vmem:[%s3967_s24 + $0x300] sm:$0xff] %v713_v32  ;;  %716 = vst [vmem:[%s3967_s24 + $0x308] sm:$0xff] %v715_v33  ;;  %v719_v35 = vld [vmem:[%s3959_s23 + $0x630] sm:$0xff] }
  0x46   : > { %718 = vst [vmem:[%s3967_s24 + $0x310] sm:$0xff] %v717_v34  ;;  %v721_v36 = vld [vmem:[%s3959_s23 + $0x640] sm:$0xff]  ;;  %v723_v37 = vld [vmem:[%s3959_s23 + $0x650] sm:$0xff]  ;;  %720 = vst [vmem:[%s3967_s24 + $0x318] sm:$0xff] %v719_v35 }
  0x47   : > { %722 = vst [vmem:[%s3967_s24 + $0x320] sm:$0xff] %v721_v36  ;;  %724 = vst [vmem:[%s3967_s24 + $0x328] sm:$0xff] %v723_v37  ;;  %v725_v38 = vld [vmem:[%s3959_s23 + $0x660] sm:$0xff]  ;;  %v727_v39 = vld [vmem:[%s3959_s23 + $0x670] sm:$0xff] }
  0x48   : > { %v729_v40 = vld [vmem:[%s3959_s23 + $0x680] sm:$0xff]  ;;  %726 = vst [vmem:[%s3967_s24 + $0x330] sm:$0xff] %v725_v38  ;;  %728 = vst [vmem:[%s3967_s24 + $0x338] sm:$0xff] %v727_v39  ;;  %v731_v41 = vld [vmem:[%s3959_s23 + $0x690] sm:$0xff] }
  0x49   : > { %730 = vst [vmem:[%s3967_s24 + $0x340] sm:$0xff] %v729_v40  ;;  %v733_v42 = vld [vmem:[%s3959_s23 + $0x6a0] sm:$0xff]  ;;  %v735_v43 = vld [vmem:[%s3959_s23 + $0x6b0] sm:$0xff]  ;;  %732 = vst [vmem:[%s3967_s24 + $0x348] sm:$0xff] %v731_v41 }
  0x4a   : > { %734 = vst [vmem:[%s3967_s24 + $0x350] sm:$0xff] %v733_v42  ;;  %736 = vst [vmem:[%s3967_s24 + $0x358] sm:$0xff] %v735_v43  ;;  %v737_v44 = vld [vmem:[%s3959_s23 + $0x6c0] sm:$0xff]  ;;  %v739_v45 = vld [vmem:[%s3959_s23 + $0x6d0] sm:$0xff] }
  0x4b   : > { %v741_v46 = vld [vmem:[%s3959_s23 + $0x6e0] sm:$0xff]  ;;  %738 = vst [vmem:[%s3967_s24 + $0x360] sm:$0xff] %v737_v44  ;;  %740 = vst [vmem:[%s3967_s24 + $0x368] sm:$0xff] %v739_v45  ;;  %v743_v47 = vld [vmem:[%s3959_s23 + $0x6f0] sm:$0xff] }
  0x4c   : > { %742 = vst [vmem:[%s3967_s24 + $0x370] sm:$0xff] %v741_v46  ;;  %v745_v48 = vld [vmem:[%s3959_s23 + $0x700] sm:$0xff]  ;;  %v747_v49 = vld [vmem:[%s3959_s23 + $0x710] sm:$0xff]  ;;  %744 = vst [vmem:[%s3967_s24 + $0x378] sm:$0xff] %v743_v47 }
  0x4d   : > { %746 = vst [vmem:[%s3967_s24 + $0x380] sm:$0xff] %v745_v48  ;;  %748 = vst [vmem:[%s3967_s24 + $0x388] sm:$0xff] %v747_v49  ;;  %v749_v50 = vld [vmem:[%s3959_s23 + $0x720] sm:$0xff]  ;;  %v751_v51 = vld [vmem:[%s3959_s23 + $0x730] sm:$0xff] }
  0x4e   : > { %v753_v52 = vld [vmem:[%s3959_s23 + $0x740] sm:$0xff]  ;;  %750 = vst [vmem:[%s3967_s24 + $0x390] sm:$0xff] %v749_v50  ;;  %752 = vst [vmem:[%s3967_s24 + $0x398] sm:$0xff] %v751_v51  ;;  %v755_v53 = vld [vmem:[%s3959_s23 + $0x750] sm:$0xff] }
  0x4f   : > { %754 = vst [vmem:[%s3967_s24 + $0x3a0] sm:$0xff] %v753_v52  ;;  %v757_v54 = vld [vmem:[%s3959_s23 + $0x760] sm:$0xff]  ;;  %v759_v55 = vld [vmem:[%s3959_s23 + $0x770] sm:$0xff]  ;;  %756 = vst [vmem:[%s3967_s24 + $0x3a8] sm:$0xff] %v755_v53 }
  0x50   : > { %758 = vst [vmem:[%s3967_s24 + $0x3b0] sm:$0xff] %v757_v54  ;;  %760 = vst [vmem:[%s3967_s24 + $0x3b8] sm:$0xff] %v759_v55  ;;  %v761_v56 = vld [vmem:[%s3959_s23 + $0x780] sm:$0xff]  ;;  %v763_v57 = vld [vmem:[%s3959_s23 + $0x790] sm:$0xff] }
  0x51   : > { %v765_v58 = vld [vmem:[%s3959_s23 + $0x7a0] sm:$0xff]  ;;  %762 = vst [vmem:[%s3967_s24 + $0x3c0] sm:$0xff] %v761_v56  ;;  %764 = vst [vmem:[%s3967_s24 + $0x3c8] sm:$0xff] %v763_v57  ;;  %v767_v59 = vld [vmem:[%s3959_s23 + $0x7b0] sm:$0xff] }
  0x52   : > { %766 = vst [vmem:[%s3967_s24 + $0x3d0] sm:$0xff] %v765_v58  ;;  %v769_v60 = vld [vmem:[%s3959_s23 + $0x7c0] sm:$0xff]  ;;  %v771_v61 = vld [vmem:[%s3959_s23 + $0x7d0] sm:$0xff]  ;;  %768 = vst [vmem:[%s3967_s24 + $0x3d8] sm:$0xff] %v767_v59 }
  0x53   : > { %770 = vst [vmem:[%s3967_s24 + $0x3e0] sm:$0xff] %v769_v60  ;;  %772 = vst [vmem:[%s3967_s24 + $0x3e8] sm:$0xff] %v771_v61  ;;  %v773_v62 = vld [vmem:[%s3959_s23 + $0x7e0] sm:$0xff]  ;;  %v775_v63 = vld [vmem:[%s3959_s23 + $0x7f0] sm:$0xff] }
  0x54   : > { %v777_v0 = vld [vmem:[%s3959_s23 + $0x800] sm:$0xff]  ;;  %774 = vst [vmem:[%s3967_s24 + $0x3f0] sm:$0xff] %v773_v62  ;;  %776 = vst [vmem:[%s3967_s24 + $0x3f8] sm:$0xff] %v775_v63  ;;  %v779_v1 = vld [vmem:[%s3959_s23 + $0x810] sm:$0xff] }
  0x55   : > { %778 = vst [vmem:[%s3967_s24 + $0x400] sm:$0xff] %v777_v0  ;;  %v781_v2 = vld [vmem:[%s3959_s23 + $0x820] sm:$0xff]  ;;  %v783_v3 = vld [vmem:[%s3959_s23 + $0x830] sm:$0xff]  ;;  %780 = vst [vmem:[%s3967_s24 + $0x408] sm:$0xff] %v779_v1 }
  0x56   : > { %782 = vst [vmem:[%s3967_s24 + $0x410] sm:$0xff] %v781_v2  ;;  %784 = vst [vmem:[%s3967_s24 + $0x418] sm:$0xff] %v783_v3  ;;  %v785_v4 = vld [vmem:[%s3959_s23 + $0x840] sm:$0xff]  ;;  %v787_v5 = vld [vmem:[%s3959_s23 + $0x850] sm:$0xff] }
  0x57   : > { %v789_v6 = vld [vmem:[%s3959_s23 + $0x860] sm:$0xff]  ;;  %786 = vst [vmem:[%s3967_s24 + $0x420] sm:$0xff] %v785_v4  ;;  %788 = vst [vmem:[%s3967_s24 + $0x428] sm:$0xff] %v787_v5  ;;  %v791_v7 = vld [vmem:[%s3959_s23 + $0x870] sm:$0xff] }
  0x58   : > { %790 = vst [vmem:[%s3967_s24 + $0x430] sm:$0xff] %v789_v6  ;;  %v793_v8 = vld [vmem:[%s3959_s23 + $0x880] sm:$0xff]  ;;  %v795_v9 = vld [vmem:[%s3959_s23 + $0x890] sm:$0xff]  ;;  %792 = vst [vmem:[%s3967_s24 + $0x438] sm:$0xff] %v791_v7 }
  0x59   : > { %794 = vst [vmem:[%s3967_s24 + $0x440] sm:$0xff] %v793_v8  ;;  %796 = vst [vmem:[%s3967_s24 + $0x448] sm:$0xff] %v795_v9  ;;  %v797_v10 = vld [vmem:[%s3959_s23 + $0x8a0] sm:$0xff]  ;;  %v799_v11 = vld [vmem:[%s3959_s23 + $0x8b0] sm:$0xff] }
  0x5a   : > { %v801_v12 = vld [vmem:[%s3959_s23 + $0x8c0] sm:$0xff]  ;;  %798 = vst [vmem:[%s3967_s24 + $0x450] sm:$0xff] %v797_v10  ;;  %800 = vst [vmem:[%s3967_s24 + $0x458] sm:$0xff] %v799_v11  ;;  %v803_v13 = vld [vmem:[%s3959_s23 + $0x8d0] sm:$0xff] }
  0x5b   : > { %802 = vst [vmem:[%s3967_s24 + $0x460] sm:$0xff] %v801_v12  ;;  %v805_v14 = vld [vmem:[%s3959_s23 + $0x8e0] sm:$0xff]  ;;  %v807_v15 = vld [vmem:[%s3959_s23 + $0x8f0] sm:$0xff]  ;;  %804 = vst [vmem:[%s3967_s24 + $0x468] sm:$0xff] %v803_v13 }
  0x5c   : > { %806 = vst [vmem:[%s3967_s24 + $0x470] sm:$0xff] %v805_v14  ;;  %808 = vst [vmem:[%s3967_s24 + $0x478] sm:$0xff] %v807_v15  ;;  %v809_v16 = vld [vmem:[%s3959_s23 + $0x900] sm:$0xff]  ;;  %v811_v17 = vld [vmem:[%s3959_s23 + $0x910] sm:$0xff] }
  0x5d   : > { %v813_v18 = vld [vmem:[%s3959_s23 + $0x920] sm:$0xff]  ;;  %810 = vst [vmem:[%s3967_s24 + $0x480] sm:$0xff] %v809_v16  ;;  %812 = vst [vmem:[%s3967_s24 + $0x488] sm:$0xff] %v811_v17  ;;  %v815_v19 = vld [vmem:[%s3959_s23 + $0x930] sm:$0xff] }
  0x5e   : > { %814 = vst [vmem:[%s3967_s24 + $0x490] sm:$0xff] %v813_v18  ;;  %v817_v20 = vld [vmem:[%s3959_s23 + $0x940] sm:$0xff]  ;;  %v819_v21 = vld [vmem:[%s3959_s23 + $0x950] sm:$0xff]  ;;  %816 = vst [vmem:[%s3967_s24 + $0x498] sm:$0xff] %v815_v19 }
  0x5f   : > { %818 = vst [vmem:[%s3967_s24 + $0x4a0] sm:$0xff] %v817_v20  ;;  %820 = vst [vmem:[%s3967_s24 + $0x4a8] sm:$0xff] %v819_v21  ;;  %v821_v22 = vld [vmem:[%s3959_s23 + $0x960] sm:$0xff]  ;;  %v823_v23 = vld [vmem:[%s3959_s23 + $0x970] sm:$0xff] }
  0x60   : > { %v825_v24 = vld [vmem:[%s3959_s23 + $0x980] sm:$0xff]  ;;  %822 = vst [vmem:[%s3967_s24 + $0x4b0] sm:$0xff] %v821_v22  ;;  %824 = vst [vmem:[%s3967_s24 + $0x4b8] sm:$0xff] %v823_v23  ;;  %v827_v25 = vld [vmem:[%s3959_s23 + $0x990] sm:$0xff] }
  0x61   : > { %826 = vst [vmem:[%s3967_s24 + $0x4c0] sm:$0xff] %v825_v24  ;;  %v829_v26 = vld [vmem:[%s3959_s23 + $0x9a0] sm:$0xff]  ;;  %v831_v27 = vld [vmem:[%s3959_s23 + $0x9b0] sm:$0xff]  ;;  %828 = vst [vmem:[%s3967_s24 + $0x4c8] sm:$0xff] %v827_v25 }
  0x62   : > { %830 = vst [vmem:[%s3967_s24 + $0x4d0] sm:$0xff] %v829_v26  ;;  %832 = vst [vmem:[%s3967_s24 + $0x4d8] sm:$0xff] %v831_v27  ;;  %v833_v28 = vld [vmem:[%s3959_s23 + $0x9c0] sm:$0xff]  ;;  %v835_v29 = vld [vmem:[%s3959_s23 + $0x9d0] sm:$0xff] }
  0x63   : > { %v837_v30 = vld [vmem:[%s3959_s23 + $0x9e0] sm:$0xff]  ;;  %834 = vst [vmem:[%s3967_s24 + $0x4e0] sm:$0xff] %v833_v28  ;;  %836 = vst [vmem:[%s3967_s24 + $0x4e8] sm:$0xff] %v835_v29  ;;  %v839_v31 = vld [vmem:[%s3959_s23 + $0x9f0] sm:$0xff] }
  0x64   : > { %838 = vst [vmem:[%s3967_s24 + $0x4f0] sm:$0xff] %v837_v30  ;;  %v841_v32 = vld [vmem:[%s3959_s23 + $0xa00] sm:$0xff]  ;;  %v843_v33 = vld [vmem:[%s3959_s23 + $0xa10] sm:$0xff]  ;;  %840 = vst [vmem:[%s3967_s24 + $0x4f8] sm:$0xff] %v839_v31 }
  0x65   : > { %842 = vst [vmem:[%s3967_s24 + $0x500] sm:$0xff] %v841_v32  ;;  %844 = vst [vmem:[%s3967_s24 + $0x508] sm:$0xff] %v843_v33  ;;  %v845_v34 = vld [vmem:[%s3959_s23 + $0xa20] sm:$0xff]  ;;  %v847_v35 = vld [vmem:[%s3959_s23 + $0xa30] sm:$0xff] }
  0x66   : > { %v849_v36 = vld [vmem:[%s3959_s23 + $0xa40] sm:$0xff]  ;;  %846 = vst [vmem:[%s3967_s24 + $0x510] sm:$0xff] %v845_v34  ;;  %848 = vst [vmem:[%s3967_s24 + $0x518] sm:$0xff] %v847_v35  ;;  %v851_v37 = vld [vmem:[%s3959_s23 + $0xa50] sm:$0xff] }
  0x67   : > { %850 = vst [vmem:[%s3967_s24 + $0x520] sm:$0xff] %v849_v36  ;;  %v853_v38 = vld [vmem:[%s3959_s23 + $0xa60] sm:$0xff]  ;;  %v855_v39 = vld [vmem:[%s3959_s23 + $0xa70] sm:$0xff]  ;;  %852 = vst [vmem:[%s3967_s24 + $0x528] sm:$0xff] %v851_v37 }
  0x68   : > { %854 = vst [vmem:[%s3967_s24 + $0x530] sm:$0xff] %v853_v38  ;;  %856 = vst [vmem:[%s3967_s24 + $0x538] sm:$0xff] %v855_v39  ;;  %v857_v40 = vld [vmem:[%s3959_s23 + $0xa80] sm:$0xff]  ;;  %v859_v41 = vld [vmem:[%s3959_s23 + $0xa90] sm:$0xff] }
  0x69   : > { %v861_v42 = vld [vmem:[%s3959_s23 + $0xaa0] sm:$0xff]  ;;  %858 = vst [vmem:[%s3967_s24 + $0x540] sm:$0xff] %v857_v40  ;;  %860 = vst [vmem:[%s3967_s24 + $0x548] sm:$0xff] %v859_v41  ;;  %v863_v43 = vld [vmem:[%s3959_s23 + $0xab0] sm:$0xff] }
  0x6a   : > { %862 = vst [vmem:[%s3967_s24 + $0x550] sm:$0xff] %v861_v42  ;;  %v865_v44 = vld [vmem:[%s3959_s23 + $0xac0] sm:$0xff]  ;;  %v867_v45 = vld [vmem:[%s3959_s23 + $0xad0] sm:$0xff]  ;;  %864 = vst [vmem:[%s3967_s24 + $0x558] sm:$0xff] %v863_v43 }
  0x6b   : > { %866 = vst [vmem:[%s3967_s24 + $0x560] sm:$0xff] %v865_v44  ;;  %868 = vst [vmem:[%s3967_s24 + $0x568] sm:$0xff] %v867_v45  ;;  %v869_v46 = vld [vmem:[%s3959_s23 + $0xae0] sm:$0xff]  ;;  %v871_v47 = vld [vmem:[%s3959_s23 + $0xaf0] sm:$0xff] }
  0x6c   : > { %v873_v48 = vld [vmem:[%s3959_s23 + $0xb00] sm:$0xff]  ;;  %870 = vst [vmem:[%s3967_s24 + $0x570] sm:$0xff] %v869_v46  ;;  %872 = vst [vmem:[%s3967_s24 + $0x578] sm:$0xff] %v871_v47  ;;  %v875_v49 = vld [vmem:[%s3959_s23 + $0xb10] sm:$0xff] }
  0x6d   : > { %874 = vst [vmem:[%s3967_s24 + $0x580] sm:$0xff] %v873_v48  ;;  %v877_v50 = vld [vmem:[%s3959_s23 + $0xb20] sm:$0xff]  ;;  %v879_v51 = vld [vmem:[%s3959_s23 + $0xb30] sm:$0xff]  ;;  %876 = vst [vmem:[%s3967_s24 + $0x588] sm:$0xff] %v875_v49 }
  0x6e   : > { %878 = vst [vmem:[%s3967_s24 + $0x590] sm:$0xff] %v877_v50  ;;  %880 = vst [vmem:[%s3967_s24 + $0x598] sm:$0xff] %v879_v51  ;;  %v881_v52 = vld [vmem:[%s3959_s23 + $0xb40] sm:$0xff]  ;;  %v883_v53 = vld [vmem:[%s3959_s23 + $0xb50] sm:$0xff] }
  0x6f   : > { %v885_v54 = vld [vmem:[%s3959_s23 + $0xb60] sm:$0xff]  ;;  %882 = vst [vmem:[%s3967_s24 + $0x5a0] sm:$0xff] %v881_v52  ;;  %884 = vst [vmem:[%s3967_s24 + $0x5a8] sm:$0xff] %v883_v53  ;;  %v887_v55 = vld [vmem:[%s3959_s23 + $0xb70] sm:$0xff] }
  0x70   : > { %886 = vst [vmem:[%s3967_s24 + $0x5b0] sm:$0xff] %v885_v54  ;;  %v889_v56 = vld [vmem:[%s3959_s23 + $0xb80] sm:$0xff]  ;;  %v891_v57 = vld [vmem:[%s3959_s23 + $0xb90] sm:$0xff]  ;;  %888 = vst [vmem:[%s3967_s24 + $0x5b8] sm:$0xff] %v887_v55 }
  0x71   : > { %890 = vst [vmem:[%s3967_s24 + $0x5c0] sm:$0xff] %v889_v56  ;;  %892 = vst [vmem:[%s3967_s24 + $0x5c8] sm:$0xff] %v891_v57  ;;  %v893_v58 = vld [vmem:[%s3959_s23 + $0xba0] sm:$0xff]  ;;  %v895_v59 = vld [vmem:[%s3959_s23 + $0xbb0] sm:$0xff] }
  0x72   : > { %v897_v60 = vld [vmem:[%s3959_s23 + $0xbc0] sm:$0xff]  ;;  %894 = vst [vmem:[%s3967_s24 + $0x5d0] sm:$0xff] %v893_v58  ;;  %896 = vst [vmem:[%s3967_s24 + $0x5d8] sm:$0xff] %v895_v59  ;;  %v899_v61 = vld [vmem:[%s3959_s23 + $0xbd0] sm:$0xff] }
  0x73   : > { %898 = vst [vmem:[%s3967_s24 + $0x5e0] sm:$0xff] %v897_v60  ;;  %v901_v62 = vld [vmem:[%s3959_s23 + $0xbe0] sm:$0xff]  ;;  %v903_v63 = vld [vmem:[%s3959_s23 + $0xbf0] sm:$0xff]  ;;  %900 = vst [vmem:[%s3967_s24 + $0x5e8] sm:$0xff] %v899_v61 }
  0x74   : > { %902 = vst [vmem:[%s3967_s24 + $0x5f0] sm:$0xff] %v901_v62  ;;  %904 = vst [vmem:[%s3967_s24 + $0x5f8] sm:$0xff] %v903_v63 }
  0x75 PF: > { %p3337_p7 = scmp.ge.s32.totalorder %s3901_s11, 1  ;;  %p909_p8 = scmp.lt.s32.totalorder %s3901_s11, 3 }
  0x77   : > { %p910_p9 = pnand %p3337_p7, %p909_p8 }
  0x79   : > { %913 = sbr.rel (%p910_p9) target bundleno = 794 (0x31a), region = 62 }
  0x80   : > { %s916_s25 = sand.u32 1, %s3893_s9   ;;  %v937_v0 = vld [vmem:[%s5773_s0 + $0x8] sm:$0xff]  ;;  %v5776_v1 = vmov 0.0|0.0   ;;  %vm1527_vm0 = vcmask 1046528   ;;  %vm1921_vm1 = vcmask 1045504  }
  0x81   : > { %3501 = vmatprep.subr.bf16.mxu0 %v5776_v1  ;;  %3549 = vmatprep.subr.bf16.mxu1 %v5776_v1  ;;  %s3790_s28 = smul.u32 1536, %s916_s25 }
  0x82   : > { %1094 = vmatprep.mubr.f32.mxu0 %v937_v0  ;;  %1344 = vmatprep.mubr.f32.mxu1 %v937_v0  ;;  %s3791_s20 = smul.u32 224, %s916_s25  ;;  %s3498_s25 = sshll.u32 (%p3949_p5), %s3332_s12, 3 }
  0x83   : > { %s4357_s29 = scalar_lea.vmem [#allocation2], %s3790_s28  ;;  %s5708_s17 = scalar_lea.vmem (%p3949_p5), %s5775_s2, %s3498_s25 }
  0x84   : > { %v998_v2 = vld [vmem:[%s4357_s29] sm:$0xff]  ;;  %v999_v3 = vld [vmem:[%s4357_s29 + $0x8] sm:$0xff]  ;;  %v1000_v7 = vld [vmem:[%s4357_s29 + $0x10] sm:$0xff]  ;;  %s5588_s9 = scalar_lea.vmem [#allocation3], %s3791_s20 }
  0x85   : > { %v3338_v4 = vld [vmem:[%s4357_s29 + $0x100] sm:$0xff]  ;;  %v3502_v5 = vpack.c.bf16 %v999_v3, %v998_v2  ;;  %v3339_v6 = vld [vmem:[%s4357_s29 + $0x108] sm:$0xff]  ;;  %v1001_v8 = vld [vmem:[%s4357_s29 + $0x18] sm:$0xff] }
  0x86   : > { %v3550_v9 = vpack.c.bf16 %v3339_v6, %v3338_v4  ;;  %v3340_v10 = vld [vmem:[%s4357_s29 + $0x110] sm:$0xff]  ;;  %v3341_v11 = vld [vmem:[%s4357_s29 + $0x118] sm:$0xff]  ;;  %v3505_v12 = vpack.c.bf16 %v1001_v8, %v1000_v7  ;;  %v1002_v14 = vld [vmem:[%s4357_s29 + $0x20] sm:$0xff] }
  0x87   : > { %3503 = vmatpush1.bf16.msra.mxu0 %v3502_v5  ;;  %v3553_v13 = vpack.c.bf16 %v3341_v11, %v3340_v10  ;;  %v1003_v15 = vld [vmem:[%s4357_s29 + $0x28] sm:$0xff]  ;;  %v3342_v16 = vld [vmem:[%s4357_s29 + $0x120] sm:$0xff]  ;;  %v1004_v20 = vld [vmem:[%s4357_s29 + $0x30] sm:$0xff] }
  0x88   : > { %3551 = vmatpush1.bf16.msra.mxu1 %v3550_v9  ;;  %3504 = vmatprep.subr.bf16.mxu0 %v5776_v1  ;;  %v3343_v17 = vld [vmem:[%s4357_s29 + $0x128] sm:$0xff]  ;;  %v3508_v18 = vpack.c.bf16 %v1003_v15, %v1002_v14  ;;  %v1005_v21 = vld [vmem:[%s4357_s29 + $0x38] sm:$0xff]  ;;  %v3344_v22 = vld [vmem:[%s4357_s29 + $0x130] sm:$0xff] }
  0x89   : > { %3552 = vmatprep.subr.bf16.mxu1 %v5776_v1  ;;  %v3556_v19 = vpack.c.bf16 %v3343_v17, %v3342_v16  ;;  %v3345_v23 = vld [vmem:[%s4357_s29 + $0x138] sm:$0xff]  ;;  %v3511_v24 = vpack.c.bf16 %v1005_v21, %v1004_v20  ;;  %v1006_v26 = vld [vmem:[%s4357_s29 + $0x40] sm:$0xff]  ;;  %v1007_v27 = vld [vmem:[%s4357_s29 + $0x48] sm:$0xff] }
  0x8a   : > { %v3559_v25 = vpack.c.bf16 %v3345_v23, %v3344_v22  ;;  %v3346_v28 = vld [vmem:[%s4357_s29 + $0x140] sm:$0xff]  ;;  %v3347_v29 = vld [vmem:[%s4357_s29 + $0x148] sm:$0xff]  ;;  %v3514_v30 = vpack.c.bf16 %v1007_v27, %v1006_v26  ;;  %v1008_v32 = vld [vmem:[%s4357_s29 + $0x50] sm:$0xff] }
  0x8b   : > { %3506 = vmatpush1.bf16.msra.mxu0 %v3505_v12  ;;  %v3562_v31 = vpack.c.bf16 %v3347_v29, %v3346_v28  ;;  %v1009_v33 = vld [vmem:[%s4357_s29 + $0x58] sm:$0xff]  ;;  %v3348_v34 = vld [vmem:[%s4357_s29 + $0x150] sm:$0xff]  ;;  %v1010_v38 = vld [vmem:[%s4357_s29 + $0x60] sm:$0xff] }
  0x8c   : > { %3554 = vmatpush1.bf16.msra.mxu1 %v3553_v13  ;;  %3507 = vmatprep.subr.bf16.mxu0 %v5776_v1  ;;  %v3349_v35 = vld [vmem:[%s4357_s29 + $0x158] sm:$0xff]  ;;  %v3517_v36 = vpack.c.bf16 %v1009_v33, %v1008_v32  ;;  %v1011_v39 = vld [vmem:[%s4357_s29 + $0x68] sm:$0xff]  ;;  %v3350_v40 = vld [vmem:[%s4357_s29 + $0x160] sm:$0xff] }
  0x8d   : > { %3555 = vmatprep.subr.bf16.mxu1 %v5776_v1  ;;  %v3565_v37 = vpack.c.bf16 %v3349_v35, %v3348_v34  ;;  %v3351_v41 = vld [vmem:[%s4357_s29 + $0x168] sm:$0xff]  ;;  %v3520_v42 = vpack.c.bf16 %v1011_v39, %v1010_v38  ;;  %v1012_v44 = vld [vmem:[%s4357_s29 + $0x70] sm:$0xff]  ;;  %v1013_v45 = vld [vmem:[%s4357_s29 + $0x78] sm:$0xff] }
  0x8e   : > { %v3568_v43 = vpack.c.bf16 %v3351_v41, %v3350_v40  ;;  %v3352_v46 = vld [vmem:[%s4357_s29 + $0x170] sm:$0xff]  ;;  %v3353_v47 = vld [vmem:[%s4357_s29 + $0x178] sm:$0xff]  ;;  %v3523_v48 = vpack.c.bf16 %v1013_v45, %v1012_v44  ;;  %v1014_v50 = vld [vmem:[%s4357_s29 + $0x80] sm:$0xff] }
  0x8f   : > { %3509 = vmatpush1.bf16.msra.mxu0 %v3508_v18  ;;  %v3571_v49 = vpack.c.bf16 %v3353_v47, %v3352_v46  ;;  %v1015_v51 = vld [vmem:[%s4357_s29 + $0x88] sm:$0xff]  ;;  %v3354_v52 = vld [vmem:[%s4357_s29 + $0x180] sm:$0xff]  ;;  %v1016_v56 = vld [vmem:[%s4357_s29 + $0x90] sm:$0xff] }
  0x90   : > { %3557 = vmatpush1.bf16.msra.mxu1 %v3556_v19  ;;  %3510 = vmatprep.subr.bf16.mxu0 %v5776_v1  ;;  %v3355_v53 = vld [vmem:[%s4357_s29 + $0x188] sm:$0xff]  ;;  %v3526_v54 = vpack.c.bf16 %v1015_v51, %v1014_v50  ;;  %v1017_v57 = vld [vmem:[%s4357_s29 + $0x98] sm:$0xff]  ;;  %v3356_v58 = vld [vmem:[%s4357_s29 + $0x190] sm:$0xff] }
  0x91   : > { %3558 = vmatprep.subr.bf16.mxu1 %v5776_v1  ;;  %v3574_v55 = vpack.c.bf16 %v3355_v53, %v3354_v52  ;;  %v3357_v59 = vld [vmem:[%s4357_s29 + $0x198] sm:$0xff]  ;;  %v3529_v60 = vpack.c.bf16 %v1017_v57, %v1016_v56  ;;  %v1018_v62 = vld [vmem:[%s4357_s29 + $0xa0] sm:$0xff]  ;;  %v1019_v63 = vld [vmem:[%s4357_s29 + $0xa8] sm:$0xff] }
  0x92   : > { %v3577_v61 = vpack.c.bf16 %v3357_v59, %v3356_v58  ;;  %v3358_v0 = vld [vmem:[%s4357_s29 + $0x1a0] sm:$0xff]  ;;  %v3359_v2 = vld [vmem:[%s4357_s29 + $0x1a8] sm:$0xff]  ;;  %v3532_v3 = vpack.c.bf16 %v1019_v63, %v1018_v62  ;;  %v1020_v5 = vld [vmem:[%s4357_s29 + $0xb0] sm:$0xff] }
  0x93   : > { %3512 = vmatpush1.bf16.msra.mxu0 %v3511_v24  ;;  %v3580_v4 = vpack.c.bf16 %v3359_v2, %v3358_v0  ;;  %v1021_v6 = vld [vmem:[%s4357_s29 + $0xb8] sm:$0xff]  ;;  %v3360_v7 = vld [vmem:[%s4357_s29 + $0x1b0] sm:$0xff]  ;;  %v1022_v11 = vld [vmem:[%s4357_s29 + $0xc0] sm:$0xff] }
  0x94   : > { %3560 = vmatpush1.bf16.msra.mxu1 %v3559_v25  ;;  %3513 = vmatprep.subr.bf16.mxu0 %v5776_v1  ;;  %v3361_v8 = vld [vmem:[%s4357_s29 + $0x1b8] sm:$0xff]  ;;  %v3535_v9 = vpack.c.bf16 %v1021_v6, %v1020_v5  ;;  %v1023_v12 = vld [vmem:[%s4357_s29 + $0xc8] sm:$0xff]  ;;  %v3362_v13 = vld [vmem:[%s4357_s29 + $0x1c0] sm:$0xff] }
  0x95   : > { %3561 = vmatprep.subr.bf16.mxu1 %v5776_v1  ;;  %v3583_v10 = vpack.c.bf16 %v3361_v8, %v3360_v7  ;;  %v3363_v14 = vld [vmem:[%s4357_s29 + $0x1c8] sm:$0xff]  ;;  %v3538_v15 = vpack.c.bf16 %v1023_v12, %v1022_v11  ;;  %v1024_v17 = vld [vmem:[%s4357_s29 + $0xd0] sm:$0xff]  ;;  %v1025_v18 = vld [vmem:[%s4357_s29 + $0xd8] sm:$0xff] }
  0x96   : > { %v3586_v16 = vpack.c.bf16 %v3363_v14, %v3362_v13  ;;  %v3364_v19 = vld [vmem:[%s4357_s29 + $0x1d0] sm:$0xff]  ;;  %v3365_v20 = vld [vmem:[%s4357_s29 + $0x1d8] sm:$0xff]  ;;  %v3541_v21 = vpack.c.bf16 %v1025_v18, %v1024_v17  ;;  %v1026_v23 = vld [vmem:[%s4357_s29 + $0xe0] sm:$0xff] }
  0x97   : > { %3515 = vmatpush1.bf16.msra.mxu0 %v3514_v30  ;;  %v3589_v22 = vpack.c.bf16 %v3365_v20, %v3364_v19  ;;  %v1027_v24 = vld [vmem:[%s4357_s29 + $0xe8] sm:$0xff]  ;;  %v3366_v25 = vld [vmem:[%s4357_s29 + $0x1e0] sm:$0xff]  ;;  %v1028_v29 = vld [vmem:[%s4357_s29 + $0xf0] sm:$0xff] }
  0x98   : > { %3563 = vmatpush1.bf16.msra.mxu1 %v3562_v31  ;;  %3516 = vmatprep.subr.bf16.mxu0 %v5776_v1  ;;  %v3367_v26 = vld [vmem:[%s4357_s29 + $0x1e8] sm:$0xff]  ;;  %v3544_v27 = vpack.c.bf16 %v1027_v24, %v1026_v23  ;;  %v1029_v30 = vld [vmem:[%s4357_s29 + $0xf8] sm:$0xff]  ;;  %v3368_v31 = vld [vmem:[%s4357_s29 + $0x1f0] sm:$0xff] }
  0x99   : > { %3564 = vmatprep.subr.bf16.mxu1 %v5776_v1  ;;  %v3592_v28 = vpack.c.bf16 %v3367_v26, %v3366_v25  ;;  %v3369_v32 = vld [vmem:[%s4357_s29 + $0x1f8] sm:$0xff]  ;;  %v3547_v33 = vpack.c.bf16 %v1029_v30, %v1028_v29  ;;  %v3370_v35 = vld [vmem:[%s4357_s29 + $0x200] sm:$0xff]  ;;  %v3403_v38 = vld [vmem:[%s4357_s29 + $0x308] sm:$0xff] }
  0x9a   : > { %v3595_v34 = vpack.c.bf16 %v3369_v32, %v3368_v31  ;;  %v4460_v39 = vld [vmem:[%s5773_s0] sm:$0xff]  ;;  %v4467_v41 = vld [vmem:[%s5773_s0 + $0x18] sm:$0xff]  ;;  %v3404_v45 = vld [vmem:[%s4357_s29 + $0x310] sm:$0xff] }
  0x9b   : > { %3518 = vmatpush1.bf16.msra.mxu0 %v3517_v36  ;;  %v3371_v36 = vld [vmem:[%s4357_s29 + $0x208] sm:$0xff]  ;;  %v3373_v44 = vld [vmem:[%s4357_s29 + $0x218] sm:$0xff]  ;;  %v4478_v47 = vld [vmem:[%s5773_s0 + $0x10] sm:$0xff] }
  0x9c   : > { %3566 = vmatpush1.bf16.msra.mxu1 %v3565_v37  ;;  %3519 = vmatprep.subr.bf16.mxu0 %v5776_v1  ;;  %v3402_v37 = vld [vmem:[%s4357_s29 + $0x300] sm:$0xff]  ;;  %v3598_v40 = vpack.c.bf16 %v3371_v36, %v3370_v35  ;;  %v3405_v46 = vld [vmem:[%s4357_s29 + $0x318] sm:$0xff]  ;;  %v3375_v52 = vld [vmem:[%s4357_s29 + $0x228] sm:$0xff] }
  0x9d   : > { %3567 = vmatprep.subr.bf16.mxu1 %v5776_v1  ;;  %v3649_v50 = vpack.c.bf16 %v3405_v46, %v3404_v45  ;;  %v3374_v51 = vld [vmem:[%s4357_s29 + $0x220] sm:$0xff]  ;;  %v4505_v56 = vld [vmem:[%s5773_s0 + $0x38] sm:$0xff]  ;;  %v3376_v59 = vld [vmem:[%s4357_s29 + $0x230] sm:$0xff] }
  0x9e   : > { %v3406_v53 = vld [vmem:[%s4357_s29 + $0x320] sm:$0xff]  ;;  %v3604_v57 = vpack.c.bf16 %v3375_v52, %v3374_v51  ;;  %v3409_v62 = vld [vmem:[%s4357_s29 + $0x338] sm:$0xff]  ;;  %v4519_v63 = vld [vmem:[%s5773_s0 + $0x30] sm:$0xff] }
  0x9f   : > { %3521 = vmatpush1.bf16.msra.mxu0 %v3520_v42  ;;  %v3646_v42 = vpack.c.bf16 %v3403_v38, %v3402_v37  ;;  %v4525_v0 = vld [vmem:[%s5773_s0 + $0x48] sm:$0xff]  ;;  %v3410_v6 = vld [vmem:[%s4357_s29 + $0x340] sm:$0xff]  ;;  %v3380_v12 = vld [vmem:[%s4357_s29 + $0x250] sm:$0xff] }
  0xa0   : > { %3569 = vmatpush1.bf16.msra.mxu1 %v3568_v43  ;;  %3522 = vmatprep.subr.bf16.mxu0 %v5776_v1  ;;  %v3372_v43 = vld [vmem:[%s4357_s29 + $0x210] sm:$0xff]  ;;  %v3379_v5 = vld [vmem:[%s4357_s29 + $0x248] sm:$0xff]  ;;  %v4539_v8 = vld [vmem:[%s5773_s0 + $0x40] sm:$0xff] }
  0xa1   : > { %3570 = vmatprep.subr.bf16.mxu1 %v5776_v1  ;;  %v3411_v7 = vld [vmem:[%s4357_s29 + $0x348] sm:$0xff]  ;;  %v3381_v13 = vld [vmem:[%s4357_s29 + $0x258] sm:$0xff]  ;;  %v3412_v14 = vld [vmem:[%s4357_s29 + $0x350] sm:$0xff] }
  0xa2   : > { %v3658_v11 = vpack.c.bf16 %v3411_v7, %v3410_v6  ;;  %v4565_v17 = vld [vmem:[%s5773_s0 + $0x68] sm:$0xff]  ;;  %v3613_v18 = vpack.c.bf16 %v3381_v13, %v3380_v12  ;;  %v3382_v20 = vld [vmem:[%s4357_s29 + $0x260] sm:$0xff]  ;;  %v4585_v25 = vld [vmem:[%s5773_s0 + $0x78] sm:$0xff] }
  0xa3   : > { %3524 = vmatpush1.bf16.msra.mxu0 %v3523_v48  ;;  %v4485_v48 = vld [vmem:[%s5773_s0 + $0x28] sm:$0xff]  ;;  %v4579_v24 = vld [vmem:[%s5773_s0 + $0x60] sm:$0xff]  ;;  %v3385_v29 = vld [vmem:[%s4357_s29 + $0x278] sm:$0xff] }
  0xa4   : > { %3572 = vmatpush1.bf16.msra.mxu1 %v3571_v49  ;;  %3525 = vmatprep.subr.bf16.mxu0 %v5776_v1  ;;  %v3601_v49 = vpack.c.bf16 %v3373_v44, %v3372_v43  ;;  %v3415_v23 = vld [vmem:[%s4357_s29 + $0x368] sm:$0xff]  ;;  %v3416_v30 = vld [vmem:[%s4357_s29 + $0x370] sm:$0xff]  ;;  %v3417_v31 = vld [vmem:[%s4357_s29 + $0x378] sm:$0xff] }
  0xa5   : > { %3573 = vmatprep.subr.bf16.mxu1 %v5776_v1  ;;  %v4599_v32 = vld [vmem:[%s5773_s0 + $0x70] sm:$0xff]  ;;  %v3667_v35 = vpack.c.bf16 %v3417_v31, %v3416_v30  ;;  %v3386_v36 = vld [vmem:[%s4357_s29 + $0x280] sm:$0xff]  ;;  %v3387_v37 = vld [vmem:[%s4357_s29 + $0x288] sm:$0xff] }
  0xa6   : > { %v3418_v38 = vld [vmem:[%s4357_s29 + $0x380] sm:$0xff]  ;;  %v4625_v43 = vld [vmem:[%s5773_s0 + $0x98] sm:$0xff]  ;;  %v3622_v44 = vpack.c.bf16 %v3387_v37, %v3386_v36  ;;  %v3388_v46 = vld [vmem:[%s4357_s29 + $0x290] sm:$0xff] }
  0xa7   : > { %3527 = vmatpush1.bf16.msra.mxu0 %v3526_v54  ;;  %v3407_v54 = vld [vmem:[%s4357_s29 + $0x328] sm:$0xff]  ;;  %v3421_v51 = vld [vmem:[%s4357_s29 + $0x398] sm:$0xff]  ;;  %v4639_v52 = vld [vmem:[%s5773_s0 + $0x90] sm:$0xff] }
  0xa8   : > { %3575 = vmatpush1.bf16.msra.mxu1 %v3574_v55  ;;  %3528 = vmatprep.subr.bf16.mxu0 %v5776_v1  ;;  %v4499_v55 = vld [vmem:[%s5773_s0 + $0x20] sm:$0xff]  ;;  %v3652_v58 = vpack.c.bf16 %v3407_v54, %v3406_v53  ;;  %v4645_v53 = vld [vmem:[%s5773_s0 + $0xa8] sm:$0xff]  ;;  %v3393_v6 = vld [vmem:[%s4357_s29 + $0x2b8] sm:$0xff] }
  0xa9   : > { %3576 = vmatprep.subr.bf16.mxu1 %v5776_v1  ;;  %v3424_v7 = vld [vmem:[%s4357_s29 + $0x3b0] sm:$0xff]  ;;  %v4685_v12 = vld [vmem:[%s5773_s0 + $0xc8] sm:$0xff]  ;;  %v3429_v30 = vld [vmem:[%s4357_s29 + $0x3d8] sm:$0xff] }
  0xaa   : > { %v4719_v31 = vld [vmem:[%s5773_s0 + $0xd0] sm:$0xff]  ;;  %v3398_v37 = vld [vmem:[%s4357_s29 + $0x2e0] sm:$0xff] }
  0xab   : > { %3530 = vmatpush1.bf16.msra.mxu0 %v3529_v60  ;;  %v3377_v60 = vld [vmem:[%s4357_s29 + $0x238] sm:$0xff] }
  0xac   : > { %3578 = vmatpush1.bf16.msra.mxu1 %v3577_v61  ;;  %3531 = vmatprep.subr.bf16.mxu0 %v5776_v1  ;;  %v3408_v61 = vld [vmem:[%s4357_s29 + $0x330] sm:$0xff]  ;;  %v3607_v2 = vpack.c.bf16 %v3377_v60, %v3376_v59  ;;  %v3391_v59 = vld [vmem:[%s4357_s29 + $0x2a8] sm:$0xff]  ;;  %v3422_v60 = vld [vmem:[%s4357_s29 + $0x3a0] sm:$0xff] }
  0xad   : > { %3579 = vmatprep.subr.bf16.mxu1 %v5776_v1 }
  0xaf   : > { %3533 = vmatpush1.bf16.msra.mxu0 %v3532_v3  ;;  %v3655_v3 = vpack.c.bf16 %v3409_v62, %v3408_v61  ;;  %v3423_v61 = vld [vmem:[%s4357_s29 + $0x3a8] sm:$0xff]  ;;  %v4659_v62 = vld [vmem:[%s5773_s0 + $0xa0] sm:$0xff] }
  0xb0   : > { %3581 = vmatpush1.bf16.msra.mxu1 %v3580_v4  ;;  %3534 = vmatprep.subr.bf16.mxu0 %v5776_v1  ;;  %v3378_v4 = vld [vmem:[%s4357_s29 + $0x240] sm:$0xff] }
  0xb1   : > { %3582 = vmatprep.subr.bf16.mxu1 %v5776_v1 }
  0xb3   : > { %3536 = vmatpush1.bf16.msra.mxu0 %v3535_v9  ;;  %v4545_v9 = vld [vmem:[%s5773_s0 + $0x58] sm:$0xff] }
  0xb4   : > { %3584 = vmatpush1.bf16.msra.mxu1 %v3583_v10  ;;  %3537 = vmatprep.subr.bf16.mxu0 %v5776_v1  ;;  %v3610_v10 = vpack.c.bf16 %v3379_v5, %v3378_v4  ;;  %v3676_v4 = vpack.c.bf16 %v3423_v61, %v3422_v60  ;;  %v3392_v5 = vld [vmem:[%s4357_s29 + $0x2b0] sm:$0xff]  ;;  %v4765_v60 = vld [vmem:[%s5773_s0 + $0x108] sm:$0xff] }
  0xb5   : > { %3585 = vmatprep.subr.bf16.mxu1 %v5776_v1  ;;  %v3631_v13 = vpack.c.bf16 %v3393_v6, %v3392_v5  ;;  %v4781_v5 = vld [vmem:[%s5773_s0 + $0x118] sm:$0xff]  ;;  %v4791_v6 = vld [vmem:[%s5773_s0 + $0x110] sm:$0xff] }
  0xb7   : > { %3539 = vmatpush1.bf16.msra.mxu0 %v3538_v15  ;;  %v3413_v15 = vld [vmem:[%s4357_s29 + $0x358] sm:$0xff] }
  0xb8   : > { %3587 = vmatpush1.bf16.msra.mxu1 %v3586_v16  ;;  %3540 = vmatprep.subr.bf16.mxu0 %v5776_v1  ;;  %v4559_v16 = vld [vmem:[%s5773_s0 + $0x50] sm:$0xff]  ;;  %v3661_v19 = vpack.c.bf16 %v3413_v15, %v3412_v14  ;;  %v3394_v15 = vld [vmem:[%s4357_s29 + $0x2c0] sm:$0xff] }
  0xb9   : > { %3588 = vmatprep.subr.bf16.mxu1 %v5776_v1 }
  0xbb   : > { %3542 = vmatpush1.bf16.msra.mxu0 %v3541_v21  ;;  %v3383_v21 = vld [vmem:[%s4357_s29 + $0x268] sm:$0xff] }
  0xbc   : > { %3590 = vmatpush1.bf16.msra.mxu1 %v3589_v22  ;;  %3543 = vmatprep.subr.bf16.mxu0 %v5776_v1  ;;  %v3414_v22 = vld [vmem:[%s4357_s29 + $0x360] sm:$0xff]  ;;  %v3616_v26 = vpack.c.bf16 %v3383_v21, %v3382_v20  ;;  %v3427_v20 = vld [vmem:[%s4357_s29 + $0x3c8] sm:$0xff] }
  0xbd   : > { %3591 = vmatprep.subr.bf16.mxu1 %v5776_v1  ;;  %v4699_v21 = vld [vmem:[%s5773_s0 + $0xc0] sm:$0xff] }
  0xbf   : > { %3545 = vmatpush1.bf16.msra.mxu0 %v3544_v27  ;;  %v3664_v27 = vpack.c.bf16 %v3415_v23, %v3414_v22  ;;  %v4705_v22 = vld [vmem:[%s5773_s0 + $0xd8] sm:$0xff] }
  0xc0   : > { %3593 = vmatpush1.bf16.msra.mxu1 %v3592_v28  ;;  %3546 = vmatprep.subr.bf16.mxu0 %v5776_v1  ;;  %v3384_v28 = vld [vmem:[%s4357_s29 + $0x270] sm:$0xff] }
  0xc1   : > { %3594 = vmatprep.subr.bf16.mxu1 %v5776_v1 }
  0xc3   : > { %3548 = vmatpush1.bf16.msra.mxu0 %v3547_v33  ;;  %v4605_v33 = vld [vmem:[%s5773_s0 + $0x88] sm:$0xff] }
  0xc4   : > { %3596 = vmatpush1.bf16.msra.mxu1 %v3595_v34  ;;  %3597 = vmatprep.subr.bf16.mxu0 %v5776_v1  ;;  %v3619_v34 = vpack.c.bf16 %v3385_v29, %v3384_v28  ;;  %v3397_v28 = vld [vmem:[%s4357_s29 + $0x2d8] sm:$0xff]  ;;  %v3428_v29 = vld [vmem:[%s4357_s29 + $0x3d0] sm:$0xff] }
  0xc5   : > { %3645 = vmatprep.subr.bf16.mxu1 %v5776_v1  ;;  %v3685_v36 = vpack.c.bf16 %v3429_v30, %v3428_v29  ;;  %v4881_v29 = vld [vmem:[%s5773_s0 + $0x188] sm:$0xff]  ;;  %v4889_v30 = vld [vmem:[%s5773_s0 + $0x180] sm:$0xff] }
  0xc6   : > { %1095 = vmatmul.mubr.f32.vlgmr.msra.gmra.mrb[0].mxu0 %v4460_v39 }
  0xc7   : > { %1345 = vmatmul.mubr.f32.vlgmr.msra.gmra.mrb[0].mxu1 %v4460_v39  ;;  %3599 = vmatpush1.bf16.msra.mxu0 %v3598_v40  ;;  %v3419_v40 = vld [vmem:[%s4357_s29 + $0x388] sm:$0xff] }
  0xc8   : > { %1099 = vmatprep.mubr.f32.mxu0 %v4467_v41  ;;  %1349 = vmatprep.mubr.f32.mxu1 %v4467_v41  ;;  %v3670_v45 = vpack.c.bf16 %v3419_v40, %v3418_v38  ;;  %v3399_v38 = vld [vmem:[%s4357_s29 + $0x2e8] sm:$0xff]  ;;  %v3430_v40 = vld [vmem:[%s4357_s29 + $0x3e0] sm:$0xff] }
  0xc9   : > { %3647 = vmatpush1.bf16.msra.mxu1 %v3646_v42  ;;  %3600 = vmatprep.subr.bf16.mxu0 %v5776_v1  ;;  %v4619_v42 = vld [vmem:[%s5773_s0 + $0x80] sm:$0xff] }
  0xca   : > { %1100 = vmatmul.mubr.f32.gmra.mrb[2].mxu0 %v4478_v47  ;;  %3648 = vmatprep.subr.bf16.mxu1 %v5776_v1 }
  0xcb   : > { %1350 = vmatmul.mubr.f32.gmra.mrb[2].mxu1 %v4478_v47  ;;  %1104 = vmatprep.mubr.f32.mxu0 %v4485_v48 }
  0xcc   : > { %1354 = vmatprep.mubr.f32.mxu1 %v4485_v48  ;;  %3602 = vmatpush1.bf16.msra.mxu0 %v3601_v49  ;;  %v3389_v49 = vld [vmem:[%s4357_s29 + $0x298] sm:$0xff] }
  0xcd   : > { %3650 = vmatpush1.bf16.msra.mxu1 %v3649_v50  ;;  %3603 = vmatprep.subr.bf16.mxu0 %v5776_v1  ;;  %v3420_v50 = vld [vmem:[%s4357_s29 + $0x390] sm:$0xff]  ;;  %v3625_v54 = vpack.c.bf16 %v3389_v49, %v3388_v46  ;;  %v4745_v46 = vld [vmem:[%s5773_s0 + $0xf8] sm:$0xff]  ;;  %v3640_v49 = vpack.c.bf16 %v3399_v38, %v3398_v37  ;;  %v4909_v37 = vld [vmem:[%s5773_s0 + $0x1a8] sm:$0xff] }
  0xce   : > { %1105 = vmatmul.mubr.f32.gmra.mrb[4].mxu0 %v4499_v55  ;;  %3651 = vmatprep.subr.bf16.mxu1 %v5776_v1  ;;  %v4917_v38 = vld [vmem:[%s5773_s0 + $0x1a0] sm:$0xff] }
  0xcf   : > { %1355 = vmatmul.mubr.f32.gmra.mrb[4].mxu1 %v4499_v55  ;;  %1109 = vmatprep.mubr.f32.mxu0 %v4505_v56 }
  0xd0   : > { %1359 = vmatprep.mubr.f32.mxu1 %v4505_v56  ;;  %3605 = vmatpush1.bf16.msra.mxu0 %v3604_v57  ;;  %v3673_v57 = vpack.c.bf16 %v3421_v51, %v3420_v50  ;;  %v3400_v51 = vld [vmem:[%s4357_s29 + $0x2f0] sm:$0xff] }
  0xd1   : > { %3653 = vmatpush1.bf16.msra.mxu1 %v3652_v58  ;;  %3606 = vmatprep.subr.bf16.mxu0 %v5776_v1  ;;  %v3390_v58 = vld [vmem:[%s4357_s29 + $0x2a0] sm:$0xff] }
  0xd2   : > { %1110 = vmatmul.mubr.f32.gmra.mrb[6].mxu0 %v4519_v63  ;;  %3654 = vmatprep.subr.bf16.mxu1 %v5776_v1 }
  0xd3   : > { %1360 = vmatmul.mubr.f32.gmra.mrb[6].mxu1 %v4519_v63  ;;  %1114 = vmatprep.mubr.f32.mxu0 %v4525_v0 }
  0xd4   : > { %1364 = vmatprep.mubr.f32.mxu1 %v4525_v0  ;;  %3608 = vmatpush1.bf16.msra.mxu0 %v3607_v2  ;;  %v4665_v2 = vld [vmem:[%s5773_s0 + $0xb8] sm:$0xff] }
  0xd5   : > { %3656 = vmatpush1.bf16.msra.mxu1 %v3655_v3  ;;  %3609 = vmatprep.subr.bf16.mxu0 %v5776_v1  ;;  %v3628_v3 = vpack.c.bf16 %v3391_v59, %v3390_v58  ;;  %v3433_v58 = vld [vmem:[%s4357_s29 + $0x3f8] sm:$0xff]  ;;  %v4759_v59 = vld [vmem:[%s5773_s0 + $0xf0] sm:$0xff] }
  0xd6   : > { %1115 = vmatmul.mubr.f32.gmra.mrb[8].mxu0 %v4539_v8  ;;  %3657 = vmatprep.subr.bf16.mxu1 %v5776_v1 }
  0xd7   : > { %1365 = vmatmul.mubr.f32.gmra.mrb[8].mxu1 %v4539_v8  ;;  %1119 = vmatprep.mubr.f32.mxu0 %v4545_v9 }
  0xd8   : > { %1369 = vmatprep.mubr.f32.mxu1 %v4545_v9  ;;  %3611 = vmatpush1.bf16.msra.mxu0 %v3610_v10  ;;  %v3425_v10 = vld [vmem:[%s4357_s29 + $0x3b8] sm:$0xff] }
  0xd9   : > { %3659 = vmatpush1.bf16.msra.mxu1 %v3658_v11  ;;  %3612 = vmatprep.subr.bf16.mxu0 %v5776_v1  ;;  %v4679_v11 = vld [vmem:[%s5773_s0 + $0xb0] sm:$0xff]  ;;  %v3679_v14 = vpack.c.bf16 %v3425_v10, %v3424_v7  ;;  %v4797_v7 = vld [vmem:[%s5773_s0 + $0x128] sm:$0xff]  ;;  %v4805_v10 = vld [vmem:[%s5773_s0 + $0x120] sm:$0xff] }
  0xda   : > { %1120 = vmatmul.mubr.f32.gmra.mrb[10].mxu0 %v4559_v16  ;;  %3660 = vmatprep.subr.bf16.mxu1 %v5776_v1 }
  0xdb   : > { %1370 = vmatmul.mubr.f32.gmra.mrb[10].mxu1 %v4559_v16  ;;  %1124 = vmatprep.mubr.f32.mxu0 %v4565_v17 }
  0xdc   : > { %1374 = vmatprep.mubr.f32.mxu1 %v4565_v17  ;;  %3614 = vmatpush1.bf16.msra.mxu0 %v3613_v18  ;;  %v3395_v18 = vld [vmem:[%s4357_s29 + $0x2c8] sm:$0xff] }
  0xdd   : > { %3662 = vmatpush1.bf16.msra.mxu1 %v3661_v19  ;;  %3615 = vmatprep.subr.bf16.mxu0 %v5776_v1  ;;  %v3426_v19 = vld [vmem:[%s4357_s29 + $0x3c0] sm:$0xff]  ;;  %v3634_v23 = vpack.c.bf16 %v3395_v18, %v3394_v15  ;;  %v4825_v15 = vld [vmem:[%s5773_s0 + $0x148] sm:$0xff] }
  0xde   : > { %1125 = vmatmul.mubr.f32.gmra.mrb[12].mxu0 %v4579_v24  ;;  %3663 = vmatprep.subr.bf16.mxu1 %v5776_v1  ;;  %v4833_v18 = vld [vmem:[%s5773_s0 + $0x140] sm:$0xff] }
  0xdf   : > { %1375 = vmatmul.mubr.f32.gmra.mrb[12].mxu1 %v4579_v24  ;;  %1129 = vmatprep.mubr.f32.mxu0 %v4585_v25 }
  0xe0   : > { %1379 = vmatprep.mubr.f32.mxu1 %v4585_v25  ;;  %3617 = vmatpush1.bf16.msra.mxu0 %v3616_v26  ;;  %v3682_v26 = vpack.c.bf16 %v3427_v20, %v3426_v19  ;;  %v4839_v19 = vld [vmem:[%s5773_s0 + $0x158] sm:$0xff]  ;;  %v4847_v20 = vld [vmem:[%s5773_s0 + $0x150] sm:$0xff] }
  0xe1   : > { %3665 = vmatpush1.bf16.msra.mxu1 %v3664_v27  ;;  %3618 = vmatprep.subr.bf16.mxu0 %v5776_v1  ;;  %v3396_v27 = vld [vmem:[%s4357_s29 + $0x2d0] sm:$0xff] }
  0xe2   : > { %1130 = vmatmul.mubr.f32.gmra.mrb[14].mxu0 %v4599_v32  ;;  %3666 = vmatprep.subr.bf16.mxu1 %v5776_v1 }
  0xe3   : > { %1380 = vmatmul.mubr.f32.gmra.mrb[14].mxu1 %v4599_v32  ;;  %1134 = vmatprep.mubr.f32.mxu0 %v4605_v33 }
  0xe4   : > { %1384 = vmatprep.mubr.f32.mxu1 %v4605_v33  ;;  %3620 = vmatpush1.bf16.msra.mxu0 %v3619_v34  ;;  %v4725_v34 = vld [vmem:[%s5773_s0 + $0xe8] sm:$0xff] }
  0xe5   : > { %3668 = vmatpush1.bf16.msra.mxu1 %v3667_v35  ;;  %3621 = vmatprep.subr.bf16.mxu0 %v5776_v1  ;;  %v3637_v35 = vpack.c.bf16 %v3397_v28, %v3396_v27  ;;  %v4867_v27 = vld [vmem:[%s5773_s0 + $0x178] sm:$0xff]  ;;  %v4875_v28 = vld [vmem:[%s5773_s0 + $0x170] sm:$0xff] }
  0xe6   : > { %1135 = vmatmul.mubr.f32.gmra.mrb[16].mxu0 %v4619_v42  ;;  %3669 = vmatprep.subr.bf16.mxu1 %v5776_v1 }
  0xe7   : > { %1385 = vmatmul.mubr.f32.gmra.mrb[16].mxu1 %v4619_v42  ;;  %1139 = vmatprep.mubr.f32.mxu0 %v4625_v43 }
  0xe8   : > { %1389 = vmatprep.mubr.f32.mxu1 %v4625_v43  ;;  %3623 = vmatpush1.bf16.msra.mxu0 %v3622_v44  ;;  %v3431_v44 = vld [vmem:[%s4357_s29 + $0x3e8] sm:$0xff] }
  0xe9   : > { %3671 = vmatpush1.bf16.msra.mxu1 %v3670_v45  ;;  %3624 = vmatprep.subr.bf16.mxu0 %v5776_v1  ;;  %v4739_v45 = vld [vmem:[%s5773_s0 + $0xe0] sm:$0xff]  ;;  %v3688_v50 = vpack.c.bf16 %v3431_v44, %v3430_v40  ;;  %v4923_v40 = vld [vmem:[%s5773_s0 + $0x1b8] sm:$0xff]  ;;  %v4931_v44 = vld [vmem:[%s5773_s0 + $0x1b0] sm:$0xff] }
  0xea   : > { %1140 = vmatmul.mubr.f32.gmra.mrb[18].mxu0 %v4639_v52  ;;  %3672 = vmatprep.subr.bf16.mxu1 %v5776_v1  ;;  %5797 = vst [vmem:[#allocation4_spill] sm:$0xff] %v4923_v40  ;;  %5798 = vst [vmem:[#allocation5_spill] sm:$0xff] %v4931_v44 }
  0xeb   : > { %1390 = vmatmul.mubr.f32.gmra.mrb[18].mxu1 %v4639_v52  ;;  %1144 = vmatprep.mubr.f32.mxu0 %v4645_v53 }
  0xec   : > { %1394 = vmatprep.mubr.f32.mxu1 %v4645_v53  ;;  %3626 = vmatpush1.bf16.msra.mxu0 %v3625_v54  ;;  %v3401_v54 = vld [vmem:[%s4357_s29 + $0x2f8] sm:$0xff] }
  0xed   : > { %3674 = vmatpush1.bf16.msra.mxu1 %v3673_v57  ;;  %3627 = vmatprep.subr.bf16.mxu0 %v5776_v1  ;;  %v3432_v57 = vld [vmem:[%s4357_s29 + $0x3f0] sm:$0xff]  ;;  %v3643_v61 = vpack.c.bf16 %v3401_v54, %v3400_v51  ;;  %v4951_v51 = vld [vmem:[%s5773_s0 + $0x1d8] sm:$0xff] }
  0xee   : > { %1145 = vmatmul.mubr.f32.gmra.mrb[20].mxu0 %v4659_v62  ;;  %3675 = vmatprep.subr.bf16.mxu1 %v5776_v1  ;;  %5801 = vst [vmem:[#allocation8_spill] sm:$0xff] %v4951_v51  ;;  %v4959_v54 = vld [vmem:[%s5773_s0 + $0x1d0] sm:$0xff] }
  0xef   : > { %1395 = vmatmul.mubr.f32.gmra.mrb[20].mxu1 %v4659_v62  ;;  %1149 = vmatprep.mubr.f32.mxu0 %v4665_v2  ;;  %5802 = vst [vmem:[#allocation9_spill] sm:$0xff] %v4959_v54 }
  0xf0   : > { %1399 = vmatprep.mubr.f32.mxu1 %v4665_v2  ;;  %3629 = vmatpush1.bf16.msra.mxu0 %v3628_v3  ;;  %v3691_v3 = vpack.c.bf16 %v3433_v58, %v3432_v57  ;;  %v4965_v57 = vld [vmem:[%s5773_s0 + $0x1e8] sm:$0xff]  ;;  %v4973_v58 = vld [vmem:[%s5773_s0 + $0x1e0] sm:$0xff] }
  0xf1   : > { %3677 = vmatpush1.bf16.msra.mxu1 %v3676_v4  ;;  %3630 = vmatprep.subr.bf16.mxu0 %v5776_v1  ;;  %v4775_v4 = vld [vmem:[%s5773_s0 + $0x100] sm:$0xff]  ;;  %5803 = vst [vmem:[#allocation10_spill] sm:$0xff] %v4965_v57  ;;  %5804 = vst [vmem:[#allocation11_spill] sm:$0xff] %v4973_v58 }
  0xf2   : > { %1150 = vmatmul.mubr.f32.gmra.mrb[22].mxu0 %v4679_v11  ;;  %3678 = vmatprep.subr.bf16.mxu1 %v5776_v1 }
  0xf3   : > { %1400 = vmatmul.mubr.f32.gmra.mrb[22].mxu1 %v4679_v11  ;;  %1154 = vmatprep.mubr.f32.mxu0 %v4685_v12 }
  0xf4   : > { %1404 = vmatprep.mubr.f32.mxu1 %v4685_v12  ;;  %3632 = vmatpush1.bf16.msra.mxu0 %v3631_v13  ;;  %v4811_v13 = vld [vmem:[%s5773_s0 + $0x138] sm:$0xff] }
  0xf5   : > { %3680 = vmatpush1.bf16.msra.mxu1 %v3679_v14  ;;  %3633 = vmatprep.subr.bf16.mxu0 %v5776_v1  ;;  %v4819_v14 = vld [vmem:[%s5773_s0 + $0x130] sm:$0xff] }
  0xf6   : > { %1155 = vmatmul.mubr.f32.gmra.mrb[24].mxu0 %v4699_v21  ;;  %3681 = vmatprep.subr.bf16.mxu1 %v5776_v1 }
  0xf7   : > { %1405 = vmatmul.mubr.f32.gmra.mrb[24].mxu1 %v4699_v21  ;;  %1159 = vmatprep.mubr.f32.mxu0 %v4705_v22 }
  0xf8   : > { %1409 = vmatprep.mubr.f32.mxu1 %v4705_v22  ;;  %3635 = vmatpush1.bf16.msra.mxu0 %v3634_v23  ;;  %v4853_v23 = vld [vmem:[%s5773_s0 + $0x168] sm:$0xff] }
  0xf9   : > { %3683 = vmatpush1.bf16.msra.mxu1 %v3682_v26  ;;  %3636 = vmatprep.subr.bf16.mxu0 %v5776_v1  ;;  %v4861_v26 = vld [vmem:[%s5773_s0 + $0x160] sm:$0xff] }
  0xfa   : > { %1160 = vmatmul.mubr.f32.gmra.mrb[26].mxu0 %v4719_v31  ;;  %3684 = vmatprep.subr.bf16.mxu1 %v5776_v1 }
  0xfb   : > { %1410 = vmatmul.mubr.f32.gmra.mrb[26].mxu1 %v4719_v31  ;;  %1164 = vmatprep.mubr.f32.mxu0 %v4725_v34 }
  0xfc   : > { %1414 = vmatprep.mubr.f32.mxu1 %v4725_v34  ;;  %3638 = vmatpush1.bf16.msra.mxu0 %v3637_v35  ;;  %v4895_v35 = vld [vmem:[%s5773_s0 + $0x198] sm:$0xff] }
  0xfd   : > { %3686 = vmatpush1.bf16.msra.mxu1 %v3685_v36  ;;  %3639 = vmatprep.subr.bf16.mxu0 %v5776_v1  ;;  %v4903_v36 = vld [vmem:[%s5773_s0 + $0x190] sm:$0xff] }
  0xfe   : > { %1165 = vmatmul.mubr.f32.gmra.mrb[28].mxu0 %v4739_v45  ;;  %3687 = vmatprep.subr.bf16.mxu1 %v5776_v1 }
  0xff   : > { %1415 = vmatmul.mubr.f32.gmra.mrb[28].mxu1 %v4739_v45  ;;  %1169 = vmatprep.mubr.f32.mxu0 %v4745_v46 }
 0x100   : > { %1419 = vmatprep.mubr.f32.mxu1 %v4745_v46  ;;  %3641 = vmatpush1.bf16.msra.mxu0 %v3640_v49  ;;  %v4937_v49 = vld [vmem:[%s5773_s0 + $0x1c8] sm:$0xff] }
 0x101   : > { %3689 = vmatpush1.bf16.msra.mxu1 %v3688_v50  ;;  %3642 = vmatprep.subr.bf16.mxu0 %v5776_v1  ;;  %5799 = vst [vmem:[#allocation6_spill] sm:$0xff] %v4937_v49  ;;  %v4945_v50 = vld [vmem:[%s5773_s0 + $0x1c0] sm:$0xff] }
 0x102   : > { %1170 = vmatmul.mubr.f32.gmra.mrb[30].mxu0 %v4759_v59  ;;  %3690 = vmatprep.subr.bf16.mxu1 %v5776_v1  ;;  %5800 = vst [vmem:[#allocation7_spill] sm:$0xff] %v4945_v50 }
 0x103   : > { %1420 = vmatmul.mubr.f32.gmra.mrb[30].mxu1 %v4759_v59  ;;  %1174 = vmatprep.mubr.f32.mxu0 %v4765_v60 }
 0x104   : > { %1424 = vmatprep.mubr.f32.mxu1 %v4765_v60  ;;  %3644 = vmatpush1.bf16.msra.mxu0 %v3643_v61  ;;  %v3434_v61 = vld [vmem:[%s4357_s29 + $0x400] sm:$0xff] }
 0x105   : > { %3692 = vmatpush1.bf16.msra.mxu1 %v3691_v3  ;;  %3693 = vmatprep.subr.bf16.mxu0 %v5776_v1  ;;  %v3435_v3 = vld [vmem:[%s4357_s29 + $0x408] sm:$0xff] }
 0x106   : > { %1175 = vmatmul.mubr.f32.gmra.mrb[32].mxu0 %v4775_v4  ;;  %3741 = vmatprep.subr.bf16.mxu1 %v5776_v1  ;;  %v3466_v1 = vld [vmem:[%s4357_s29 + $0x500] sm:$0xff] }
 0x107   : > { %1425 = vmatmul.mubr.f32.gmra.mrb[32].mxu1 %v4775_v4  ;;  %1179 = vmatprep.mubr.f32.mxu0 %v4781_v5 }
 0x108   : > { %1429 = vmatprep.mubr.f32.mxu1 %v4781_v5 }
 0x10a   : > { %1180 = vmatmul.mubr.f32.gmra.mrb[34].mxu0 %v4791_v6 }
 0x10b   : > { %1430 = vmatmul.mubr.f32.gmra.mrb[34].mxu1 %v4791_v6  ;;  %1184 = vmatprep.mubr.f32.mxu0 %v4797_v7 }
 0x10c   : > { %1434 = vmatprep.mubr.f32.mxu1 %v4797_v7 }
 0x10e   : > { %1185 = vmatmul.mubr.f32.gmra.mrb[36].mxu0 %v4805_v10 }
 0x10f   : > { %1435 = vmatmul.mubr.f32.gmra.mrb[36].mxu1 %v4805_v10  ;;  %1189 = vmatprep.mubr.f32.mxu0 %v4811_v13 }
 0x110   : > { %1439 = vmatprep.mubr.f32.mxu1 %v4811_v13 }
 0x112   : > { %1190 = vmatmul.mubr.f32.gmra.mrb[38].mxu0 %v4819_v14 }
 0x113   : > { %1440 = vmatmul.mubr.f32.gmra.mrb[38].mxu1 %v4819_v14  ;;  %1194 = vmatprep.mubr.f32.mxu0 %v4825_v15 }
 0x114   : > { %1444 = vmatprep.mubr.f32.mxu1 %v4825_v15 }
 0x116   : > { %1195 = vmatmul.mubr.f32.gmra.mrb[40].mxu0 %v4833_v18 }
 0x117   : > { %1445 = vmatmul.mubr.f32.gmra.mrb[40].mxu1 %v4833_v18  ;;  %1199 = vmatprep.mubr.f32.mxu0 %v4839_v19 }
 0x118   : > { %1449 = vmatprep.mubr.f32.mxu1 %v4839_v19 }
 0x11a   : > { %1200 = vmatmul.mubr.f32.gmra.mrb[42].mxu0 %v4847_v20 }
 0x11b   : > { %1450 = vmatmul.mubr.f32.gmra.mrb[42].mxu1 %v4847_v20  ;;  %1204 = vmatprep.mubr.f32.mxu0 %v4853_v23 }
 0x11c   : > { %1454 = vmatprep.mubr.f32.mxu1 %v4853_v23 }
 0x11e   : > { %1205 = vmatmul.mubr.f32.gmra.mrb[44].mxu0 %v4861_v26 }
 0x11f   : > { %1455 = vmatmul.mubr.f32.gmra.mrb[44].mxu1 %v4861_v26  ;;  %1209 = vmatprep.mubr.f32.mxu0 %v4867_v27 }
 0x120   : > { %1459 = vmatprep.mubr.f32.mxu1 %v4867_v27 }
 0x122   : > { %1210 = vmatmul.mubr.f32.gmra.mrb[46].mxu0 %v4875_v28 }
 0x123   : > { %1460 = vmatmul.mubr.f32.gmra.mrb[46].mxu1 %v4875_v28  ;;  %1214 = vmatprep.mubr.f32.mxu0 %v4881_v29 }
 0x124   : > { %1464 = vmatprep.mubr.f32.mxu1 %v4881_v29 }
 0x126   : > { %1215 = vmatmul.mubr.f32.gmra.mrb[48].mxu0 %v4889_v30 }
 0x127   : > { %1465 = vmatmul.mubr.f32.gmra.mrb[48].mxu1 %v4889_v30  ;;  %1219 = vmatprep.mubr.f32.mxu0 %v4895_v35 }
 0x128   : > { %1469 = vmatprep.mubr.f32.mxu1 %v4895_v35 }
 0x12a   : > { %1220 = vmatmul.mubr.f32.gmra.mrb[50].mxu0 %v4903_v36 }
 0x12b   : > { %1470 = vmatmul.mubr.f32.gmra.mrb[50].mxu1 %v4903_v36  ;;  %1224 = vmatprep.mubr.f32.mxu0 %v4909_v37 }
 0x12c   : > { %1474 = vmatprep.mubr.f32.mxu1 %v4909_v37 }
 0x12e   : > { %1225 = vmatmul.mubr.f32.gmra.mrb[52].mxu0 %v4917_v38 }
 0x12f   : > { %1475 = vmatmul.mubr.f32.gmra.mrb[52].mxu1 %v4917_v38  ;;  %1229 = vmatprep.mubr.f32.mxu0 %v4923_v40 }
 0x130   : > { %1479 = vmatprep.mubr.f32.mxu1 %v4923_v40  ;;  %v3469_v40 = vld [vmem:[%s4357_s29 + $0x518] sm:$0xff] }
 0x132   : > { %1230 = vmatmul.mubr.f32.gmra.mrb[54].mxu0 %v4931_v44 }
 0x133   : > { %1480 = vmatmul.mubr.f32.gmra.mrb[54].mxu1 %v4931_v44  ;;  %1234 = vmatprep.mubr.f32.mxu0 %v4937_v49  ;;  %v3437_v44 = vld [vmem:[%s4357_s29 + $0x418] sm:$0xff] }
 0x134   : > { %1484 = vmatprep.mubr.f32.mxu1 %v4937_v49  ;;  %v3436_v49 = vld [vmem:[%s4357_s29 + $0x410] sm:$0xff] }
 0x136   : > { %1235 = vmatmul.mubr.f32.gmra.mrb[56].mxu0 %v4945_v50 }
 0x137   : > { %1485 = vmatmul.mubr.f32.gmra.mrb[56].mxu1 %v4945_v50  ;;  %1238 = vmatprep.mubr.f32.mxu0 %v4951_v51  ;;  %v3694_v50 = vpack.c.bf16 %v3435_v3, %v3434_v61  ;;  %v3697_v61 = vpack.c.bf16 %v3437_v44, %v3436_v49  ;;  %v5806_v3 = vmov 0.0|0.0   ;;  %v3440_v44 = vld [vmem:[%s4357_s29 + $0x430] sm:$0xff]  ;;  %v3441_v49 = vld [vmem:[%s4357_s29 + $0x438] sm:$0xff] }
 0x138   : > { %1489 = vmatprep.mubr.f32.mxu1 %v4951_v51  ;;  %v3467_v51 = vld [vmem:[%s4357_s29 + $0x508] sm:$0xff] }
 0x13a   : > { %1239 = vmatmul.mubr.f32.gmra.mrb[58].mxu0 %v4959_v54 }
 0x13b   : > { %1490 = vmatmul.mubr.f32.gmra.mrb[58].mxu1 %v4959_v54  ;;  %1242 = vmatprep.mubr.f32.mxu0 %v4965_v57  ;;  %v4985_v54 = vld [vmem:[%s5773_s0 + $0x8] sm:$0xff] }
 0x13c   : > { %1493 = vmatprep.mubr.f32.mxu1 %v4965_v57  ;;  %5805 = vst [vmem:[#allocation12_spill] sm:$0xff] %v4985_v54  ;;  %v3742_v57 = vpack.c.bf16 %v3467_v51, %v3466_v1  ;;  %v3438_v51 = vld [vmem:[%s4357_s29 + $0x420] sm:$0xff] }
 0x13e   : > { %1243 = vmatmul.mubr.f32.gmra.mrb[60].mxu0 %v4973_v58 }
 0x13f   : > { %1494 = vmatmul.mubr.f32.gmra.mrb[60].mxu1 %v4973_v58  ;;  %1738 = vmatprep.mubr.f32.mxu0 %v4985_v54  ;;  %v3468_v58 = vld [vmem:[%s4357_s29 + $0x510] sm:$0xff] }
 0x140   : > { %2132 = vmatprep.mubr.f32.mxu1 %v4985_v54  ;;  %v3745_v1 = vpack.c.bf16 %v3469_v40, %v3468_v58  ;;  %v3439_v54 = vld [vmem:[%s4357_s29 + $0x428] sm:$0xff]  ;;  %v3442_v58 = vld [vmem:[%s4357_s29 + $0x440] sm:$0xff] }
 0x142   : > { %1739 = vmatmul.mubr.f32.vlgmr.msra.gmra.mrb[62].mxu0 %v4460_v39 }
 0x143   : > { %2133 = vmatmul.mubr.f32.vlgmr.msra.gmra.mrb[62].mxu1 %v4460_v39  ;;  %3695 = vmatpush1.bf16.msra.mxu0 %v3694_v50  ;;  %v3470_v39 = vld [vmem:[%s4357_s29 + $0x520] sm:$0xff]  ;;  %v3471_v50 = vld [vmem:[%s4357_s29 + $0x528] sm:$0xff] }
 0x144   : > { %1743 = vmatprep.mubr.f32.mxu0 %v4467_v41  ;;  %2136 = vmatprep.mubr.f32.mxu1 %v4467_v41  ;;  %v3700_v41 = vpack.c.bf16 %v3439_v54, %v3438_v51  ;;  %v3748_v40 = vpack.c.bf16 %v3471_v50, %v3470_v39  ;;  %v3444_v39 = vld [vmem:[%s4357_s29 + $0x450] sm:$0xff]  ;;  %v3445_v50 = vld [vmem:[%s4357_s29 + $0x458] sm:$0xff] }
 0x145   : > { %3743 = vmatpush1.bf16.msra.mxu1 %v3742_v57  ;;  %3696 = vmatprep.subr.bf16.mxu0 %v5806_v3  ;;  %v3473_v57 = vld [vmem:[%s4357_s29 + $0x538] sm:$0xff] }
 0x146   : > { %1744 = vmatmul.mubr.f32.gmra.mrb[64].mxu0 %v4478_v47  ;;  %3744 = vmatprep.subr.bf16.mxu1 %v5806_v3 }
 0x147   : > { %2137 = vmatmul.mubr.f32.gmra.mrb[64].mxu1 %v4478_v47  ;;  %1748 = vmatprep.mubr.f32.mxu0 %v4485_v48  ;;  %v3472_v47 = vld [vmem:[%s4357_s29 + $0x530] sm:$0xff] }
 0x148   : > { %2140 = vmatprep.mubr.f32.mxu1 %v4485_v48  ;;  %3698 = vmatpush1.bf16.msra.mxu0 %v3697_v61  ;;  %v3703_v48 = vpack.c.bf16 %v3441_v49, %v3440_v44  ;;  %v3751_v54 = vpack.c.bf16 %v3473_v57, %v3472_v47  ;;  %v3443_v61 = vld [vmem:[%s4357_s29 + $0x448] sm:$0xff]  ;;  %v3446_v44 = vld [vmem:[%s4357_s29 + $0x460] sm:$0xff] }
 0x149   : > { %3746 = vmatpush1.bf16.msra.mxu1 %v3745_v1  ;;  %3699 = vmatprep.subr.bf16.mxu0 %v5806_v3  ;;  %v3475_v1 = vld [vmem:[%s4357_s29 + $0x548] sm:$0xff] }
 0x14a   : > { %1749 = vmatmul.mubr.f32.gmra.mrb[66].mxu0 %v4499_v55  ;;  %3747 = vmatprep.subr.bf16.mxu1 %v5806_v3  ;;  %v3447_v49 = vld [vmem:[%s4357_s29 + $0x468] sm:$0xff] }
 0x14b   : > { %2141 = vmatmul.mubr.f32.gmra.mrb[66].mxu1 %v4499_v55  ;;  %1753 = vmatprep.mubr.f32.mxu0 %v4505_v56  ;;  %v3474_v55 = vld [vmem:[%s4357_s29 + $0x540] sm:$0xff]  ;;  %v3479_v47 = vld [vmem:[%s4357_s29 + $0x568] sm:$0xff] }
 0x14c   : > { %2145 = vmatprep.mubr.f32.mxu1 %v4505_v56  ;;  %3701 = vmatpush1.bf16.msra.mxu0 %v3700_v41  ;;  %v3706_v56 = vpack.c.bf16 %v3443_v61, %v3442_v58  ;;  %v3754_v51 = vpack.c.bf16 %v3475_v1, %v3474_v55  ;;  %v3477_v41 = vld [vmem:[%s4357_s29 + $0x558] sm:$0xff]  ;;  %v3450_v55 = vld [vmem:[%s4357_s29 + $0x480] sm:$0xff]  ;;  %v3451_v1 = vld [vmem:[%s4357_s29 + $0x488] sm:$0xff] }
 0x14d   : > { %3749 = vmatpush1.bf16.msra.mxu1 %v3748_v40  ;;  %3702 = vmatprep.subr.bf16.mxu0 %v5806_v3  ;;  %v3481_v58 = vld [vmem:[%s4357_s29 + $0x578] sm:$0xff] }
 0x14e   : > { %1754 = vmatmul.mubr.f32.gmra.mrb[68].mxu0 %v4519_v63  ;;  %3750 = vmatprep.subr.bf16.mxu1 %v5806_v3 }
 0x14f   : > { %2146 = vmatmul.mubr.f32.gmra.mrb[68].mxu1 %v4519_v63  ;;  %1758 = vmatprep.mubr.f32.mxu0 %v4525_v0  ;;  %v3476_v63 = vld [vmem:[%s4357_s29 + $0x550] sm:$0xff] }
 0x150   : > { %2150 = vmatprep.mubr.f32.mxu1 %v4525_v0  ;;  %3704 = vmatpush1.bf16.msra.mxu0 %v3703_v48  ;;  %v3709_v0 = vpack.c.bf16 %v3445_v50, %v3444_v39  ;;  %v3757_v40 = vpack.c.bf16 %v3477_v41, %v3476_v63  ;;  %v3448_v48 = vld [vmem:[%s4357_s29 + $0x470] sm:$0xff]  ;;  %v3453_v50 = vld [vmem:[%s4357_s29 + $0x498] sm:$0xff] }
 0x151   : > { %3752 = vmatpush1.bf16.msra.mxu1 %v3751_v54  ;;  %3705 = vmatprep.subr.bf16.mxu0 %v5806_v3  ;;  %v3449_v54 = vld [vmem:[%s4357_s29 + $0x478] sm:$0xff]  ;;  %v3452_v39 = vld [vmem:[%s4357_s29 + $0x490] sm:$0xff] }
 0x152   : > { %1759 = vmatmul.mubr.f32.gmra.mrb[70].mxu0 %v4539_v8  ;;  %3753 = vmatprep.subr.bf16.mxu1 %v5806_v3  ;;  %v3485_v63 = vld [vmem:[%s4357_s29 + $0x598] sm:$0xff] }
 0x153   : > { %2151 = vmatmul.mubr.f32.gmra.mrb[70].mxu1 %v4539_v8  ;;  %1763 = vmatprep.mubr.f32.mxu0 %v4545_v9  ;;  %v3478_v8 = vld [vmem:[%s4357_s29 + $0x560] sm:$0xff] }
 0x154   : > { %2155 = vmatprep.mubr.f32.mxu1 %v4545_v9  ;;  %3707 = vmatpush1.bf16.msra.mxu0 %v3706_v56  ;;  %v3712_v9 = vpack.c.bf16 %v3447_v49, %v3446_v44  ;;  %v3760_v57 = vpack.c.bf16 %v3479_v47, %v3478_v8  ;;  %v3483_v56 = vld [vmem:[%s4357_s29 + $0x588] sm:$0xff]  ;;  %v3456_v8 = vld [vmem:[%s4357_s29 + $0x4b0] sm:$0xff]  ;;  %v3457_v47 = vld [vmem:[%s4357_s29 + $0x4b8] sm:$0xff] }
 0x155   : > { %3755 = vmatpush1.bf16.msra.mxu1 %v3754_v51  ;;  %3708 = vmatprep.subr.bf16.mxu0 %v5806_v3  ;;  %v3487_v44 = vld [vmem:[%s4357_s29 + $0x5a8] sm:$0xff] }
 0x156   : > { %1764 = vmatmul.mubr.f32.gmra.mrb[72].mxu0 %v4559_v16  ;;  %3756 = vmatprep.subr.bf16.mxu1 %v5806_v3 }
 0x157   : > { %2156 = vmatmul.mubr.f32.gmra.mrb[72].mxu1 %v4559_v16  ;;  %1768 = vmatprep.mubr.f32.mxu0 %v4565_v17  ;;  %v3480_v16 = vld [vmem:[%s4357_s29 + $0x570] sm:$0xff] }
 0x158   : > { %2160 = vmatprep.mubr.f32.mxu1 %v4565_v17  ;;  %3710 = vmatpush1.bf16.msra.mxu0 %v3709_v0  ;;  %v3715_v17 = vpack.c.bf16 %v3449_v54, %v3448_v48  ;;  %v3763_v61 = vpack.c.bf16 %v3481_v58, %v3480_v16  ;;  %v3454_v0 = vld [vmem:[%s4357_s29 + $0x4a0] sm:$0xff]  ;;  %v3459_v54 = vld [vmem:[%s4357_s29 + $0x4c8] sm:$0xff] }
 0x159   : > { %3758 = vmatpush1.bf16.msra.mxu1 %v3757_v40  ;;  %3711 = vmatprep.subr.bf16.mxu0 %v5806_v3  ;;  %v3455_v40 = vld [vmem:[%s4357_s29 + $0x4a8] sm:$0xff]  ;;  %v3458_v48 = vld [vmem:[%s4357_s29 + $0x4c0] sm:$0xff] }
 0x15a   : > { %1769 = vmatmul.mubr.f32.gmra.mrb[74].mxu0 %v4579_v24  ;;  %3759 = vmatprep.subr.bf16.mxu1 %v5806_v3  ;;  %v3491_v16 = vld [vmem:[%s4357_s29 + $0x5c8] sm:$0xff] }
 0x15b   : > { %2161 = vmatmul.mubr.f32.gmra.mrb[74].mxu1 %v4579_v24  ;;  %1773 = vmatprep.mubr.f32.mxu0 %v4585_v25  ;;  %v3482_v24 = vld [vmem:[%s4357_s29 + $0x580] sm:$0xff] }
 0x15c   : > { %2165 = vmatprep.mubr.f32.mxu1 %v4585_v25  ;;  %3713 = vmatpush1.bf16.msra.mxu0 %v3712_v9  ;;  %v3718_v25 = vpack.c.bf16 %v3451_v1, %v3450_v55  ;;  %v3766_v51 = vpack.c.bf16 %v3483_v56, %v3482_v24  ;;  %v3489_v9 = vld [vmem:[%s4357_s29 + $0x5b8] sm:$0xff]  ;;  %v3462_v24 = vld [vmem:[%s4357_s29 + $0x4e0] sm:$0xff]  ;;  %v3463_v56 = vld [vmem:[%s4357_s29 + $0x4e8] sm:$0xff] }
 0x15d   : > { %3761 = vmatpush1.bf16.msra.mxu1 %v3760_v57  ;;  %3714 = vmatprep.subr.bf16.mxu0 %v5806_v3  ;;  %v3493_v55 = vld [vmem:[%s4357_s29 + $0x5d8] sm:$0xff] }
 0x15e   : > { %1774 = vmatmul.mubr.f32.gmra.mrb[76].mxu0 %v4599_v32  ;;  %3762 = vmatprep.subr.bf16.mxu1 %v5806_v3 }
 0x15f   : > { %2166 = vmatmul.mubr.f32.gmra.mrb[76].mxu1 %v4599_v32  ;;  %1778 = vmatprep.mubr.f32.mxu0 %v4605_v33  ;;  %v3484_v32 = vld [vmem:[%s4357_s29 + $0x590] sm:$0xff] }
 0x160   : > { %2170 = vmatprep.mubr.f32.mxu1 %v4605_v33  ;;  %3716 = vmatpush1.bf16.msra.mxu0 %v3715_v17  ;;  %v3721_v33 = vpack.c.bf16 %v3453_v50, %v3452_v39  ;;  %v3769_v41 = vpack.c.bf16 %v3485_v63, %v3484_v32  ;;  %v3460_v17 = vld [vmem:[%s4357_s29 + $0x4d0] sm:$0xff]  ;;  %v3465_v50 = vld [vmem:[%s4357_s29 + $0x4f8] sm:$0xff] }
 0x161   : > { %3764 = vmatpush1.bf16.msra.mxu1 %v3763_v61  ;;  %3717 = vmatprep.subr.bf16.mxu0 %v5806_v3  ;;  %v3461_v61 = vld [vmem:[%s4357_s29 + $0x4d8] sm:$0xff]  ;;  %v3464_v39 = vld [vmem:[%s4357_s29 + $0x4f0] sm:$0xff] }
 0x162   : > { %1779 = vmatmul.mubr.f32.gmra.mrb[78].mxu0 %v4619_v42  ;;  %3765 = vmatprep.subr.bf16.mxu1 %v5806_v3  ;;  %v3496_v32 = vld [vmem:[%s4357_s29 + $0x5f0] sm:$0xff]  ;;  %v3497_v63 = vld [vmem:[%s4357_s29 + $0x5f8] sm:$0xff] }
 0x163   : > { %2171 = vmatmul.mubr.f32.gmra.mrb[78].mxu1 %v4619_v42  ;;  %1783 = vmatprep.mubr.f32.mxu0 %v4625_v43  ;;  %v3486_v42 = vld [vmem:[%s4357_s29 + $0x5a0] sm:$0xff] }
 0x164   : > { %2175 = vmatprep.mubr.f32.mxu1 %v4625_v43  ;;  %3719 = vmatpush1.bf16.msra.mxu0 %v3718_v25  ;;  %v3724_v43 = vpack.c.bf16 %v3455_v40, %v3454_v0  ;;  %v3772_v49 = vpack.c.bf16 %v3487_v44, %v3486_v42  ;;  %v3495_v25 = vld [vmem:[%s4357_s29 + $0x5e8] sm:$0xff] }
 0x165   : > { %3767 = vmatpush1.bf16.msra.mxu1 %v3766_v51  ;;  %3720 = vmatprep.subr.bf16.mxu0 %v5806_v3 }
 0x166   : > { %1784 = vmatmul.mubr.f32.gmra.mrb[80].mxu0 %v4639_v52  ;;  %3768 = vmatprep.subr.bf16.mxu1 %v5806_v3 }
 0x167   : > { %2176 = vmatmul.mubr.f32.gmra.mrb[80].mxu1 %v4639_v52  ;;  %1788 = vmatprep.mubr.f32.mxu0 %v4645_v53  ;;  %v3488_v52 = vld [vmem:[%s4357_s29 + $0x5b0] sm:$0xff] }
 0x168   : > { %2180 = vmatprep.mubr.f32.mxu1 %v4645_v53  ;;  %3722 = vmatpush1.bf16.msra.mxu0 %v3721_v33  ;;  %v3727_v53 = vpack.c.bf16 %v3457_v47, %v3456_v8  ;;  %v3775_v57 = vpack.c.bf16 %v3489_v9, %v3488_v52  ;;  %v5807_v8 = vld [vmem:[#allocation4_spill] sm:$0xff]  ;;  %v5808_v9 = vld [vmem:[#allocation5_spill] sm:$0xff] }
 0x169   : > { %3770 = vmatpush1.bf16.msra.mxu1 %v3769_v41  ;;  %3723 = vmatprep.subr.bf16.mxu0 %v5806_v3 }
 0x16a   : > { %1789 = vmatmul.mubr.f32.gmra.mrb[82].mxu0 %v4659_v62  ;;  %3771 = vmatprep.subr.bf16.mxu1 %v5806_v3 }
 0x16b   : > { %2181 = vmatmul.mubr.f32.gmra.mrb[82].mxu1 %v4659_v62  ;;  %1793 = vmatprep.mubr.f32.mxu0 %v4665_v2  ;;  %v3490_v62 = vld [vmem:[%s4357_s29 + $0x5c0] sm:$0xff] }
 0x16c   : > { %2185 = vmatprep.mubr.f32.mxu1 %v4665_v2  ;;  %3725 = vmatpush1.bf16.msra.mxu0 %v3724_v43  ;;  %v3730_v2 = vpack.c.bf16 %v3459_v54, %v3458_v48  ;;  %v3778_v58 = vpack.c.bf16 %v3491_v16, %v3490_v62  ;;  %v5809_v54 = vld [vmem:[#allocation6_spill] sm:$0xff] }
 0x16d   : > { %3773 = vmatpush1.bf16.msra.mxu1 %v3772_v49  ;;  %3726 = vmatprep.subr.bf16.mxu0 %v5806_v3 }
 0x16e   : > { %1794 = vmatmul.mubr.f32.gmra.mrb[84].mxu0 %v4679_v11  ;;  %3774 = vmatprep.subr.bf16.mxu1 %v5806_v3 }
 0x16f   : > { %2186 = vmatmul.mubr.f32.gmra.mrb[84].mxu1 %v4679_v11  ;;  %1798 = vmatprep.mubr.f32.mxu0 %v4685_v12  ;;  %v3492_v11 = vld [vmem:[%s4357_s29 + $0x5d0] sm:$0xff] }
 0x170   : > { %2190 = vmatprep.mubr.f32.mxu1 %v4685_v12  ;;  %3728 = vmatpush1.bf16.msra.mxu0 %v3727_v53  ;;  %v3733_v12 = vpack.c.bf16 %v3461_v61, %v3460_v17  ;;  %v3781_v1 = vpack.c.bf16 %v3493_v55, %v3492_v11  ;;  %v5811_v55 = vld [vmem:[#allocation8_spill] sm:$0xff] }
 0x171   : > { %3776 = vmatpush1.bf16.msra.mxu1 %v3775_v57  ;;  %3729 = vmatprep.subr.bf16.mxu0 %v5806_v3 }
 0x172   : > { %1799 = vmatmul.mubr.f32.gmra.mrb[86].mxu0 %v4699_v21  ;;  %3777 = vmatprep.subr.bf16.mxu1 %v5806_v3 }
 0x173   : > { %2191 = vmatmul.mubr.f32.gmra.mrb[86].mxu1 %v4699_v21  ;;  %1803 = vmatprep.mubr.f32.mxu0 %v4705_v22  ;;  %v3494_v21 = vld [vmem:[%s4357_s29 + $0x5e0] sm:$0xff] }
 0x174   : > { %2195 = vmatprep.mubr.f32.mxu1 %v4705_v22  ;;  %3731 = vmatpush1.bf16.msra.mxu0 %v3730_v2  ;;  %v3736_v22 = vpack.c.bf16 %v3463_v56, %v3462_v24  ;;  %v3784_v51 = vpack.c.bf16 %v3495_v25, %v3494_v21  ;;  %v5812_v21 = vld [vmem:[#allocation9_spill] sm:$0xff] }
 0x175   : > { %3779 = vmatpush1.bf16.msra.mxu1 %v3778_v58  ;;  %3732 = vmatprep.subr.bf16.mxu0 %v5806_v3  ;;  %v5810_v58 = vld [vmem:[#allocation7_spill] sm:$0xff] }
 0x176   : > { %1804 = vmatmul.mubr.f32.gmra.mrb[88].mxu0 %v4719_v31  ;;  %3780 = vmatprep.subr.bf16.mxu1 %v5806_v3 }
 0x177   : > { %2196 = vmatmul.mubr.f32.gmra.mrb[88].mxu1 %v4719_v31  ;;  %1808 = vmatprep.mubr.f32.mxu0 %v4725_v34  ;;  %v3739_v31 = vpack.c.bf16 %v3465_v50, %v3464_v39  ;;  %v5813_v39 = vld [vmem:[#allocation10_spill] sm:$0xff] }
 0x178   : > { %2200 = vmatprep.mubr.f32.mxu1 %v4725_v34  ;;  %3734 = vmatpush1.bf16.msra.mxu0 %v3733_v12  ;;  %v3787_v34 = vpack.c.bf16 %v3497_v63, %v3496_v32 }
 0x179   : > { %3782 = vmatpush1.bf16.msra.mxu1 %v3781_v1  ;;  %3735 = vmatprep.subr.bf16.mxu0 %v5806_v3 }
 0x17a   : > { %1809 = vmatmul.mubr.f32.gmra.mrb[90].mxu0 %v4739_v45  ;;  %3783 = vmatprep.subr.bf16.mxu1 %v5806_v3 }
 0x17b   : > { %2201 = vmatmul.mubr.f32.gmra.mrb[90].mxu1 %v4739_v45  ;;  %1813 = vmatprep.mubr.f32.mxu0 %v4745_v46 }
 0x17c   : > { %2205 = vmatprep.mubr.f32.mxu1 %v4745_v46  ;;  %3737 = vmatpush1.bf16.msra.mxu0 %v3736_v22 }
 0x17d   : > { %3785 = vmatpush1.bf16.msra.mxu1 %v3784_v51  ;;  %3738 = vmatprep.subr.bf16.mxu0 %v5806_v3 }
 0x17e   : > { %1814 = vmatmul.mubr.f32.gmra.mrb[92].mxu0 %v4759_v59  ;;  %3786 = vmatprep.subr.bf16.mxu1 %v5806_v3 }
 0x17f   : > { %2206 = vmatmul.mubr.f32.gmra.mrb[92].mxu1 %v4759_v59  ;;  %1818 = vmatprep.mubr.f32.mxu0 %v4765_v60 }
 0x180   : > { %2210 = vmatprep.mubr.f32.mxu1 %v4765_v60  ;;  %3740 = vmatpush1.bf16.msra.mxu0 %v3739_v31 }
 0x181   : > { %3788 = vmatpush1.bf16.msra.mxu1 %v3787_v34  ;;  %v5814_v34 = vld [vmem:[#allocation11_spill] sm:$0xff] }
 0x182   : > { %1819 = vmatmul.mubr.f32.gmra.mrb[94].mxu0 %v4775_v4 }
 0x183   : > { %2211 = vmatmul.mubr.f32.gmra.mrb[94].mxu1 %v4775_v4  ;;  %1823 = vmatprep.mubr.f32.mxu0 %v4781_v5 }
 0x184   : > { %2215 = vmatprep.mubr.f32.mxu1 %v4781_v5 }
 0x186   : > { %1824 = vmatmul.mubr.f32.gmra.mrb[96].mxu0 %v4791_v6 }
 0x187   : > { %2216 = vmatmul.mubr.f32.gmra.mrb[96].mxu1 %v4791_v6  ;;  %1828 = vmatprep.mubr.f32.mxu0 %v4797_v7 }
 0x188   : > { %2220 = vmatprep.mubr.f32.mxu1 %v4797_v7 }
 0x18a   : > { %1829 = vmatmul.mubr.f32.gmra.mrb[98].mxu0 %v4805_v10 }
 0x18b   : > { %2221 = vmatmul.mubr.f32.gmra.mrb[98].mxu1 %v4805_v10  ;;  %1833 = vmatprep.mubr.f32.mxu0 %v4811_v13 }
 0x18c   : > { %2225 = vmatprep.mubr.f32.mxu1 %v4811_v13 }
 0x18e   : > { %1834 = vmatmul.mubr.f32.gmra.mrb[100].mxu0 %v4819_v14 }
 0x18f   : > { %2226 = vmatmul.mubr.f32.gmra.mrb[100].mxu1 %v4819_v14  ;;  %1838 = vmatprep.mubr.f32.mxu0 %v4825_v15 }
 0x190   : > { %2230 = vmatprep.mubr.f32.mxu1 %v4825_v15 }
 0x192   : > { %1839 = vmatmul.mubr.f32.gmra.mrb[102].mxu0 %v4833_v18 }
 0x193   : > { %2231 = vmatmul.mubr.f32.gmra.mrb[102].mxu1 %v4833_v18  ;;  %1843 = vmatprep.mubr.f32.mxu0 %v4839_v19 }
 0x194   : > { %2235 = vmatprep.mubr.f32.mxu1 %v4839_v19 }
 0x196   : > { %1844 = vmatmul.mubr.f32.gmra.mrb[104].mxu0 %v4847_v20 }
 0x197   : > { %2236 = vmatmul.mubr.f32.gmra.mrb[104].mxu1 %v4847_v20  ;;  %1848 = vmatprep.mubr.f32.mxu0 %v4853_v23 }
 0x198   : > { %2240 = vmatprep.mubr.f32.mxu1 %v4853_v23 }
 0x199   : > { %v1096_v45 = vpop.f32.mrb[0].mxu0 }
 0x19a   : > { %v1098_v46 = vpop.f32.mrb[1].mxu0  ;;  %1849 = vmatmul.mubr.f32.gmra.mrb[106].mxu0 %v4861_v26  ;;  %v1346_v59 = vpop.f32.mrb[0].mxu1 }
 0x19b   : > { %2241 = vmatmul.mubr.f32.gmra.mrb[106].mxu1 %v4861_v26  ;;  %v1348_v60 = vpop.f32.mrb[1].mxu1  ;;  %1853 = vmatprep.mubr.f32.mxu0 %v4867_v27  ;;  %v1528_v7 = vrot.slane %v1346_v59, 1 }
 0x19c   : > { %2245 = vmatprep.mubr.f32.mxu1 %v4867_v27  ;;  %v5815_v60 = vld [vmem:[#allocation12_spill] sm:$0xff] }
 0x19d   : > { %v1101_v4 = vpop.f32.mrb[2].mxu0 }
 0x19e   : > { %v1351_v5 = vpop.f32.mrb[2].mxu1  ;;  %v1103_v6 = vpop.f32.mrb[3].mxu0  ;;  %1854 = vmatmul.mubr.f32.gmra.mrb[108].mxu0 %v4875_v28 }
 0x19f   : > { %v1529_v10 = vrot.slane %v1351_v5, 1  ;;  %2246 = vmatmul.mubr.f32.gmra.mrb[108].mxu1 %v4875_v28  ;;  %v1353_v13 = vpop.f32.mrb[3].mxu1  ;;  %1858 = vmatprep.mubr.f32.mxu0 %v4881_v29 }
 0x1a0   : > { %2250 = vmatprep.mubr.f32.mxu1 %v4881_v29 }
 0x1a1   : > { %v1530_v14 = vsel %vm1527_vm0, %v1528_v7, %v1529_v10  ;;  %v1106_v15 = vpop.f32.mrb[4].mxu0 }
 0x1a2   : > { %v1356_v18 = vpop.f32.mrb[4].mxu1  ;;  %v1108_v19 = vpop.f32.mrb[5].mxu0  ;;  %1859 = vmatmul.mubr.f32.gmra.mrb[110].mxu0 %v4889_v30  ;;  %v5177_v20 = vadd.f32 %v1530_v14, %v1096_v45 }
 0x1a3   : > { %v1531_v23 = vrot.slane %v1356_v18, 1  ;;  %2251 = vmatmul.mubr.f32.gmra.mrb[110].mxu1 %v4889_v30  ;;  %v1358_v26 = vpop.f32.mrb[5].mxu1  ;;  %1863 = vmatprep.mubr.f32.mxu0 %v4895_v35  ;;  %v3819_v18 = vld [vmem:[%s5773_s0 + $0x18] sm:$0xff] }
 0x1a4   : > { %2255 = vmatprep.mubr.f32.mxu1 %v4895_v35 }
 0x1a5   : > { %v1532_v27 = vsel %vm1527_vm0, %v1529_v10, %v1531_v23  ;;  %v1111_v28 = vpop.f32.mrb[6].mxu0  ;;  %v3818_v10 = vld [vmem:[%s5773_s0] sm:$0xff] }
 0x1a6   : > { %v1361_v29 = vpop.f32.mrb[6].mxu1  ;;  %v1113_v3 = vpop.f32.mrb[7].mxu0  ;;  %1864 = vmatmul.mubr.f32.gmra.mrb[112].mxu0 %v4903_v36  ;;  %v5184_v33 = vadd.f32 %v1532_v27, %v1101_v4 }
 0x1a7   : > { %v1533_v41 = vrot.slane %v1361_v29, 1  ;;  %2256 = vmatmul.mubr.f32.gmra.mrb[112].mxu1 %v4903_v36  ;;  %v1363_v0 = vpop.f32.mrb[7].mxu1  ;;  %1868 = vmatprep.mubr.f32.mxu0 %v4909_v37 }
 0x1a8   : > { %2260 = vmatprep.mubr.f32.mxu1 %v4909_v37  ;;  %v3821_v0 = vld [vmem:[%s5773_s0 + $0x28] sm:$0xff] }
 0x1a9   : > { %v1534_v30 = vsel %vm1527_vm0, %v1531_v23, %v1533_v41  ;;  %v1116_v35 = vpop.f32.mrb[8].mxu0 }
 0x1aa   : > { %v1366_v40 = vpop.f32.mrb[8].mxu1  ;;  %v1118_v42 = vpop.f32.mrb[9].mxu0  ;;  %1869 = vmatmul.mubr.f32.gmra.mrb[114].mxu0 %v4917_v38  ;;  %v5191_v44 = vadd.f32 %v1534_v30, %v1106_v15 }
 0x1ab   : > { %v1535_v43 = vrot.slane %v1366_v40, 1  ;;  %2261 = vmatmul.mubr.f32.gmra.mrb[114].mxu1 %v4917_v38  ;;  %v1368_v49 = vpop.f32.mrb[9].mxu1  ;;  %1873 = vmatprep.mubr.f32.mxu0 %v5807_v8 }
 0x1ac   : > { %2265 = vmatprep.mubr.f32.mxu1 %v5807_v8 }
 0x1ad   : > { %v1536_v36 = vsel %vm1527_vm0, %v1533_v41, %v1535_v43  ;;  %v1121_v37 = vpop.f32.mrb[10].mxu0 }
 0x1ae   : > { %v1371_v47 = vpop.f32.mrb[10].mxu1  ;;  %v1123_v52 = vpop.f32.mrb[11].mxu0  ;;  %1874 = vmatmul.mubr.f32.gmra.mrb[116].mxu0 %v5808_v9  ;;  %v5198_v53 = vadd.f32 %v1536_v36, %v1111_v28  ;;  %v3820_v28 = vld [vmem:[%s5773_s0 + $0x10] sm:$0xff] }
 0x1af   : > { %v1537_v57 = vrot.slane %v1371_v47, 1  ;;  %2266 = vmatmul.mubr.f32.gmra.mrb[116].mxu1 %v5808_v9  ;;  %v1373_v48 = vpop.f32.mrb[11].mxu1  ;;  %1878 = vmatprep.mubr.f32.mxu0 %v5809_v54 }
 0x1b0   : > { %2270 = vmatprep.mubr.f32.mxu1 %v5809_v54  ;;  %v3824_v48 = vld [vmem:[%s5773_s0 + $0x30] sm:$0xff] }
 0x1b1   : > { %v1538_v38 = vsel %vm1527_vm0, %v1535_v43, %v1537_v57  ;;  %v1126_v62 = vpop.f32.mrb[12].mxu0  ;;  %v3822_v43 = vld [vmem:[%s5773_s0 + $0x20] sm:$0xff] }
 0x1b2   : > { %v1376_v16 = vpop.f32.mrb[12].mxu1  ;;  %v1128_v2 = vpop.f32.mrb[13].mxu0  ;;  %1879 = vmatmul.mubr.f32.gmra.mrb[118].mxu0 %v5810_v58  ;;  %v5205_v17 = vadd.f32 %v1538_v38, %v1116_v35 }
 0x1b3   : > { %v1539_v61 = vrot.slane %v1376_v16, 1  ;;  %2271 = vmatmul.mubr.f32.gmra.mrb[118].mxu1 %v5810_v58  ;;  %v1378_v11 = vpop.f32.mrb[13].mxu1  ;;  %1883 = vmatprep.mubr.f32.mxu0 %v5811_v55  ;;  %v3825_v16 = vld [vmem:[%s5773_s0 + $0x48] sm:$0xff] }
 0x1b4   : > { %2275 = vmatprep.mubr.f32.mxu1 %v5811_v55  ;;  %v3826_v55 = vld [vmem:[%s5773_s0 + $0x40] sm:$0xff] }
 0x1b5   : > { %v1540_v12 = vsel %vm1527_vm0, %v1537_v57, %v1539_v61  ;;  %v1131_v1 = vpop.f32.mrb[14].mxu0 }
 0x1b6   : > { %v1381_v24 = vpop.f32.mrb[14].mxu1  ;;  %v1133_v56 = vpop.f32.mrb[15].mxu0  ;;  %1884 = vmatmul.mubr.f32.gmra.mrb[120].mxu0 %v5812_v21  ;;  %v5212_v25 = vadd.f32 %v1540_v12, %v1121_v37  ;;  %v3823_v37 = vld [vmem:[%s5773_s0 + $0x38] sm:$0xff] }
 0x1b7   : > { %v1541_v22 = vrot.slane %v1381_v24, 1  ;;  %2276 = vmatmul.mubr.f32.gmra.mrb[120].mxu1 %v5812_v21  ;;  %v1383_v51 = vpop.f32.mrb[15].mxu1  ;;  %1887 = vmatprep.mubr.f32.mxu0 %v5813_v39  ;;  %v3827_v56 = vld [vmem:[%s5773_s0 + $0x58] sm:$0xff] }
 0x1b8   : > { %2280 = vmatprep.mubr.f32.mxu1 %v5813_v39 }
 0x1b9   : > { %v1542_v50 = vsel %vm1527_vm0, %v1539_v61, %v1541_v22  ;;  %v1136_v32 = vpop.f32.mrb[16].mxu0 }
 0x1ba   : > { %v1386_v63 = vpop.f32.mrb[16].mxu1  ;;  %v1138_v31 = vpop.f32.mrb[17].mxu0  ;;  %1888 = vmatmul.mubr.f32.gmra.mrb[122].mxu0 %v5814_v34  ;;  %v5219_v45 = vadd.f32 %v1542_v50, %v1126_v62  ;;  %v3828_v50 = vld [vmem:[%s5773_s0 + $0x50] sm:$0xff] }
 0x1bb   : > { %v1543_v46 = vrot.slane %v1386_v63, 1  ;;  %2281 = vmatmul.mubr.f32.gmra.mrb[122].mxu1 %v5814_v34  ;;  %v1388_v59 = vpop.f32.mrb[17].mxu1  ;;  %2410 = vmatprep.mubr.f32.mxu0 %v5815_v60  ;;  %v3829_v34 = vld [vmem:[%s5773_s0 + $0x68] sm:$0xff] }
 0x1bc   : > { %2803 = vmatprep.mubr.f32.mxu1 %v5815_v60 }
 0x1bd   : > { %v1544_v4 = vsel %vm1527_vm0, %v1541_v22, %v1543_v46  ;;  %v1141_v5 = vpop.f32.mrb[18].mxu0 }
 0x1be   : > { %v1391_v6 = vpop.f32.mrb[18].mxu1  ;;  %v1143_v7 = vpop.f32.mrb[19].mxu0  ;;  %2411 = vmatmul.mubr.f32.vlgmr.msra.gmra.mrb[124].mxu0 %v3818_v10  ;;  %v5228_v13 = vadd.f32 %v1544_v4, %v1131_v1 }
 0x1bf   : > { %v1545_v14 = vrot.slane %v1391_v6, 1  ;;  %2804 = vmatmul.mubr.f32.vlgmr.msra.gmra.mrb[124].mxu1 %v3818_v10  ;;  %v1393_v15 = vpop.f32.mrb[19].mxu1  ;;  %2414 = vmatprep.mubr.f32.mxu0 %v3819_v18 }
 0x1c0   : > { %2807 = vmatprep.mubr.f32.mxu1 %v3819_v18 }
 0x1c1   : > { %v1546_v19 = vsel %vm1527_vm0, %v1543_v46, %v1545_v14  ;;  %v1146_v23 = vpop.f32.mrb[20].mxu0 }
 0x1c2   : > { %v1396_v26 = vpop.f32.mrb[20].mxu1  ;;  %v1148_v27 = vpop.f32.mrb[21].mxu0  ;;  %2415 = vmatmul.mubr.f32.gmra.mrb[126].mxu0 %v3820_v28  ;;  %v5237_v29 = vadd.f32 %v1546_v19, %v1136_v32 }
 0x1c3   : > { %v1547_v3 = vrot.slane %v1396_v26, 1  ;;  %2808 = vmatmul.mubr.f32.gmra.mrb[126].mxu1 %v3820_v28  ;;  %v1398_v41 = vpop.f32.mrb[21].mxu1  ;;  %2418 = vmatprep.mubr.f32.mxu0 %v3821_v0  ;;  %v3832_v26 = vld [vmem:[%s5773_s0 + $0x70] sm:$0xff] }
 0x1c4   : > { %2811 = vmatprep.mubr.f32.mxu1 %v3821_v0  ;;  %v3833_v41 = vld [vmem:[%s5773_s0 + $0x88] sm:$0xff] }
 0x1c5   : > { %v1548_v30 = vsel %vm1527_vm0, %v1545_v14, %v1547_v3  ;;  %v1151_v35 = vpop.f32.mrb[22].mxu0  ;;  %v3831_v14 = vld [vmem:[%s5773_s0 + $0x78] sm:$0xff] }
 0x1c6   : > { %v1401_v40 = vpop.f32.mrb[22].mxu1  ;;  %v1153_v42 = vpop.f32.mrb[23].mxu0  ;;  %2419 = vmatmul.mubr.f32.gmra.mrb[128].mxu0 %v3822_v43  ;;  %v5246_v49 = vadd.f32 %v1548_v30, %v1141_v5  ;;  %v3830_v5 = vld [vmem:[%s5773_s0 + $0x60] sm:$0xff] }
 0x1c7   : > { %v1549_v8 = vrot.slane %v1401_v40, 1  ;;  %2812 = vmatmul.mubr.f32.gmra.mrb[128].mxu1 %v3822_v43  ;;  %v1403_v36 = vpop.f32.mrb[23].mxu1  ;;  %2423 = vmatprep.mubr.f32.mxu0 %v3823_v37  ;;  %v3834_v42 = vld [vmem:[%s5773_s0 + $0x80] sm:$0xff] }
 0x1c8   : > { %2816 = vmatprep.mubr.f32.mxu1 %v3823_v37  ;;  %v3835_v37 = vld [vmem:[%s5773_s0 + $0x98] sm:$0xff] }
 0x1c9   : > { %v1550_v47 = vsel %vm1527_vm0, %v1547_v3, %v1549_v8  ;;  %v1156_v52 = vpop.f32.mrb[24].mxu0 }
 0x1ca   : > { %v1406_v9 = vpop.f32.mrb[24].mxu1  ;;  %v1158_v57 = vpop.f32.mrb[25].mxu0  ;;  %2424 = vmatmul.mubr.f32.gmra.mrb[130].mxu0 %v3824_v48  ;;  %v5255_v54 = vadd.f32 %v1550_v47, %v1146_v23 }
 0x1cb   : > { %v1551_v38 = vrot.slane %v1406_v9, 1  ;;  %2817 = vmatmul.mubr.f32.gmra.mrb[130].mxu1 %v3824_v48  ;;  %v1408_v62 = vpop.f32.mrb[25].mxu1  ;;  %2428 = vmatprep.mubr.f32.mxu0 %v3825_v16  ;;  %v3836_v48 = vld [vmem:[%s5773_s0 + $0x90] sm:$0xff] }
 0x1cc   : > { %2821 = vmatprep.mubr.f32.mxu1 %v3825_v16 }
 0x1cd   : > { %v1552_v2 = vsel %vm1527_vm0, %v1549_v8, %v1551_v38  ;;  %v1161_v58 = vpop.f32.mrb[26].mxu0 }
 0x1ce   : > { %v1411_v61 = vpop.f32.mrb[26].mxu1  ;;  %v1163_v11 = vpop.f32.mrb[27].mxu0  ;;  %2429 = vmatmul.mubr.f32.gmra.mrb[132].mxu0 %v3826_v55  ;;  %v5264_v12 = vadd.f32 %v1552_v2, %v1151_v35  ;;  %v3837_v2 = vld [vmem:[%s5773_s0 + $0xa8] sm:$0xff] }
 0x1cf   : > { %v1553_v1 = vrot.slane %v1411_v61, 1  ;;  %2822 = vmatmul.mubr.f32.gmra.mrb[132].mxu1 %v3826_v55  ;;  %v1413_v24 = vpop.f32.mrb[27].mxu1  ;;  %2433 = vmatprep.mubr.f32.mxu0 %v3827_v56 }
 0x1d0   : > { %2826 = vmatprep.mubr.f32.mxu1 %v3827_v56 }
 0x1d1   : > { %v1554_v21 = vsel %vm1527_vm0, %v1551_v38, %v1553_v1  ;;  %v1166_v22 = vpop.f32.mrb[28].mxu0 }
 0x1d2   : > { %v1416_v51 = vpop.f32.mrb[28].mxu1  ;;  %v1168_v39 = vpop.f32.mrb[29].mxu0  ;;  %2434 = vmatmul.mubr.f32.gmra.mrb[134].mxu0 %v3828_v50  ;;  %v5273_v32 = vadd.f32 %v1554_v21, %v1156_v52 }
 0x1d3   : > { %v1555_v63 = vrot.slane %v1416_v51, 1  ;;  %2827 = vmatmul.mubr.f32.gmra.mrb[134].mxu1 %v3828_v50  ;;  %v1418_v31 = vpop.f32.mrb[29].mxu1  ;;  %2438 = vmatprep.mubr.f32.mxu0 %v3829_v34 }
 0x1d4   : > { %2831 = vmatprep.mubr.f32.mxu1 %v3829_v34  ;;  %v3840_v31 = vld [vmem:[%s5773_s0 + $0xb0] sm:$0xff] }
 0x1d5   : > { %v1556_v46 = vsel %vm1527_vm0, %v1553_v1, %v1555_v63  ;;  %v1171_v59 = vpop.f32.mrb[30].mxu0  ;;  %v3838_v1 = vld [vmem:[%s5773_s0 + $0xa0] sm:$0xff] }
 0x1d6   : > { %v1421_v60 = vpop.f32.mrb[30].mxu1  ;;  %v1173_v4 = vpop.f32.mrb[31].mxu0  ;;  %2439 = vmatmul.mubr.f32.gmra.mrb[136].mxu0 %v3830_v5  ;;  %v5282_v6 = vadd.f32 %v1556_v46, %v1161_v58 }
 0x1d7   : > { %v1557_v7 = vrot.slane %v1421_v60, 1  ;;  %2832 = vmatmul.mubr.f32.gmra.mrb[136].mxu1 %v3830_v5  ;;  %v1423_v10 = vpop.f32.mrb[31].mxu1  ;;  %2443 = vmatprep.mubr.f32.mxu0 %v3831_v14  ;;  %v3841_v60 = vld [vmem:[%s5773_s0 + $0xc8] sm:$0xff] }
 0x1d8   : > { %2836 = vmatprep.mubr.f32.mxu1 %v3831_v14  ;;  %v3842_v14 = vld [vmem:[%s5773_s0 + $0xc0] sm:$0xff] }
 0x1d9   : > { %v1558_v15 = vsel %vm1527_vm0, %v1555_v63, %v1557_v7  ;;  %v1176_v18 = vpop.f32.mrb[32].mxu0 }
 0x1da   : > { %v1426_v19 = vpop.f32.mrb[32].mxu1  ;;  %v1178_v23 = vpop.f32.mrb[33].mxu0  ;;  %2444 = vmatmul.mubr.f32.gmra.mrb[138].mxu0 %v3832_v26  ;;  %v5291_v27 = vadd.f32 %v1558_v15, %v1166_v22  ;;  %v3839_v22 = vld [vmem:[%s5773_s0 + $0xb8] sm:$0xff] }
 0x1db   : > { %v1559_v28 = vrot.slane %v1426_v19, 1  ;;  %2837 = vmatmul.mubr.f32.gmra.mrb[138].mxu1 %v3832_v26  ;;  %v1428_v3 = vpop.f32.mrb[33].mxu1  ;;  %2448 = vmatprep.mubr.f32.mxu0 %v3833_v41  ;;  %v3843_v23 = vld [vmem:[%s5773_s0 + $0xd8] sm:$0xff] }
 0x1dc   : > { %2841 = vmatprep.mubr.f32.mxu1 %v3833_v41 }
 0x1dd   : > { %v1560_v0 = vsel %vm1527_vm0, %v1557_v7, %v1559_v28  ;;  %v1181_v30 = vpop.f32.mrb[34].mxu0 }
 0x1de   : > { %v1431_v35 = vpop.f32.mrb[34].mxu1  ;;  %v1183_v40 = vpop.f32.mrb[35].mxu0  ;;  %2449 = vmatmul.mubr.f32.gmra.mrb[140].mxu0 %v3834_v42  ;;  %v5300_v43 = vadd.f32 %v1560_v0, %v1171_v59  ;;  %v3844_v0 = vld [vmem:[%s5773_s0 + $0xd0] sm:$0xff] }
 0x1df   : > { %v1561_v8 = vrot.slane %v1431_v35, 1  ;;  %2842 = vmatmul.mubr.f32.gmra.mrb[140].mxu1 %v3834_v42  ;;  %v1433_v36 = vpop.f32.mrb[35].mxu1  ;;  %2453 = vmatprep.mubr.f32.mxu0 %v3835_v37  ;;  %v3845_v42 = vld [vmem:[%s5773_s0 + $0xe8] sm:$0xff] }
 0x1e0   : > { %2846 = vmatprep.mubr.f32.mxu1 %v3835_v37 }
 0x1e1   : > { %v1562_v47 = vsel %vm1527_vm0, %v1559_v28, %v1561_v8  ;;  %v1186_v52 = vpop.f32.mrb[36].mxu0 }
 0x1e2   : > { %v1436_v9 = vpop.f32.mrb[36].mxu1  ;;  %v1188_v57 = vpop.f32.mrb[37].mxu0  ;;  %2454 = vmatmul.mubr.f32.gmra.mrb[142].mxu0 %v3836_v48  ;;  %v5309_v38 = vadd.f32 %v1562_v47, %v1176_v18 }
 0x1e3   : > { %v1563_v62 = vrot.slane %v1436_v9, 1  ;;  %2847 = vmatmul.mubr.f32.gmra.mrb[142].mxu1 %v3836_v48  ;;  %v1438_v16 = vpop.f32.mrb[37].mxu1  ;;  %2458 = vmatprep.mubr.f32.mxu0 %v3837_v2 }
 0x1e4   : > { %2851 = vmatprep.mubr.f32.mxu1 %v3837_v2 }
 0x1e5   : > { %v1564_v58 = vsel %vm1527_vm0, %v1561_v8, %v1563_v62  ;;  %v1191_v61 = vpop.f32.mrb[38].mxu0 }
 0x1e6   : > { %v1441_v11 = vpop.f32.mrb[38].mxu1  ;;  %v1193_v55 = vpop.f32.mrb[39].mxu0  ;;  %2459 = vmatmul.mubr.f32.gmra.mrb[144].mxu0 %v3838_v1  ;;  %v5318_v24 = vadd.f32 %v1564_v58, %v1181_v30 }
 0x1e7   : > { %v1565_v56 = vrot.slane %v1441_v11, 1  ;;  %2852 = vmatmul.mubr.f32.gmra.mrb[144].mxu1 %v3838_v1  ;;  %v1443_v21 = vpop.f32.mrb[39].mxu1  ;;  %2463 = vmatprep.mubr.f32.mxu0 %v3839_v22  ;;  %v3848_v11 = vld [vmem:[%s5773_s0 + $0xf0] sm:$0xff] }
 0x1e8   : > { %2856 = vmatprep.mubr.f32.mxu1 %v3839_v22  ;;  %v3849_v21 = vld [vmem:[%s5773_s0 + $0x108] sm:$0xff] }
 0x1e9   : > { %v1566_v51 = vsel %vm1527_vm0, %v1563_v62, %v1565_v56  ;;  %v1196_v39 = vpop.f32.mrb[40].mxu0  ;;  %v3847_v62 = vld [vmem:[%s5773_s0 + $0xf8] sm:$0xff] }
 0x1ea   : > { %v1446_v50 = vpop.f32.mrb[40].mxu1  ;;  %v1198_v63 = vpop.f32.mrb[41].mxu0  ;;  %2464 = vmatmul.mubr.f32.gmra.mrb[146].mxu0 %v3840_v31  ;;  %v5327_v34 = vadd.f32 %v1566_v51, %v1186_v52  ;;  %v3846_v52 = vld [vmem:[%s5773_s0 + $0xe0] sm:$0xff] }
 0x1eb   : > { %v1567_v46 = vrot.slane %v1446_v50, 1  ;;  %2857 = vmatmul.mubr.f32.gmra.mrb[146].mxu1 %v3840_v31  ;;  %v1448_v59 = vpop.f32.mrb[41].mxu1  ;;  %2468 = vmatprep.mubr.f32.mxu0 %v3841_v60  ;;  %v3850_v63 = vld [vmem:[%s5773_s0 + $0x100] sm:$0xff] }
 0x1ec   : > { %2861 = vmatprep.mubr.f32.mxu1 %v3841_v60  ;;  %v3851_v60 = vld [vmem:[%s5773_s0 + $0x118] sm:$0xff] }
 0x1ed   : > { %v1568_v4 = vsel %vm1527_vm0, %v1565_v56, %v1567_v46  ;;  %v1201_v5 = vpop.f32.mrb[42].mxu0 }
 0x1ee   : > { %v1451_v7 = vpop.f32.mrb[42].mxu1  ;;  %v1203_v10 = vpop.f32.mrb[43].mxu0  ;;  %2469 = vmatmul.mubr.f32.gmra.mrb[148].mxu0 %v3842_v14  ;;  %v5336_v15 = vadd.f32 %v1568_v4, %v1191_v61 }
 0x1ef   : > { %v1569_v18 = vrot.slane %v1451_v7, 1  ;;  %2862 = vmatmul.mubr.f32.gmra.mrb[148].mxu1 %v3842_v14  ;;  %v1453_v19 = vpop.f32.mrb[43].mxu1  ;;  %2473 = vmatprep.mubr.f32.mxu0 %v3843_v23  ;;  %v3852_v14 = vld [vmem:[%s5773_s0 + $0x110] sm:$0xff] }
 0x1f0   : > { %2866 = vmatprep.mubr.f32.mxu1 %v3843_v23 }
 0x1f1   : > { %v1570_v26 = vsel %vm1527_vm0, %v1567_v46, %v1569_v18  ;;  %v1206_v28 = vpop.f32.mrb[44].mxu0 }
 0x1f2   : > { %v1456_v3 = vpop.f32.mrb[44].mxu1  ;;  %v1208_v41 = vpop.f32.mrb[45].mxu0  ;;  %2474 = vmatmul.mubr.f32.gmra.mrb[150].mxu0 %v3844_v0  ;;  %v5345_v30 = vadd.f32 %v1570_v26, %v1196_v39  ;;  %v3853_v26 = vld [vmem:[%s5773_s0 + $0x128] sm:$0xff] }
 0x1f3   : > { %v1571_v35 = vrot.slane %v1456_v3, 1  ;;  %2867 = vmatmul.mubr.f32.gmra.mrb[150].mxu1 %v3844_v0  ;;  %v1458_v40 = vpop.f32.mrb[45].mxu1  ;;  %2478 = vmatprep.mubr.f32.mxu0 %v3845_v42 }
 0x1f4   : > { %2871 = vmatprep.mubr.f32.mxu1 %v3845_v42 }
 0x1f5   : > { %v1572_v8 = vsel %vm1527_vm0, %v1569_v18, %v1571_v35  ;;  %v1211_v36 = vpop.f32.mrb[46].mxu0 }
 0x1f6   : > { %v1461_v37 = vpop.f32.mrb[46].mxu1  ;;  %v1213_v47 = vpop.f32.mrb[47].mxu0  ;;  %2479 = vmatmul.mubr.f32.gmra.mrb[152].mxu0 %v3846_v52  ;;  %v5354_v9 = vadd.f32 %v1572_v8, %v1201_v5 }
 0x1f7   : > { %v1573_v57 = vrot.slane %v1461_v37, 1  ;;  %2872 = vmatmul.mubr.f32.gmra.mrb[152].mxu1 %v3846_v52  ;;  %v1463_v48 = vpop.f32.mrb[47].mxu1  ;;  %2483 = vmatprep.mubr.f32.mxu0 %v3847_v62 }
 0x1f8   : > { %2876 = vmatprep.mubr.f32.mxu1 %v3847_v62  ;;  %v3856_v48 = vld [vmem:[%s5773_s0 + $0x130] sm:$0xff] }
 0x1f9   : > { %v1574_v16 = vsel %vm1527_vm0, %v1571_v35, %v1573_v57  ;;  %v1216_v2 = vpop.f32.mrb[48].mxu0  ;;  %v3854_v35 = vld [vmem:[%s5773_s0 + $0x120] sm:$0xff] }
 0x1fa   : > { %v1466_v58 = vpop.f32.mrb[48].mxu1  ;;  %v1218_v61 = vpop.f32.mrb[49].mxu0  ;;  %2484 = vmatmul.mubr.f32.gmra.mrb[154].mxu0 %v3848_v11  ;;  %v5363_v55 = vadd.f32 %v1574_v16, %v1206_v28 }
 0x1fb   : > { %v1575_v1 = vrot.slane %v1466_v58, 1  ;;  %2877 = vmatmul.mubr.f32.gmra.mrb[154].mxu1 %v3848_v11  ;;  %v1468_v56 = vpop.f32.mrb[49].mxu1  ;;  %2488 = vmatprep.mubr.f32.mxu0 %v3849_v21  ;;  %v3857_v58 = vld [vmem:[%s5773_s0 + $0x148] sm:$0xff] }
 0x1fc   : > { %2881 = vmatprep.mubr.f32.mxu1 %v3849_v21  ;;  %v3858_v56 = vld [vmem:[%s5773_s0 + $0x140] sm:$0xff] }
 0x1fd   : > { %v1576_v22 = vsel %vm1527_vm0, %v1573_v57, %v1575_v1  ;;  %v1221_v51 = vpop.f32.mrb[50].mxu0 }
 0x1fe   : > { %v1471_v39 = vpop.f32.mrb[50].mxu1  ;;  %v1223_v50 = vpop.f32.mrb[51].mxu0  ;;  %2489 = vmatmul.mubr.f32.gmra.mrb[156].mxu0 %v3850_v63  ;;  %v5372_v31 = vadd.f32 %v1576_v22, %v1211_v36  ;;  %v3855_v36 = vld [vmem:[%s5773_s0 + $0x138] sm:$0xff] }
 0x1ff   : > { %v1577_v46 = vrot.slane %v1471_v39, 1  ;;  %2882 = vmatmul.mubr.f32.gmra.mrb[156].mxu1 %v3850_v63  ;;  %v1473_v59 = vpop.f32.mrb[51].mxu1  ;;  %2493 = vmatprep.mubr.f32.mxu0 %v3851_v60  ;;  %v3859_v39 = vld [vmem:[%s5773_s0 + $0x158] sm:$0xff] }
 0x200   : > { %2886 = vmatprep.mubr.f32.mxu1 %v3851_v60 }
 0x201   : > { %v1578_v4 = vsel %vm1527_vm0, %v1575_v1, %v1577_v46  ;;  %v1226_v5 = vpop.f32.mrb[52].mxu0 }
 0x202   : > { %v1476_v7 = vpop.f32.mrb[52].mxu1  ;;  %v1228_v10 = vpop.f32.mrb[53].mxu0  ;;  %2494 = vmatmul.mubr.f32.gmra.mrb[158].mxu0 %v3852_v14  ;;  %v5381_v18 = vadd.f32 %v1578_v4, %v1216_v2  ;;  %v3861_v4 = vld [vmem:[%s5773_s0 + $0x168] sm:$0xff] }
 0x203   : > { %v1579_v19 = vrot.slane %v1476_v7, 1  ;;  %2887 = vmatmul.mubr.f32.gmra.mrb[158].mxu1 %v3852_v14  ;;  %v1478_v23 = vpop.f32.mrb[53].mxu1  ;;  %2498 = vmatprep.mubr.f32.mxu0 %v3853_v26  ;;  %v3862_v10 = vld [vmem:[%s5773_s0 + $0x160] sm:$0xff] }
 0x204   : > { %2891 = vmatprep.mubr.f32.mxu1 %v3853_v26  ;;  %v3863_v23 = vld [vmem:[%s5773_s0 + $0x178] sm:$0xff] }
 0x205   : > { %v1580_v28 = vsel %vm1527_vm0, %v1577_v46, %v1579_v19  ;;  %v1231_v3 = vpop.f32.mrb[54].mxu0  ;;  %v3860_v46 = vld [vmem:[%s5773_s0 + $0x150] sm:$0xff] }
 0x206   : > { %v1481_v41 = vpop.f32.mrb[54].mxu1  ;;  %v1233_v0 = vpop.f32.mrb[55].mxu0  ;;  %2499 = vmatmul.mubr.f32.gmra.mrb[160].mxu0 %v3854_v35  ;;  %v5390_v40 = vadd.f32 %v1580_v28, %v1221_v51 }
 0x207   : > { %v1581_v42 = vrot.slane %v1481_v41, 1  ;;  %2892 = vmatmul.mubr.f32.gmra.mrb[160].mxu1 %v3854_v35  ;;  %v1483_v8 = vpop.f32.mrb[55].mxu1  ;;  %2503 = vmatprep.mubr.f32.mxu0 %v3855_v36  ;;  %v3864_v0 = vld [vmem:[%s5773_s0 + $0x170] sm:$0xff] }
 0x208   : > { %2896 = vmatprep.mubr.f32.mxu1 %v3855_v36  ;;  %v3865_v8 = vld [vmem:[%s5773_s0 + $0x188] sm:$0xff] }
 0x209   : > { %v1582_v37 = vsel %vm1527_vm0, %v1579_v19, %v1581_v42  ;;  %v1236_v47 = vpop.f32.mrb[56].mxu0 }
 0x20a   : > { %v1486_v52 = vpop.f32.mrb[56].mxu1  ;;  %v1237_v57 = vpop.f32.mrb[57].mxu0  ;;  %2504 = vmatmul.mubr.f32.gmra.mrb[162].mxu0 %v3856_v48  ;;  %v5399_v62 = vadd.f32 %v1582_v37, %v1226_v5 }
 0x20b   : > { %v1583_v16 = vrot.slane %v1486_v52, 1  ;;  %2897 = vmatmul.mubr.f32.gmra.mrb[162].mxu1 %v3856_v48  ;;  %v1488_v2 = vpop.f32.mrb[57].mxu1  ;;  %2508 = vmatprep.mubr.f32.mxu0 %v3857_v58 }
 0x20c   : > { %2901 = vmatprep.mubr.f32.mxu1 %v3857_v58 }
 0x20d   : > { %v1584_v61 = vsel %vm1527_vm0, %v1581_v42, %v1583_v16  ;;  %v1240_v11 = vpop.f32.mrb[58].mxu0  ;;  %v3866_v16 = vld [vmem:[%s5773_s0 + $0x180] sm:$0xff] }
 0x20e   : > { %v1241_v1 = vpop.f32.mrb[59].mxu0  ;;  %2509 = vmatmul.mubr.f32.gmra.mrb[164].mxu0 %v3858_v56  ;;  %v1491_v21 = vpop.f32.mrb[58].mxu1  ;;  %v5408_v22 = vadd.f32 %v1584_v61, %v1231_v3  ;;  %v3867_v61 = vld [vmem:[%s5773_s0 + $0x198] sm:$0xff] }
 0x20f   : > { %2902 = vmatmul.mubr.f32.gmra.mrb[164].mxu1 %v3858_v56  ;;  %v1492_v51 = vpop.f32.mrb[59].mxu1  ;;  %2513 = vmatprep.mubr.f32.mxu0 %v3859_v39 }
 0x210   : > { %2906 = vmatprep.mubr.f32.mxu1 %v3859_v39  ;;  %v3868_v39 = vld [vmem:[%s5773_s0 + $0x190] sm:$0xff] }
 0x211   : > { %v1244_v50 = vpop.f32.mrb[60].mxu0 }
 0x212   : > { %v1245_v63 = vpop.f32.mrb[61].mxu0  ;;  %2514 = vmatmul.mubr.f32.gmra.mrb[166].mxu0 %v3860_v46  ;;  %v1495_v59 = vpop.f32.mrb[60].mxu1 }
 0x213   : > { %2907 = vmatmul.mubr.f32.gmra.mrb[166].mxu1 %v3860_v46  ;;  %v1496_v60 = vpop.f32.mrb[61].mxu1  ;;  %2518 = vmatprep.mubr.f32.mxu0 %v3861_v4  ;;  %v3869_v46 = vld [vmem:[%s5773_s0 + $0x1a8] sm:$0xff] }
 0x214   : > { %2911 = vmatprep.mubr.f32.mxu1 %v3861_v4 }
 0x215   : > { %v1740_v5 = vpop.f32.mrb[62].mxu0 }
 0x216   : > { %v1742_v7 = vpop.f32.mrb[63].mxu0  ;;  %2519 = vmatmul.mubr.f32.gmra.mrb[168].mxu0 %v3862_v10  ;;  %v2134_v14 = vpop.f32.mrb[62].mxu1  ;;  %v1922_v28 = vrot.slane %v1740_v5, 2 }
 0x217   : > { %2912 = vmatmul.mubr.f32.gmra.mrb[168].mxu1 %v3862_v10  ;;  %v2135_v19 = vpop.f32.mrb[63].mxu1  ;;  %2523 = vmatprep.mubr.f32.mxu0 %v3863_v23  ;;  %v3870_v10 = vld [vmem:[%s5773_s0 + $0x1a0] sm:$0xff] }
 0x218   : > { %2916 = vmatprep.mubr.f32.mxu1 %v3863_v23  ;;  %v3871_v23 = vld [vmem:[%s5773_s0 + $0x1b8] sm:$0xff] }
 0x219   : > { %v1745_v26 = vpop.f32.mrb[64].mxu0 }
 0x21a   : > { %v1923_v3 = vrot.slane %v1745_v26, 2  ;;  %v1747_v41 = vpop.f32.mrb[65].mxu0  ;;  %2524 = vmatmul.mubr.f32.gmra.mrb[170].mxu0 %v3864_v0  ;;  %v2138_v35 = vpop.f32.mrb[64].mxu1 }
 0x21b   : > { %2917 = vmatmul.mubr.f32.gmra.mrb[170].mxu1 %v3864_v0  ;;  %v2139_v42 = vpop.f32.mrb[65].mxu1  ;;  %2528 = vmatprep.mubr.f32.mxu0 %v3865_v8  ;;  %v3872_v35 = vld [vmem:[%s5773_s0 + $0x1b0] sm:$0xff] }
 0x21c   : > { %2921 = vmatprep.mubr.f32.mxu1 %v3865_v8  ;;  %v1924_v36 = vsel %vm1921_vm1, %v1922_v28, %v1923_v3 }
 0x21d   : > { %v1750_v37 = vpop.f32.mrb[66].mxu0  ;;  %v2007_v47 = vadd.f32 %v1924_v36, %v5177_v20  ;;  %v3873_v36 = vld [vmem:[%s5773_s0 + $0x1c8] sm:$0xff] }
 0x21e   : > { %v1925_v52 = vrot.slane %v1750_v37, 2  ;;  %v1752_v57 = vpop.f32.mrb[67].mxu0  ;;  %v2142_v48 = vpop.f32.mrb[66].mxu1  ;;  %2529 = vmatmul.mubr.f32.gmra.mrb[172].mxu0 %v3866_v16 }
 0x21f   : > { %v5436_v2 = vadd.f32 %v2142_v48, %v2007_v47  ;;  %2922 = vmatmul.mubr.f32.gmra.mrb[172].mxu1 %v3866_v16  ;;  %v2144_v58 = vpop.f32.mrb[67].mxu1  ;;  %2533 = vmatprep.mubr.f32.mxu0 %v3867_v61  ;;  %v3874_v16 = vld [vmem:[%s5773_s0 + $0x1c0] sm:$0xff] }
 0x220   : > { %2926 = vmatprep.mubr.f32.mxu1 %v3867_v61  ;;  %v1926_v20 = vsel %vm1921_vm1, %v1923_v3, %v1925_v52 }
 0x221   : > { %v1755_v11 = vpop.f32.mrb[68].mxu0  ;;  %v2008_v1 = vadd.f32 %v1926_v20, %v5184_v33  ;;  %v3875_v20 = vld [vmem:[%s5773_s0 + $0x1d8] sm:$0xff] }
 0x222   : > { %v1927_v56 = vrot.slane %v1755_v11, 2  ;;  %v1757_v21 = vpop.f32.mrb[69].mxu0  ;;  %v2147_v51 = vpop.f32.mrb[68].mxu1  ;;  %2534 = vmatmul.mubr.f32.gmra.mrb[174].mxu0 %v3868_v39 }
 0x223   : > { %v5446_v50 = vadd.f32 %v2147_v51, %v2008_v1  ;;  %2927 = vmatmul.mubr.f32.gmra.mrb[174].mxu1 %v3868_v39  ;;  %v2149_v63 = vpop.f32.mrb[69].mxu1  ;;  %2538 = vmatprep.mubr.f32.mxu0 %v3869_v46  ;;  %v3876_v39 = vld [vmem:[%s5773_s0 + $0x1d0] sm:$0xff] }
 0x224   : > { %2931 = vmatprep.mubr.f32.mxu1 %v3869_v46  ;;  %v1928_v33 = vsel %vm1921_vm1, %v1925_v52, %v1927_v56 }
 0x225   : > { %v1760_v59 = vpop.f32.mrb[70].mxu0  ;;  %v2009_v60 = vadd.f32 %v1928_v33, %v5191_v44  ;;  %v3877_v33 = vld [vmem:[%s5773_s0 + $0x1e8] sm:$0xff] }
 0x226   : > { %v1929_v4 = vrot.slane %v1760_v59, 2  ;;  %v1762_v5 = vpop.f32.mrb[71].mxu0  ;;  %v2152_v7 = vpop.f32.mrb[70].mxu1  ;;  %2539 = vmatmul.mubr.f32.gmra.mrb[176].mxu0 %v3870_v10 }
 0x227   : > { %v5456_v14 = vadd.f32 %v2152_v7, %v2009_v60  ;;  %2932 = vmatmul.mubr.f32.gmra.mrb[176].mxu1 %v3870_v10  ;;  %v2154_v19 = vpop.f32.mrb[71].mxu1  ;;  %2543 = vmatprep.mubr.f32.mxu0 %v3871_v23  ;;  %v3878_v10 = vld [vmem:[%s5773_s0 + $0x1e0] sm:$0xff] }
 0x228   : > { %2936 = vmatprep.mubr.f32.mxu1 %v3871_v23  ;;  %v1930_v44 = vsel %vm1921_vm1, %v1927_v56, %v1929_v4 }
 0x229   : > { %v1765_v26 = vpop.f32.mrb[72].mxu0  ;;  %v2010_v28 = vadd.f32 %v1930_v44, %v5198_v53 }
 0x22a   : > { %v1931_v3 = vrot.slane %v1765_v26, 2  ;;  %v1767_v41 = vpop.f32.mrb[73].mxu0  ;;  %v2157_v0 = vpop.f32.mrb[72].mxu1  ;;  %2544 = vmatmul.mubr.f32.gmra.mrb[178].mxu0 %v3872_v35 }
 0x22b   : > { %v5466_v42 = vadd.f32 %v2157_v0, %v2010_v28  ;;  %2937 = vmatmul.mubr.f32.gmra.mrb[178].mxu1 %v3872_v35  ;;  %v2159_v8 = vpop.f32.mrb[73].mxu1  ;;  %2548 = vmatprep.mubr.f32.mxu0 %v3873_v36 }
 0x22c   : > { %2941 = vmatprep.mubr.f32.mxu1 %v3873_v36  ;;  %v1932_v53 = vsel %vm1921_vm1, %v1929_v4, %v1931_v3 }
 0x22d   : > { %v1770_v37 = vpop.f32.mrb[74].mxu0  ;;  %v2011_v47 = vadd.f32 %v1932_v53, %v5205_v17 }
 0x22e   : > { %v1933_v52 = vrot.slane %v1770_v37, 2  ;;  %v1772_v57 = vpop.f32.mrb[75].mxu0  ;;  %v2162_v48 = vpop.f32.mrb[74].mxu1  ;;  %2549 = vmatmul.mubr.f32.gmra.mrb[180].mxu0 %v3874_v16 }
 0x22f   : > { %v5476_v58 = vadd.f32 %v2162_v48, %v2011_v47  ;;  %2942 = vmatmul.mubr.f32.gmra.mrb[180].mxu1 %v3874_v16  ;;  %v2164_v61 = vpop.f32.mrb[75].mxu1  ;;  %2553 = vmatprep.mubr.f32.mxu0 %v3875_v20 }
 0x230   : > { %2946 = vmatprep.mubr.f32.mxu1 %v3875_v20  ;;  %v1934_v17 = vsel %vm1921_vm1, %v1931_v3, %v1933_v52 }
 0x231   : > { %v1775_v11 = vpop.f32.mrb[76].mxu0  ;;  %v2012_v1 = vadd.f32 %v1934_v17, %v5212_v25 }
 0x232   : > { %v1935_v56 = vrot.slane %v1775_v11, 2  ;;  %v1777_v21 = vpop.f32.mrb[77].mxu0  ;;  %v2167_v51 = vpop.f32.mrb[76].mxu1  ;;  %2554 = vmatmul.mubr.f32.gmra.mrb[182].mxu0 %v3876_v39 }
 0x233   : > { %v5486_v63 = vadd.f32 %v2167_v51, %v2012_v1  ;;  %2947 = vmatmul.mubr.f32.gmra.mrb[182].mxu1 %v3876_v39  ;;  %v2169_v46 = vpop.f32.mrb[77].mxu1  ;;  %2558 = vmatprep.mubr.f32.mxu0 %v3877_v33 }
 0x234   : > { %2951 = vmatprep.mubr.f32.mxu1 %v3877_v33  ;;  %v1936_v25 = vsel %vm1921_vm1, %v1933_v52, %v1935_v56 }
 0x235   : > { %v1780_v59 = vpop.f32.mrb[78].mxu0  ;;  %v2013_v60 = vadd.f32 %v1936_v25, %v5219_v45 }
 0x236   : > { %v1937_v4 = vrot.slane %v1780_v59, 2  ;;  %v1782_v5 = vpop.f32.mrb[79].mxu0  ;;  %v2172_v7 = vpop.f32.mrb[78].mxu1  ;;  %2559 = vmatmul.mubr.f32.gmra.mrb[184].mxu0 %v3878_v10 }
 0x237   : > { %v5496_v19 = vadd.f32 %v2172_v7, %v2013_v60  ;;  %2952 = vmatmul.mubr.f32.gmra.mrb[184].mxu1 %v3878_v10  ;;  %v2174_v23 = vpop.f32.mrb[79].mxu1 }
 0x238   : > { %v1938_v44 = vsel %vm1921_vm1, %v1935_v56, %v1937_v4 }
 0x239   : > { %v1785_v26 = vpop.f32.mrb[80].mxu0  ;;  %v2014_v28 = vadd.f32 %v1938_v44, %v5228_v13 }
 0x23a   : > { %v1939_v3 = vrot.slane %v1785_v26, 2  ;;  %v1787_v41 = vpop.f32.mrb[81].mxu0  ;;  %v2177_v45 = vpop.f32.mrb[80].mxu1 }
 0x23b   : > { %v5500_v0 = vadd.f32 %v2177_v45, %v2014_v28  ;;  %v2179_v35 = vpop.f32.mrb[81].mxu1 }
 0x23c   : > { %v1940_v8 = vsel %vm1921_vm1, %v1937_v4, %v1939_v3 }
 0x23d   : > { %v1790_v36 = vpop.f32.mrb[82].mxu0  ;;  %v2015_v53 = vadd.f32 %v1940_v8, %v5237_v29 }
 0x23e   : > { %v1941_v37 = vrot.slane %v1790_v36, 2  ;;  %v1792_v47 = vpop.f32.mrb[83].mxu0  ;;  %v2182_v52 = vpop.f32.mrb[82].mxu1 }
 0x23f   : > { %v5504_v57 = vadd.f32 %v2182_v52, %v2015_v53  ;;  %v2184_v48 = vpop.f32.mrb[83].mxu1 }
 0x240   : > { %v1942_v16 = vsel %vm1921_vm1, %v1939_v3, %v1941_v37 }
 0x241   : > { %v1795_v13 = vpop.f32.mrb[84].mxu0  ;;  %v2016_v61 = vadd.f32 %v1942_v16, %v5246_v49 }
 0x242   : > { %v1943_v20 = vrot.slane %v1795_v13, 2  ;;  %v1797_v17 = vpop.f32.mrb[85].mxu0  ;;  %v2187_v11 = vpop.f32.mrb[84].mxu1 }
 0x243   : > { %v5508_v1 = vadd.f32 %v2187_v11, %v2016_v61  ;;  %v2189_v56 = vpop.f32.mrb[85].mxu1 }
 0x244   : > { %v1944_v21 = vsel %vm1921_vm1, %v1941_v37, %v1943_v20 }
 0x245   : > { %v1800_v29 = vpop.f32.mrb[86].mxu0  ;;  %v2017_v51 = vadd.f32 %v1944_v21, %v5255_v54 }
 0x246   : > { %v1945_v39 = vrot.slane %v1800_v29, 2  ;;  %v1802_v46 = vpop.f32.mrb[87].mxu0  ;;  %v2192_v33 = vpop.f32.mrb[86].mxu1 }
 0x247   : > { %v5512_v25 = vadd.f32 %v2192_v33, %v2017_v51  ;;  %v2194_v59 = vpop.f32.mrb[87].mxu1 }
 0x248   : > { %v1946_v60 = vsel %vm1921_vm1, %v1943_v20, %v1945_v39 }
 0x249   : > { %v1805_v49 = vpop.f32.mrb[88].mxu0  ;;  %v2018_v4 = vadd.f32 %v1946_v60, %v5264_v12 }
 0x24a   : > { %v1947_v5 = vrot.slane %v1805_v49, 2  ;;  %v1807_v7 = vpop.f32.mrb[89].mxu0  ;;  %v2197_v10 = vpop.f32.mrb[88].mxu1 }
 0x24b   : > { %v5516_v23 = vadd.f32 %v2197_v10, %v2018_v4  ;;  %v2199_v44 = vpop.f32.mrb[89].mxu1 }
 0x24c   : > { %v1948_v26 = vsel %vm1921_vm1, %v1945_v39, %v1947_v5 }
 0x24d   : > { %v1810_v54 = vpop.f32.mrb[90].mxu0  ;;  %v2019_v28 = vadd.f32 %v1948_v26, %v5273_v32 }
 0x24e   : > { %v1949_v3 = vrot.slane %v1810_v54, 2  ;;  %v1812_v41 = vpop.f32.mrb[91].mxu0  ;;  %v2202_v45 = vpop.f32.mrb[90].mxu1 }
 0x24f   : > { %v5520_v35 = vadd.f32 %v2202_v45, %v2019_v28  ;;  %v2204_v8 = vpop.f32.mrb[91].mxu1 }
 0x250   : > { %v1950_v36 = vsel %vm1921_vm1, %v1947_v5, %v1949_v3 }
 0x251   : > { %v1815_v12 = vpop.f32.mrb[92].mxu0  ;;  %v2020_v53 = vadd.f32 %v1950_v36, %v5282_v6 }
 0x252   : > { %v1951_v37 = vrot.slane %v1815_v12, 2  ;;  %v1817_v47 = vpop.f32.mrb[93].mxu0  ;;  %v2207_v52 = vpop.f32.mrb[92].mxu1 }
 0x253   : > { %v5524_v48 = vadd.f32 %v2207_v52, %v2020_v53  ;;  %v2209_v16 = vpop.f32.mrb[93].mxu1 }
 0x254   : > { %v1952_v13 = vsel %vm1921_vm1, %v1949_v3, %v1951_v37 }
 0x255   : > { %v1820_v32 = vpop.f32.mrb[94].mxu0  ;;  %v2021_v61 = vadd.f32 %v1952_v13, %v5291_v27 }
 0x256   : > { %v1953_v20 = vrot.slane %v1820_v32, 2  ;;  %v1822_v17 = vpop.f32.mrb[95].mxu0  ;;  %v2212_v11 = vpop.f32.mrb[94].mxu1 }
 0x257   : > { %v5528_v56 = vadd.f32 %v2212_v11, %v2021_v61  ;;  %v2214_v21 = vpop.f32.mrb[95].mxu1 }
 0x258   : > { %v1954_v29 = vsel %vm1921_vm1, %v1951_v37, %v1953_v20 }
 0x259   : > { %v1825_v6 = vpop.f32.mrb[96].mxu0  ;;  %v2022_v51 = vadd.f32 %v1954_v29, %v5300_v43 }
 0x25a   : > { %v1955_v39 = vrot.slane %v1825_v6, 2  ;;  %v1827_v46 = vpop.f32.mrb[97].mxu0  ;;  %v2217_v33 = vpop.f32.mrb[96].mxu1 }
 0x25b   : > { %v5532_v59 = vadd.f32 %v2217_v33, %v2022_v51  ;;  %v2219_v60 = vpop.f32.mrb[97].mxu1 }
 0x25c   : > { %v1956_v49 = vsel %vm1921_vm1, %v1953_v20, %v1955_v39 }
 0x25d   : > { %v1830_v27 = vpop.f32.mrb[98].mxu0  ;;  %v2023_v4 = vadd.f32 %v1956_v49, %v5309_v38 }
 0x25e   : > { %v1957_v5 = vrot.slane %v1830_v27, 2  ;;  %v1832_v7 = vpop.f32.mrb[99].mxu0  ;;  %v2222_v10 = vpop.f32.mrb[98].mxu1 }
 0x25f   : > { %v5536_v44 = vadd.f32 %v2222_v10, %v2023_v4  ;;  %v2224_v26 = vpop.f32.mrb[99].mxu1 }
 0x260   : > { %v1958_v54 = vsel %vm1921_vm1, %v1955_v39, %v1957_v5 }
 0x261   : > { %v1835_v43 = vpop.f32.mrb[100].mxu0  ;;  %v2024_v28 = vadd.f32 %v1958_v54, %v5318_v24 }
 0x262   : > { %v1959_v3 = vrot.slane %v1835_v43, 2  ;;  %v1837_v41 = vpop.f32.mrb[101].mxu0  ;;  %v2227_v45 = vpop.f32.mrb[100].mxu1 }
 0x263   : > { %v5540_v8 = vadd.f32 %v2227_v45, %v2024_v28  ;;  %v2229_v36 = vpop.f32.mrb[101].mxu1 }
 0x264   : > { %v1960_v12 = vsel %vm1921_vm1, %v1957_v5, %v1959_v3 }
 0x265   : > { %v1840_v38 = vpop.f32.mrb[102].mxu0  ;;  %v2025_v53 = vadd.f32 %v1960_v12, %v5327_v34 }
 0x266   : > { %v1961_v37 = vrot.slane %v1840_v38, 2  ;;  %v1842_v47 = vpop.f32.mrb[103].mxu0  ;;  %v2232_v52 = vpop.f32.mrb[102].mxu1 }
 0x267   : > { %v5544_v16 = vadd.f32 %v2232_v52, %v2025_v53  ;;  %v2234_v13 = vpop.f32.mrb[103].mxu1 }
 0x268   : > { %v1962_v32 = vsel %vm1921_vm1, %v1959_v3, %v1961_v37 }
 0x269   : > { %v1845_v24 = vpop.f32.mrb[104].mxu0  ;;  %v2026_v61 = vadd.f32 %v1962_v32, %v5336_v15 }
 0x26a   : > { %v1963_v20 = vrot.slane %v1845_v24, 2  ;;  %v1847_v17 = vpop.f32.mrb[105].mxu0  ;;  %v2237_v11 = vpop.f32.mrb[104].mxu1 }
 0x26b   : > { %v5548_v21 = vadd.f32 %v2237_v11, %v2026_v61  ;;  %v2239_v29 = vpop.f32.mrb[105].mxu1 }
 0x26c   : > { %v1964_v6 = vsel %vm1921_vm1, %v1961_v37, %v1963_v20 }
 0x26d   : > { %v1850_v34 = vpop.f32.mrb[106].mxu0  ;;  %v2027_v51 = vadd.f32 %v1964_v6, %v5345_v30 }
 0x26e   : > { %v1965_v39 = vrot.slane %v1850_v34, 2  ;;  %v1852_v46 = vpop.f32.mrb[107].mxu0  ;;  %v2242_v33 = vpop.f32.mrb[106].mxu1 }
 0x26f   : > { %v5552_v60 = vadd.f32 %v2242_v33, %v2027_v51  ;;  %v2244_v49 = vpop.f32.mrb[107].mxu1 }
 0x270   : > { %v1966_v27 = vsel %vm1921_vm1, %v1963_v20, %v1965_v39 }
 0x271   : > { %v1855_v15 = vpop.f32.mrb[108].mxu0  ;;  %v2028_v4 = vadd.f32 %v1966_v27, %v5354_v9 }
 0x272   : > { %v1967_v5 = vrot.slane %v1855_v15, 2  ;;  %v1857_v7 = vpop.f32.mrb[109].mxu0  ;;  %v2247_v10 = vpop.f32.mrb[108].mxu1 }
 0x273   : > { %v5556_v26 = vadd.f32 %v2247_v10, %v2028_v4  ;;  %v2249_v54 = vpop.f32.mrb[109].mxu1 }
 0x274   : > { %v1968_v43 = vsel %vm1921_vm1, %v1965_v39, %v1967_v5 }
 0x275   : > { %v1860_v30 = vpop.f32.mrb[110].mxu0  ;;  %v2029_v28 = vadd.f32 %v1968_v43, %v5363_v55 }
 0x276   : > { %v1969_v3 = vrot.slane %v1860_v30, 2  ;;  %v1862_v41 = vpop.f32.mrb[111].mxu0  ;;  %v2252_v45 = vpop.f32.mrb[110].mxu1 }
 0x277   : > { %v5560_v36 = vadd.f32 %v2252_v45, %v2029_v28  ;;  %v2254_v12 = vpop.f32.mrb[111].mxu1 }
 0x278   : > { %v1970_v38 = vsel %vm1921_vm1, %v1967_v5, %v1969_v3 }
 0x279   : > { %v1865_v9 = vpop.f32.mrb[112].mxu0  ;;  %v2030_v53 = vadd.f32 %v1970_v38, %v5372_v31 }
 0x27a   : > { %v1971_v37 = vrot.slane %v1865_v9, 2  ;;  %v1867_v47 = vpop.f32.mrb[113].mxu0  ;;  %v2257_v52 = vpop.f32.mrb[112].mxu1 }
 0x27b   : > { %v5564_v13 = vadd.f32 %v2257_v52, %v2030_v53  ;;  %v2259_v32 = vpop.f32.mrb[113].mxu1 }
 0x27c   : > { %v1972_v24 = vsel %vm1921_vm1, %v1969_v3, %v1971_v37 }
 0x27d   : > { %v1870_v55 = vpop.f32.mrb[114].mxu0  ;;  %v2031_v61 = vadd.f32 %v1972_v24, %v5381_v18 }
 0x27e   : > { %v1973_v20 = vrot.slane %v1870_v55, 2  ;;  %v1872_v17 = vpop.f32.mrb[115].mxu0  ;;  %v2262_v11 = vpop.f32.mrb[114].mxu1 }
 0x27f   : > { %v5568_v29 = vadd.f32 %v2262_v11, %v2031_v61  ;;  %v2264_v6 = vpop.f32.mrb[115].mxu1 }
 0x280   : > { %v1974_v34 = vsel %vm1921_vm1, %v1971_v37, %v1973_v20 }
 0x281   : > { %v1875_v31 = vpop.f32.mrb[116].mxu0  ;;  %v2032_v51 = vadd.f32 %v1974_v34, %v5390_v40 }
 0x282   : > { %v1975_v39 = vrot.slane %v1875_v31, 2  ;;  %v1877_v46 = vpop.f32.mrb[117].mxu0  ;;  %v2267_v33 = vpop.f32.mrb[116].mxu1 }
 0x283   : > { %v5572_v49 = vadd.f32 %v2267_v33, %v2032_v51  ;;  %v2269_v27 = vpop.f32.mrb[117].mxu1 }
 0x284   : > { %v1976_v15 = vsel %vm1921_vm1, %v1973_v20, %v1975_v39 }
 0x285   : > { %v1880_v18 = vpop.f32.mrb[118].mxu0  ;;  %v2033_v4 = vadd.f32 %v1976_v15, %v5399_v62 }
 0x286   : > { %v1977_v5 = vrot.slane %v1880_v18, 2  ;;  %v1882_v7 = vpop.f32.mrb[119].mxu0  ;;  %v2272_v10 = vpop.f32.mrb[118].mxu1 }
 0x287   : > { %v5576_v54 = vadd.f32 %v2272_v10, %v2033_v4  ;;  %v2274_v43 = vpop.f32.mrb[119].mxu1 }
 0x288   : > { %v1978_v30 = vsel %vm1921_vm1, %v1975_v39, %v1977_v5 }
 0x289   : > { %v1885_v40 = vpop.f32.mrb[120].mxu0  ;;  %v2034_v28 = vadd.f32 %v1978_v30, %v5408_v22 }
 0x28a   : > { %v1886_v3 = vpop.f32.mrb[121].mxu0  ;;  %v2277_v41 = vpop.f32.mrb[120].mxu1 }
 0x28b   : > { %v5580_v45 = vadd.f32 %v2277_v41, %v2034_v28  ;;  %v2279_v12 = vpop.f32.mrb[121].mxu1 }
 0x28d   : > { %v1889_v38 = vpop.f32.mrb[122].mxu0 }
 0x28e   : > { %v1890_v9 = vpop.f32.mrb[123].mxu0  ;;  %v2282_v53 = vpop.f32.mrb[122].mxu1 }
 0x28f   : > { %v2283_v62 = vpop.f32.mrb[123].mxu1 }
 0x291   : > { %v2412_v37 = vpop.f32.mrb[124].mxu0 }
 0x292   : > { %v2413_v47 = vpop.f32.mrb[125].mxu0  ;;  %v2805_v52 = vpop.f32.mrb[124].mxu1 }
 0x293   : > { %v2806_v32 = vpop.f32.mrb[125].mxu1 }
 0x295   : > { %v2416_v24 = vpop.f32.mrb[126].mxu0 }
 0x296   : > { %v2417_v55 = vpop.f32.mrb[127].mxu0  ;;  %v2809_v61 = vpop.f32.mrb[126].mxu1 }
 0x297   : > { %v2810_v20 = vpop.f32.mrb[127].mxu1 }
 0x299   : > { %v2420_v17 = vpop.f32.mrb[128].mxu0 }
 0x29a   : > { %v2422_v22 = vpop.f32.mrb[129].mxu0  ;;  %v2813_v11 = vpop.f32.mrb[128].mxu1  ;;  %v2593_v31 = vrot.slane %v2420_v17, 1 }
 0x29b   : > { %v2815_v6 = vpop.f32.mrb[129].mxu1  ;;  %v2986_v33 = vrot.slane %v2813_v11, 2 }
 0x29d   : > { %v2425_v34 = vpop.f32.mrb[130].mxu0 }
 0x29e   : > { %v2594_v51 = vrot.slane %v2425_v34, 1  ;;  %v2818_v39 = vpop.f32.mrb[130].mxu1  ;;  %v2427_v46 = vpop.f32.mrb[131].mxu0 }
 0x29f   : > { %v2987_v27 = vrot.slane %v2818_v39, 2  ;;  %v2820_v15 = vpop.f32.mrb[131].mxu1 }
 0x2a0   : > { %v2595_v18 = vsel %vm1527_vm0, %v2593_v31, %v2594_v51 }
 0x2a1   : > { %v2678_v4 = vadd.f32 %v2595_v18, %v5436_v2  ;;  %v2988_v5 = vsel %vm1921_vm1, %v2986_v33, %v2987_v27  ;;  %v2430_v7 = vpop.f32.mrb[132].mxu0 }
 0x2a2   : > { %v2596_v10 = vrot.slane %v2430_v7, 1  ;;  %v2823_v43 = vpop.f32.mrb[132].mxu1  ;;  %v2432_v30 = vpop.f32.mrb[133].mxu0 }
 0x2a3   : > { %v3071_v40 = vadd.f32 %v2988_v5, %v2678_v4  ;;  %v2989_v28 = vrot.slane %v2823_v43, 2  ;;  %v2825_v3 = vpop.f32.mrb[133].mxu1 }
 0x2a4   : > { %v2597_v41 = vsel %vm1527_vm0, %v2594_v51, %v2596_v10 }
 0x2a5   : > { %3099 = vst [vmem:[%s5588_s9] sm:$0xff] %v3071_v40  ;;  %v2679_v12 = vadd.f32 %v2597_v41, %v5446_v50  ;;  %v2990_v2 = vsel %vm1921_vm1, %v2987_v27, %v2989_v28  ;;  %v2435_v38 = vpop.f32.mrb[134].mxu0 }
 0x2a6   : > { %v2598_v9 = vrot.slane %v2435_v38, 1  ;;  %v2828_v53 = vpop.f32.mrb[134].mxu1  ;;  %v2437_v62 = vpop.f32.mrb[135].mxu0 }
 0x2a7   : > { %v3072_v37 = vadd.f32 %v2990_v2, %v2679_v12  ;;  %v2991_v47 = vrot.slane %v2828_v53, 2  ;;  %v2830_v52 = vpop.f32.mrb[135].mxu1 }
 0x2a8   : > { %v2599_v32 = vsel %vm1527_vm0, %v2596_v10, %v2598_v9 }
 0x2a9   : > { %3100 = vst [vmem:[%s5588_s9 + $0x8] sm:$0xff] %v3072_v37  ;;  %v2680_v24 = vadd.f32 %v2599_v32, %v5456_v14  ;;  %v2992_v55 = vsel %vm1921_vm1, %v2989_v28, %v2991_v47  ;;  %v2440_v61 = vpop.f32.mrb[136].mxu0 }
 0x2aa   : > { %v2600_v20 = vrot.slane %v2440_v61, 1  ;;  %v2833_v50 = vpop.f32.mrb[136].mxu1  ;;  %v2442_v17 = vpop.f32.mrb[137].mxu0 }
 0x2ab   : > { %v3073_v22 = vadd.f32 %v2992_v55, %v2680_v24  ;;  %v2993_v11 = vrot.slane %v2833_v50, 2  ;;  %v2835_v6 = vpop.f32.mrb[137].mxu1 }
 0x2ac   : > { %v2601_v34 = vsel %vm1527_vm0, %v2598_v9, %v2600_v20 }
 0x2ad   : > { %3101 = vst [vmem:[%s5588_s9 + $0x10] sm:$0xff] %v3073_v22  ;;  %v2681_v31 = vadd.f32 %v2601_v34, %v5466_v42  ;;  %v2994_v51 = vsel %vm1921_vm1, %v2991_v47, %v2993_v11  ;;  %v2445_v39 = vpop.f32.mrb[138].mxu0 }
 0x2ae   : > { %v2602_v46 = vrot.slane %v2445_v39, 1  ;;  %v2838_v14 = vpop.f32.mrb[138].mxu1  ;;  %v2447_v33 = vpop.f32.mrb[139].mxu0 }
 0x2af   : > { %v3074_v27 = vadd.f32 %v2994_v51, %v2681_v31  ;;  %v2995_v15 = vrot.slane %v2838_v14, 2  ;;  %v2840_v18 = vpop.f32.mrb[139].mxu1 }
 0x2b0   : > { %v2603_v4 = vsel %vm1527_vm0, %v2600_v20, %v2602_v46 }
 0x2b1   : > { %3102 = vst [vmem:[%s5588_s9 + $0x18] sm:$0xff] %v3074_v27  ;;  %v2682_v5 = vadd.f32 %v2603_v4, %v5476_v58  ;;  %v2996_v7 = vsel %vm1921_vm1, %v2993_v11, %v2995_v15  ;;  %v2450_v10 = vpop.f32.mrb[140].mxu0 }
 0x2b2   : > { %v2604_v43 = vrot.slane %v2450_v10, 1  ;;  %v2843_v42 = vpop.f32.mrb[140].mxu1  ;;  %v2452_v30 = vpop.f32.mrb[141].mxu0 }
 0x2b3   : > { %v3075_v40 = vadd.f32 %v2996_v7, %v2682_v5  ;;  %v2997_v28 = vrot.slane %v2843_v42, 2  ;;  %v2845_v3 = vpop.f32.mrb[141].mxu1 }
 0x2b4   : > { %v2605_v41 = vsel %vm1527_vm0, %v2602_v46, %v2604_v43 }
 0x2b5   : > { %3103 = vst [vmem:[%s5588_s9 + $0x20] sm:$0xff] %v3075_v40  ;;  %v2683_v12 = vadd.f32 %v2605_v41, %v5486_v63  ;;  %v2998_v2 = vsel %vm1921_vm1, %v2995_v15, %v2997_v28  ;;  %v2455_v38 = vpop.f32.mrb[142].mxu0 }
 0x2b6   : > { %v2606_v9 = vrot.slane %v2455_v38, 1  ;;  %v2848_v58 = vpop.f32.mrb[142].mxu1  ;;  %v2457_v53 = vpop.f32.mrb[143].mxu0 }
 0x2b7   : > { %v3076_v62 = vadd.f32 %v2998_v2, %v2683_v12  ;;  %v2999_v37 = vrot.slane %v2848_v58, 2  ;;  %v2850_v47 = vpop.f32.mrb[143].mxu1 }
 0x2b8   : > { %v2607_v52 = vsel %vm1527_vm0, %v2604_v43, %v2606_v9 }
 0x2b9   : > { %3104 = vst [vmem:[%s5588_s9 + $0x28] sm:$0xff] %v3076_v62  ;;  %v2684_v32 = vadd.f32 %v2607_v52, %v5496_v19  ;;  %v3000_v24 = vsel %vm1921_vm1, %v2997_v28, %v2999_v37  ;;  %v2460_v55 = vpop.f32.mrb[144].mxu0 }
 0x2ba   : > { %v2608_v61 = vrot.slane %v2460_v55, 1  ;;  %v2853_v63 = vpop.f32.mrb[144].mxu1  ;;  %v2462_v20 = vpop.f32.mrb[145].mxu0 }
 0x2bb   : > { %v3077_v50 = vadd.f32 %v3000_v24, %v2684_v32  ;;  %v3001_v17 = vrot.slane %v2853_v63, 2  ;;  %v2855_v22 = vpop.f32.mrb[145].mxu1 }
 0x2bc   : > { %v2609_v11 = vsel %vm1527_vm0, %v2606_v9, %v2608_v61 }
 0x2bd   : > { %3105 = vst [vmem:[%s5588_s9 + $0x30] sm:$0xff] %v3077_v50  ;;  %v2685_v6 = vadd.f32 %v2609_v11, %v5500_v0  ;;  %v3002_v34 = vsel %vm1921_vm1, %v2999_v37, %v3001_v17  ;;  %v2465_v31 = vpop.f32.mrb[146].mxu0 }
 0x2be   : > { %v2610_v51 = vrot.slane %v2465_v31, 1  ;;  %v2858_v19 = vpop.f32.mrb[146].mxu1  ;;  %v2467_v39 = vpop.f32.mrb[147].mxu0 }
 0x2bf   : > { %v3078_v46 = vadd.f32 %v3002_v34, %v2685_v6  ;;  %v3003_v14 = vrot.slane %v2858_v19, 2  ;;  %v2860_v33 = vpop.f32.mrb[147].mxu1 }
 0x2c0   : > { %v2611_v27 = vsel %vm1527_vm0, %v2608_v61, %v2610_v51 }
 0x2c1   : > { %3106 = vst [vmem:[%s5588_s9 + $0x38] sm:$0xff] %v3078_v46  ;;  %v2686_v15 = vadd.f32 %v2611_v27, %v5504_v57  ;;  %v3004_v18 = vsel %vm1921_vm1, %v3001_v17, %v3003_v14  ;;  %v2470_v4 = vpop.f32.mrb[148].mxu0 }
 0x2c2   : > { %v2612_v5 = vrot.slane %v2470_v4, 1  ;;  %v2863_v0 = vpop.f32.mrb[148].mxu1  ;;  %v2472_v7 = vpop.f32.mrb[149].mxu0 }
 0x2c3   : > { %v3079_v10 = vadd.f32 %v3004_v18, %v2686_v15  ;;  %v3005_v43 = vrot.slane %v2863_v0, 2  ;;  %v2865_v42 = vpop.f32.mrb[149].mxu1 }
 0x2c4   : > { %v2613_v30 = vsel %vm1527_vm0, %v2610_v51, %v2612_v5 }
 0x2c5   : > { %3107 = vst [vmem:[%s5588_s9 + $0x40] sm:$0xff] %v3079_v10  ;;  %v2687_v40 = vadd.f32 %v2613_v30, %v5508_v1  ;;  %v3006_v28 = vsel %vm1921_vm1, %v3003_v14, %v3005_v43  ;;  %v2475_v3 = vpop.f32.mrb[150].mxu0 }
 0x2c6   : > { %v2614_v41 = vrot.slane %v2475_v3, 1  ;;  %v2868_v57 = vpop.f32.mrb[150].mxu1  ;;  %v2477_v12 = vpop.f32.mrb[151].mxu0 }
 0x2c7   : > { %v3080_v2 = vadd.f32 %v3006_v28, %v2687_v40  ;;  %v3007_v38 = vrot.slane %v2868_v57, 2  ;;  %v2870_v9 = vpop.f32.mrb[151].mxu1 }
 0x2c8   : > { %v2615_v58 = vsel %vm1527_vm0, %v2612_v5, %v2614_v41 }
 0x2c9   : > { %3108 = vst [vmem:[%s5588_s9 + $0x48] sm:$0xff] %v3080_v2  ;;  %v2688_v53 = vadd.f32 %v2615_v58, %v5512_v25  ;;  %v3008_v62 = vsel %vm1921_vm1, %v3005_v43, %v3007_v38  ;;  %v2480_v37 = vpop.f32.mrb[152].mxu0 }
 0x2ca   : > { %v2616_v47 = vrot.slane %v2480_v37, 1  ;;  %v2873_v1 = vpop.f32.mrb[152].mxu1  ;;  %v2482_v52 = vpop.f32.mrb[153].mxu0 }
 0x2cb   : > { %v3081_v32 = vadd.f32 %v3008_v62, %v2688_v53  ;;  %v3009_v24 = vrot.slane %v2873_v1, 2  ;;  %v2875_v55 = vpop.f32.mrb[153].mxu1 }
 0x2cc   : > { %v2617_v61 = vsel %vm1527_vm0, %v2614_v41, %v2616_v47 }
 0x2cd   : > { %3109 = vst [vmem:[%s5588_s9 + $0x50] sm:$0xff] %v3081_v32  ;;  %v2689_v63 = vadd.f32 %v2617_v61, %v5516_v23  ;;  %v3010_v20 = vsel %vm1921_vm1, %v3007_v38, %v3009_v24  ;;  %v2485_v50 = vpop.f32.mrb[154].mxu0 }
 0x2ce   : > { %v2618_v17 = vrot.slane %v2485_v50, 1  ;;  %v2878_v25 = vpop.f32.mrb[154].mxu1  ;;  %v2487_v22 = vpop.f32.mrb[155].mxu0 }
 0x2cf   : > { %v3082_v11 = vadd.f32 %v3010_v20, %v2689_v63  ;;  %v3011_v6 = vrot.slane %v2878_v25, 2  ;;  %v2880_v34 = vpop.f32.mrb[155].mxu1 }
 0x2d0   : > { %v2619_v31 = vsel %vm1527_vm0, %v2616_v47, %v2618_v17 }
 0x2d1   : > { %3110 = vst [vmem:[%s5588_s9 + $0x58] sm:$0xff] %v3082_v11  ;;  %v2690_v51 = vadd.f32 %v2619_v31, %v5520_v35  ;;  %v3012_v19 = vsel %vm1921_vm1, %v3009_v24, %v3011_v6  ;;  %v2490_v39 = vpop.f32.mrb[156].mxu0 }
 0x2d2   : > { %v2620_v46 = vrot.slane %v2490_v39, 1  ;;  %v2883_v23 = vpop.f32.mrb[156].mxu1  ;;  %v2492_v14 = vpop.f32.mrb[157].mxu0 }
 0x2d3   : > { %v3083_v33 = vadd.f32 %v3012_v19, %v2690_v51  ;;  %v3013_v27 = vrot.slane %v2883_v23, 2  ;;  %v2885_v15 = vpop.f32.mrb[157].mxu1 }
 0x2d4   : > { %v2621_v18 = vsel %vm1527_vm0, %v2618_v17, %v2620_v46 }
 0x2d5   : > { %3111 = vst [vmem:[%s5588_s9 + $0x60] sm:$0xff] %v3083_v33  ;;  %v2691_v4 = vadd.f32 %v2621_v18, %v5524_v48  ;;  %v3014_v5 = vsel %vm1921_vm1, %v3011_v6, %v3013_v27  ;;  %v2495_v0 = vpop.f32.mrb[158].mxu0 }
 0x2d6   : > { %v2622_v7 = vrot.slane %v2495_v0, 1  ;;  %v2888_v35 = vpop.f32.mrb[158].mxu1  ;;  %v2497_v10 = vpop.f32.mrb[159].mxu0 }
 0x2d7   : > { %v3084_v43 = vadd.f32 %v3014_v5, %v2691_v4  ;;  %v3015_v42 = vrot.slane %v2888_v35, 2  ;;  %v2890_v30 = vpop.f32.mrb[159].mxu1 }
 0x2d8   : > { %v2623_v40 = vsel %vm1527_vm0, %v2620_v46, %v2622_v7 }
 0x2d9   : > { %3112 = vst [vmem:[%s5588_s9 + $0x68] sm:$0xff] %v3084_v43  ;;  %v2692_v28 = vadd.f32 %v2623_v40, %v5528_v56  ;;  %v3016_v3 = vsel %vm1921_vm1, %v3013_v27, %v3015_v42  ;;  %v2500_v41 = vpop.f32.mrb[160].mxu0 }
 0x2da   : > { %v2624_v57 = vrot.slane %v2500_v41, 1  ;;  %v2893_v48 = vpop.f32.mrb[160].mxu1  ;;  %v2502_v12 = vpop.f32.mrb[161].mxu0 }
 0x2db   : > { %v3085_v2 = vadd.f32 %v3016_v3, %v2692_v28  ;;  %v3017_v38 = vrot.slane %v2893_v48, 2  ;;  %v2895_v9 = vpop.f32.mrb[161].mxu1 }
 0x2dc   : > { %v2625_v58 = vsel %vm1527_vm0, %v2622_v7, %v2624_v57 }
 0x2dd   : > { %3113 = vst [vmem:[%s5588_s9 + $0x70] sm:$0xff] %v3085_v2  ;;  %v2693_v53 = vadd.f32 %v2625_v58, %v5532_v59  ;;  %v3018_v62 = vsel %vm1921_vm1, %v3015_v42, %v3017_v38  ;;  %v2505_v37 = vpop.f32.mrb[162].mxu0 }
 0x2de   : > { %v2626_v47 = vrot.slane %v2505_v37, 1  ;;  %v2898_v56 = vpop.f32.mrb[162].mxu1  ;;  %v2507_v1 = vpop.f32.mrb[163].mxu0 }
 0x2df   : > { %v3086_v52 = vadd.f32 %v3018_v62, %v2693_v53  ;;  %v3019_v32 = vrot.slane %v2898_v56, 2  ;;  %v2900_v24 = vpop.f32.mrb[163].mxu1 }
 0x2e0   : > { %v2627_v55 = vsel %vm1527_vm0, %v2624_v57, %v2626_v47 }
 0x2e1   : > { %3114 = vst [vmem:[%s5588_s9 + $0x78] sm:$0xff] %v3086_v52  ;;  %v2694_v61 = vadd.f32 %v2627_v55, %v5536_v44  ;;  %v3020_v63 = vsel %vm1921_vm1, %v3017_v38, %v3019_v32  ;;  %v2510_v20 = vpop.f32.mrb[164].mxu0 }
 0x2e2   : > { %v2628_v50 = vrot.slane %v2510_v20, 1  ;;  %v2903_v59 = vpop.f32.mrb[164].mxu1  ;;  %v2512_v17 = vpop.f32.mrb[165].mxu0 }
 0x2e3   : > { %v3087_v25 = vadd.f32 %v3020_v63, %v2694_v61  ;;  %v3021_v22 = vrot.slane %v2903_v59, 2  ;;  %v2905_v11 = vpop.f32.mrb[165].mxu1 }
 0x2e4   : > { %v2629_v6 = vsel %vm1527_vm0, %v2626_v47, %v2628_v50 }
 0x2e5   : > { %3115 = vst [vmem:[%s5588_s9 + $0x80] sm:$0xff] %v3087_v25  ;;  %v2695_v34 = vadd.f32 %v2629_v6, %v5540_v8  ;;  %v3022_v31 = vsel %vm1921_vm1, %v3019_v32, %v3021_v22  ;;  %v2515_v51 = vpop.f32.mrb[166].mxu0 }
 0x2e6   : > { %v2630_v19 = vrot.slane %v2515_v51, 1  ;;  %v2908_v44 = vpop.f32.mrb[166].mxu1  ;;  %v2517_v39 = vpop.f32.mrb[167].mxu0 }
 0x2e7   : > { %v3088_v46 = vadd.f32 %v3022_v31, %v2695_v34  ;;  %v3023_v23 = vrot.slane %v2908_v44, 2  ;;  %v2910_v14 = vpop.f32.mrb[167].mxu1 }
 0x2e8   : > { %v2631_v33 = vsel %vm1527_vm0, %v2628_v50, %v2630_v19 }
 0x2e9   : > { %3116 = vst [vmem:[%s5588_s9 + $0x88] sm:$0xff] %v3088_v46  ;;  %v2696_v27 = vadd.f32 %v2631_v33, %v5544_v16  ;;  %v3024_v15 = vsel %vm1921_vm1, %v3021_v22, %v3023_v23  ;;  %v2520_v18 = vpop.f32.mrb[168].mxu0 }
 0x2ea   : > { %v2632_v4 = vrot.slane %v2520_v18, 1  ;;  %v2913_v8 = vpop.f32.mrb[168].mxu1  ;;  %v2522_v5 = vpop.f32.mrb[169].mxu0 }
 0x2eb   : > { %v3089_v0 = vadd.f32 %v3024_v15, %v2696_v27  ;;  %v3025_v7 = vrot.slane %v2913_v8, 2  ;;  %v2915_v35 = vpop.f32.mrb[169].mxu1 }
 0x2ec   : > { %v2633_v10 = vsel %vm1527_vm0, %v2630_v19, %v2632_v4 }
 0x2ed   : > { %3117 = vst [vmem:[%s5588_s9 + $0x90] sm:$0xff] %v3089_v0  ;;  %v2697_v43 = vadd.f32 %v2633_v10, %v5548_v21  ;;  %v3026_v42 = vsel %vm1921_vm1, %v3023_v23, %v3025_v7  ;;  %v2525_v30 = vpop.f32.mrb[170].mxu0 }
 0x2ee   : > { %v2634_v40 = vrot.slane %v2525_v30, 1  ;;  %v2918_v16 = vpop.f32.mrb[170].mxu1  ;;  %v2527_v28 = vpop.f32.mrb[171].mxu0 }
 0x2ef   : > { %v3090_v3 = vadd.f32 %v3026_v42, %v2697_v43  ;;  %v3027_v41 = vrot.slane %v2918_v16, 2  ;;  %v2920_v57 = vpop.f32.mrb[171].mxu1 }
 0x2f0   : > { %v2635_v48 = vsel %vm1527_vm0, %v2632_v4, %v2634_v40 }
 0x2f1   : > { %3118 = vst [vmem:[%s5588_s9 + $0x98] sm:$0xff] %v3090_v3  ;;  %v2698_v12 = vadd.f32 %v2635_v48, %v5552_v60  ;;  %v3028_v2 = vsel %vm1921_vm1, %v3025_v7, %v3027_v41  ;;  %v2530_v38 = vpop.f32.mrb[172].mxu0 }
 0x2f2   : > { %v2636_v9 = vrot.slane %v2530_v38, 1  ;;  %v2923_v21 = vpop.f32.mrb[172].mxu1  ;;  %v2532_v58 = vpop.f32.mrb[173].mxu0 }
 0x2f3   : > { %v3091_v53 = vadd.f32 %v3028_v2, %v2698_v12  ;;  %v3029_v62 = vrot.slane %v2923_v21, 2  ;;  %v2925_v37 = vpop.f32.mrb[173].mxu1 }
 0x2f4   : > { %v2637_v47 = vsel %vm1527_vm0, %v2634_v40, %v2636_v9 }
 0x2f5   : > { %3119 = vst [vmem:[%s5588_s9 + $0xa0] sm:$0xff] %v3091_v53  ;;  %v2699_v56 = vadd.f32 %v2637_v47, %v5556_v26  ;;  %v3030_v1 = vsel %vm1921_vm1, %v3027_v41, %v3029_v62  ;;  %v2535_v52 = vpop.f32.mrb[174].mxu0 }
 0x2f6   : > { %v2638_v32 = vrot.slane %v2535_v52, 1  ;;  %v2928_v60 = vpop.f32.mrb[174].mxu1  ;;  %v2537_v24 = vpop.f32.mrb[175].mxu0  ;;  %v3223_v52 = vld [vmem:[%s5588_s9 + $0x18] sm:$0xff] (%p3949_p5) }
 0x2f7   : > { %v3092_v55 = vadd.f32 %v3030_v1, %v2699_v56  ;;  %v3031_v61 = vrot.slane %v2928_v60, 2  ;;  %v2930_v63 = vpop.f32.mrb[175].mxu1  ;;  %v3221_v1 = vld [vmem:[%s5588_s9 + $0x10] sm:$0xff] (%p3949_p5)  ;;  %v3227_v60 = vld [vmem:[%s5588_s9 + $0x28] sm:$0xff] (%p3949_p5)  ;;  %3224 = vst [vmem:[%s5708_s17 + $0x30] sm:$0xff] (%p3949_p5), %v3223_v52 }
 0x2f8   : > { %v2639_v20 = vsel %vm1527_vm0, %v2636_v9, %v2638_v32  ;;  %3222 = vst [vmem:[%s5708_s17 + $0x20] sm:$0xff] (%p3949_p5), %v3221_v1  ;;  %3228 = vst [vmem:[%s5708_s17 + $0x50] sm:$0xff] (%p3949_p5), %v3227_v60  ;;  %v3229_v24 = vld [vmem:[%s5588_s9 + $0x30] sm:$0xff] (%p3949_p5)  ;;  %v3235_v63 = vld [vmem:[%s5588_s9 + $0x48] sm:$0xff] (%p3949_p5) }
 0x2f9   : > { %3120 = vst [vmem:[%s5588_s9 + $0xa8] sm:$0xff] %v3092_v55  ;;  %v2700_v50 = vadd.f32 %v2639_v20, %v5560_v36  ;;  %v3032_v59 = vsel %vm1921_vm1, %v3029_v62, %v3031_v61  ;;  %v2540_v17 = vpop.f32.mrb[176].mxu0  ;;  %v3231_v55 = vld [vmem:[%s5588_s9 + $0x38] sm:$0xff] (%p3949_p5)  ;;  %3230 = vst [vmem:[%s5708_s17 + $0x60] sm:$0xff] (%p3949_p5), %v3229_v24  ;;  %v3237_v20 = vld [vmem:[%s5588_s9 + $0x50] sm:$0xff] (%p3949_p5) }
 0x2fa   : > { %v2640_v25 = vrot.slane %v2540_v17, 1  ;;  %v2933_v26 = vpop.f32.mrb[176].mxu1  ;;  %v2542_v22 = vpop.f32.mrb[177].mxu0  ;;  %3232 = vst [vmem:[%s5708_s17 + $0x70] sm:$0xff] (%p3949_p5), %v3231_v55  ;;  %3236 = vst [vmem:[%s5708_s17 + $0x90] sm:$0xff] (%p3949_p5), %v3235_v63  ;;  %v3243_v17 = vld [vmem:[%s5588_s9 + $0x68] sm:$0xff] (%p3949_p5) }
 0x2fb   : > { %v3093_v11 = vadd.f32 %v3032_v59, %v2700_v50  ;;  %v3033_v6 = vrot.slane %v2933_v26, 2  ;;  %v2935_v34 = vpop.f32.mrb[177].mxu1  ;;  %v3239_v50 = vld [vmem:[%s5588_s9 + $0x58] sm:$0xff] (%p3949_p5)  ;;  %3238 = vst [vmem:[%s5708_s17 + $0xa0] sm:$0xff] (%p3949_p5), %v3237_v20  ;;  %v3241_v59 = vld [vmem:[%s5588_s9 + $0x60] sm:$0xff] (%p3949_p5)  ;;  %3244 = vst [vmem:[%s5708_s17 + $0xd0] sm:$0xff] (%p3949_p5), %v3243_v17 }
 0x2fc   : > { %v2641_v31 = vsel %vm1527_vm0, %v2638_v32, %v2640_v25  ;;  %v3225_v32 = vld [vmem:[%s5588_s9 + $0x20] sm:$0xff] (%p3949_p5)  ;;  %3240 = vst [vmem:[%s5708_s17 + $0xb0] sm:$0xff] (%p3949_p5), %v3239_v50  ;;  %3242 = vst [vmem:[%s5708_s17 + $0xc0] sm:$0xff] (%p3949_p5), %v3241_v59  ;;  %v3247_v26 = vld [vmem:[%s5588_s9 + $0x78] sm:$0xff] (%p3949_p5) }
 0x2fd   : > { %3121 = vst [vmem:[%s5588_s9 + $0xb0] sm:$0xff] %v3093_v11  ;;  %v2701_v51 = vadd.f32 %v2641_v31, %v5564_v13  ;;  %v3034_v19 = vsel %vm1921_vm1, %v3031_v61, %v3033_v6  ;;  %v2545_v44 = vpop.f32.mrb[178].mxu0  ;;  %3226 = vst [vmem:[%s5708_s17 + $0x40] sm:$0xff] (%p3949_p5), %v3225_v32  ;;  %v3233_v61 = vld [vmem:[%s5588_s9 + $0x40] sm:$0xff] (%p3949_p5)  ;;  %v3251_v11 = vld [vmem:[%s5588_s9 + $0x88] sm:$0xff] (%p3949_p5) }
 0x2fe   : > { %v2642_v39 = vrot.slane %v2545_v44, 1  ;;  %v2938_v36 = vpop.f32.mrb[178].mxu1  ;;  %v2547_v46 = vpop.f32.mrb[179].mxu0  ;;  %3234 = vst [vmem:[%s5708_s17 + $0x80] sm:$0xff] (%p3949_p5), %v3233_v61  ;;  %v3249_v22 = vld [vmem:[%s5588_s9 + $0x80] sm:$0xff] (%p3949_p5)  ;;  %3248 = vst [vmem:[%s5708_s17 + $0xf0] sm:$0xff] (%p3949_p5), %v3247_v26 }
 0x2ff   : > { %v3094_v23 = vadd.f32 %v3034_v19, %v2701_v51  ;;  %v3035_v14 = vrot.slane %v2938_v36, 2  ;;  %v2940_v33 = vpop.f32.mrb[179].mxu1  ;;  %3250 = vst [vmem:[%s5708_s17 + $0x100] sm:$0xff] (%p3949_p5), %v3249_v22  ;;  %3252 = vst [vmem:[%s5708_s17 + $0x110] sm:$0xff] (%p3949_p5), %v3251_v11  ;;  %v3255_v34 = vld [vmem:[%s5588_s9 + $0x98] sm:$0xff] (%p3949_p5)  ;;  %v3257_v31 = vld [vmem:[%s5588_s9 + $0xa0] sm:$0xff] (%p3949_p5) }
 0x300   : > { %v2643_v27 = vsel %vm1527_vm0, %v2640_v25, %v2642_v39  ;;  %v3245_v25 = vld [vmem:[%s5588_s9 + $0x70] sm:$0xff] (%p3949_p5)  ;;  %3256 = vst [vmem:[%s5708_s17 + $0x130] sm:$0xff] (%p3949_p5), %v3255_v34  ;;  %3258 = vst [vmem:[%s5708_s17 + $0x140] sm:$0xff] (%p3949_p5), %v3257_v31  ;;  %v3259_v51 = vld [vmem:[%s5588_s9 + $0xa8] sm:$0xff] (%p3949_p5) }
 0x301   : > { %3122 = vst [vmem:[%s5588_s9 + $0xb8] sm:$0xff] %v3094_v23  ;;  %v2702_v15 = vadd.f32 %v2643_v27, %v5568_v29  ;;  %v3036_v18 = vsel %vm1921_vm1, %v3033_v6, %v3035_v14  ;;  %v2550_v4 = vpop.f32.mrb[180].mxu0  ;;  %3246 = vst [vmem:[%s5708_s17 + $0xe0] sm:$0xff] (%p3949_p5), %v3245_v25  ;;  %v3253_v6 = vld [vmem:[%s5588_s9 + $0x90] sm:$0xff] (%p3949_p5) }
 0x302   : > { %v2644_v8 = vrot.slane %v2550_v4, 1  ;;  %v2943_v13 = vpop.f32.mrb[180].mxu1  ;;  %v2552_v5 = vpop.f32.mrb[181].mxu0  ;;  %3254 = vst [vmem:[%s5708_s17 + $0x120] sm:$0xff] (%p3949_p5), %v3253_v6  ;;  %3260 = vst [vmem:[%s5708_s17 + $0x150] sm:$0xff] (%p3949_p5), %v3259_v51 }
 0x303   : > { %v3095_v0 = vadd.f32 %v3036_v18, %v2702_v15  ;;  %v3037_v7 = vrot.slane %v2943_v13, 2  ;;  %v2945_v35 = vpop.f32.mrb[181].mxu1 }
 0x304   : > { %v2645_v10 = vsel %vm1527_vm0, %v2642_v39, %v2644_v8  ;;  %v3261_v19 = vld [vmem:[%s5588_s9 + $0xb0] sm:$0xff] (%p3949_p5) }
 0x305   : > { %3123 = vst [vmem:[%s5588_s9 + $0xc0] sm:$0xff] %v3095_v0  ;;  %v2703_v43 = vadd.f32 %v2645_v10, %v5572_v49  ;;  %v3038_v42 = vsel %vm1921_vm1, %v3035_v14, %v3037_v7  ;;  %v2555_v30 = vpop.f32.mrb[182].mxu0  ;;  %3262 = vst [vmem:[%s5708_s17 + $0x160] sm:$0xff] (%p3949_p5), %v3261_v19 }
 0x306   : > { %v2646_v40 = vrot.slane %v2555_v30, 1  ;;  %v2948_v29 = vpop.f32.mrb[182].mxu1  ;;  %v2557_v16 = vpop.f32.mrb[183].mxu0 }
 0x307   : > { %v3096_v28 = vadd.f32 %v3038_v42, %v2703_v43  ;;  %v3039_v3 = vrot.slane %v2948_v29, 2  ;;  %v2950_v41 = vpop.f32.mrb[183].mxu1 }
 0x308   : > { %v2647_v57 = vsel %vm1527_vm0, %v2644_v8, %v2646_v40  ;;  %v3263_v44 = vld [vmem:[%s5588_s9 + $0xb8] sm:$0xff] (%p3949_p5) }
 0x309   : > { %3124 = vst [vmem:[%s5588_s9 + $0xc8] sm:$0xff] %v3096_v28  ;;  %v2704_v48 = vadd.f32 %v2647_v57, %v5576_v54  ;;  %v3040_v12 = vsel %vm1921_vm1, %v3037_v7, %v3039_v3  ;;  %v2560_v2 = vpop.f32.mrb[184].mxu0  ;;  %v3217_v54 = vld [vmem:[%s5588_s9] sm:$0xff] (%p3949_p5)  ;;  %3264 = vst [vmem:[%s5708_s17 + $0x170] sm:$0xff] (%p3949_p5), %v3263_v44 }
 0x30a   : > { %v2648_v49 = vrot.slane %v2560_v2, 1  ;;  %v2953_v38 = vpop.f32.mrb[184].mxu1  ;;  %v2562_v9 = vpop.f32.mrb[185].mxu0  ;;  %3218 = vst [vmem:[%s5708_s17] sm:$0xff] (%p3949_p5), %v3217_v54 }
 0x30b   : > { %v3097_v21 = vadd.f32 %v3040_v12, %v2704_v48  ;;  %v3041_v58 = vrot.slane %v2953_v38, 2  ;;  %v2955_v53 = vpop.f32.mrb[185].mxu1  ;;  %3133 = sbr.rel (!%p3949_p5) target bundleno = 794 (0x31a), region = 70 }
 0x30c   : > { %v2649_v62 = vsel %vm1527_vm0, %v2646_v40, %v2648_v49  ;;  %v3265_v39 = vld [vmem:[%s5588_s9 + $0xc0] sm:$0xff] (%p3949_p5) }
 0x30d   : > { %3125 = vst [vmem:[%s5588_s9 + $0xd0] sm:$0xff] %v3097_v21  ;;  %v2705_v37 = vadd.f32 %v2649_v62, %v5580_v45  ;;  %v3042_v47 = vsel %vm1921_vm1, %v3039_v3, %v3041_v58  ;;  %v3219_v45 = vld [vmem:[%s5588_s9 + $0x8] sm:$0xff] (%p3949_p5)  ;;  %3266 = vst [vmem:[%s5708_s17 + $0x180] sm:$0xff] (%p3949_p5), %v3265_v39 }
 0x30e   : > { %3220 = vst [vmem:[%s5708_s17 + $0x10] sm:$0xff] (%p3949_p5), %v3219_v45 }
 0x30f   : > { %v3098_v56 = vadd.f32 %v3042_v47, %v2705_v37 }
 0x310   : > { %v3267_v36 = vld [vmem:[%s5588_s9 + $0xc8] sm:$0xff] (%p3949_p5) }
 0x311   : > { %3126 = vst [vmem:[%s5588_s9 + $0xd8] sm:$0xff] %v3098_v56  ;;  %3268 = vst [vmem:[%s5708_s17 + $0x190] sm:$0xff] (%p3949_p5), %v3267_v36 }
 0x314   : > { %v3269_v46 = vld [vmem:[%s5588_s9 + $0xd0] sm:$0xff] }
 0x315   : > { %3270 = vst [vmem:[%s5708_s17 + $0x1a0] sm:$0xff] %v3269_v46 }
 0x318   : > { %v3271_v23 = vld [vmem:[%s5588_s9 + $0xd8] sm:$0xff] }
 0x319   : > { %3272 = vst [vmem:[%s5708_s17 + $0x1b0] sm:$0xff] %v3271_v23 }
 0x31a PF: > { %p9_p10 = scmp.ge.s32.totalorder %s3936_s13, 4   ;;  %s5816_s9 = smov %s3897_s10 }
 0x31b   : > { %s5817_s10 = smov %s3947_s16  ;;  %s5818_s11 = smov %s3936_s13 }
 0x31c   :  { %11 = sbr.rel (!%p9_p10) target bundleno = 2 (0x2), region = 144 }

</bundles_post_ra>
